<compile_context>
chip_gen: v5e
topology: v5e:2x2
jax: 0.10.0
libtpu: 0.0.40
codegen_flags: <defaults>
</compile_context>

<pallas_src>
import functools

import jax
import jax.numpy as jnp
from jax.experimental import pallas as pl
from jax.experimental.pallas import tpu as pltpu


def _round_up(x, m):
    return ((x + m - 1) // m) * m


def _orphic_kernel(ids_ref, ids_rev_ref,        # scalar prefetch (SMEM)
                   *args,                       # inputs / output / scratch
                   tm, alpha, absence_factor, use_explicit_absence):
    if use_explicit_absence:
        (strength_ref, fwd_hbm, rev_hbm, iso_hbm,
         out_ref, rows, sem) = args
        presence_ref = None
        wT_ref = None
    else:
        (strength_ref, presence_ref, fwd_hbm, rev_hbm, iso_hbm, wT_ref,
         out_ref, rows, sem) = args

    i = pl.program_id(0)
    base = i * tm

    # --- Row gather: 3 tables x tm rows, one small (1, D) DMA each.  All copies
    # of a table share one DMA semaphore (paged-attention pattern): every copy
    # is in flight concurrently, then all are waited on.  No cross-step carried
    # DMA state, so the "parallel" grid axis stays safe for megacore sharding.
    copies = []
    for t in range(tm):
        tok = ids_ref[base + t]
        tok_rev = ids_rev_ref[base + t]
        for tbl, (hbm, row) in enumerate(
                ((fwd_hbm, tok), (rev_hbm, tok_rev), (iso_hbm, tok))):
            cp = pltpu.make_async_copy(hbm.at[pl.ds(row, 1)],
                                       rows.at[tbl, pl.ds(t, 1)],
                                       sem.at[tbl])
            cp.start()
            copies.append(cp)
    for cp in copies:
        cp.wait()

    fwd = rows[0]                 # (tm, D) f32
    rev = rows[1]                 # gathered at seq-flipped ids == torch.flip
    iso = rows[2]
    strength = strength_ref[...]  # (tm, 1) f32: rarity * isolation_factor

    # contextual + isolation, kept in f32 end-to-end.
    isolated = alpha * fwd + (1.0 - alpha) * rev + iso * strength

    if use_explicit_absence:
        out_ref[...] = isolated
    else:
        # absence_proj (nn.Linear, bias=False): x @ W.T with W.T precomputed in
        # the wrapper -> one clean (tm, D) @ (D, D) MXU matmul, no transpose.
        absence = jnp.dot(isolated, wT_ref[...],
                          preferred_element_type=jnp.float32)
        presence = presence_ref[...]          # (tm, 1) sigmoid(rarity * 2)
        out_ref[...] = (isolated * presence
                        - absence * ((1.0 - presence) * absence_factor))


def orphic_embedding_forward(tokens, params, *, alpha=0.5,
                             isolation_factor=0.3, absence_factor=0.1,
                             use_explicit_absence=True, token_tile=128):
    """tokens: (B, S) int32. Returns (B, S, D) float32."""
    fwd_tab = params['forward'].astype(jnp.float32)
    rev_tab = params['reverse'].astype(jnp.float32)
    iso_tab = params['isolation'].astype(jnp.float32)
    counts = params['counts'].astype(jnp.float32)

    B, S = tokens.shape
    V, D = fwd_tab.shape
    n_tok = B * S

    tokens = tokens.astype(jnp.int32)
    ids = tokens.reshape(-1)
    # torch.flip(reverse_embeds, dims=[1]) == gather reverse table at
    # seq-flipped token ids.
    ids_rev = tokens[:, ::-1].reshape(-1)

    # Hoisted token statistics: single rsqrt over the vocab, then O(n_tok)
    # gathers; the kernel never touches anything vocab-sized on the VPU/XLU.
    freqs = counts / (jnp.sum(counts) + 1e-6)
    rarity = jax.lax.rsqrt(freqs + 1e-6)                       # (V,) f32
    rar_tok = jnp.take(rarity, ids, axis=0)                    # (n_tok,) f32
    strength_tok = (rar_tok * isolation_factor).reshape(n_tok, 1)

    # Token tile: multiple of 8 sublanes (128 keeps the absence matmul
    # M-aligned at realistic sizes).  Pad the flat token axis to whole tiles;
    # pad rows gather token 0 and are sliced off afterwards.  VMEM per step is
    # ~(3 + 2) * tm * D * 4B, far under the scoped default on v5e/v6e/v7x.
    tm = _round_up(max(1, min(token_tile, n_tok)), 8)
    n_pad = _round_up(n_tok, tm)
    pad = n_pad - n_tok
    if pad:
        ids = jnp.pad(ids, (0, pad))
        ids_rev = jnp.pad(ids_rev, (0, pad))
        strength_tok = jnp.pad(strength_tok, ((0, pad), (0, 0)))

    kernel = functools.partial(
        _orphic_kernel, tm=tm, alpha=alpha, absence_factor=absence_factor,
        use_explicit_absence=use_explicit_absence)

    # Per-token vector inputs (BlockSpec-pipelined).
    vec_inputs = [strength_tok]
    vec_specs = [pl.BlockSpec((tm, 1), lambda i, ids, idr: (i, 0))]
    if not use_explicit_absence:
        presence_tok = jax.nn.sigmoid(rar_tok * 2.0).reshape(n_tok, 1)
        if pad:
            presence_tok = jnp.pad(presence_tok, ((0, pad), (0, 0)))
        vec_inputs.append(presence_tok)
        vec_specs.append(pl.BlockSpec((tm, 1), lambda i, ids, idr: (i, 0)))

    # Embedding tables stay in HBM; weight only shipped when actually used.
    tbl_inputs = [fwd_tab, rev_tab, iso_tab]
    tbl_specs = [pl.BlockSpec(memory_space=pl.ANY)] * 3
    if not use_explicit_absence:
        absence_wT = params['absence_w'].astype(jnp.float32).T   # (D_in, D_out)
        tbl_inputs.append(absence_wT)
        tbl_specs.append(pl.BlockSpec((D, D), lambda i, ids, idr: (0, 0)))

    out_flat = pl.pallas_call(
        kernel,
        out_shape=jax.ShapeDtypeStruct((n_pad, D), jnp.float32),
        grid_spec=pltpu.PrefetchScalarGridSpec(
            num_scalar_prefetch=2,                   # ids, ids_rev -> SMEM
            grid=(n_pad // tm,),
            in_specs=vec_specs + tbl_specs,
            out_specs=pl.BlockSpec((tm, D), lambda i, ids, idr: (i, 0)),
            scratch_shapes=[
                pltpu.VMEM((3, tm, D), jnp.float32),   # gathered rows
                pltpu.SemaphoreType.DMA((3,)),         # one DMA sem per table
            ],
        ),
        compiler_params=pltpu.CompilerParams(
            dimension_semantics=("parallel",),   # shard token tiles across TCs
        ),
    )(ids, ids_rev, *vec_inputs, *tbl_inputs)

    return out_flat[:n_tok].reshape(B, S, D)


def orphic_embedding_reference(tokens, params, *, alpha=0.5,
                               isolation_factor=0.3, absence_factor=0.1,
                               use_explicit_absence=True):
    counts = params['counts'].astype(jnp.float32)
    freqs = counts / (counts.sum() + 1e-6)
    rarity = jnp.sqrt(1.0 / (freqs + 1e-6))
    fwd = params['forward'][tokens]
    rev = params['reverse'][tokens][:, ::-1]          # ndim==2 -> flip seq dim
    contextual = alpha * fwd + (1.0 - alpha) * rev
    iso = params['isolation'][tokens]
    strength = rarity[tokens][..., None] * isolation_factor
    isolated = contextual + iso * strength
    if use_explicit_absence:
        return isolated
    absence = isolated @ params['absence_w'].T
    presence = jax.nn.sigmoid(rarity[tokens][..., None] * 2.0)
    return isolated * presence - absence * (1.0 - presence) * absence_factor


def init_params(key, vocab_size, embed_dim):
    k1, k2, k3, k4 = jax.random.split(key, 4)
    bound = 1.0 / (embed_dim ** 0.5)
    return {
        # nn.Embedding default init: N(0, 1)
        'forward': jax.random.normal(k1, (vocab_size, embed_dim), jnp.float32),
        'reverse': jax.random.normal(k2, (vocab_size, embed_dim), jnp.float32),
        # torch.randn(...) * 0.02
        'isolation': jax.random.normal(k3, (vocab_size, embed_dim),
                                       jnp.float32) * 0.02,
        # nn.Linear weight (synthetic uniform(+-1/sqrt(D)) init)
        'absence_w': jax.random.uniform(k4, (embed_dim, embed_dim),
                                        jnp.float32, -bound, bound),
        # registered buffer (zeros at construction; never updated for 2-D input)
        'counts': jnp.zeros((vocab_size,), jnp.float32),
    }


# TODO(synk): the stateful token_counts bincount update only fires for 1-D
# inputs in the original module (training-time buffer mutation) and is not part
# of the 2-D forward pass implemented here.

if __name__ == "__main__":
    vocab_size, embed_dim, context_window = 128, 128, 4
    batch, seq = 2, 8

    key = jax.random.PRNGKey(0)
    pkey, tkey, ckey = jax.random.split(key, 3)
    params = init_params(pkey, vocab_size, embed_dim)
    # Give the token-count buffer some history so rarity/presence vary.
    params['counts'] = jax.random.randint(ckey, (vocab_size,), 0, 50,
                                          jnp.int32).astype(jnp.float32)
    tokens = jax.random.randint(tkey, (batch, seq), 0, vocab_size, jnp.int32)

    # Default config (use_explicit_absence=True)
    out = orphic_embedding_forward(tokens, params)
    out = jax.block_until_ready(out)
    ref = orphic_embedding_reference(tokens, params)
    assert out.shape == (batch, seq, embed_dim)
    assert jnp.allclose(out, ref, atol=1e-3, rtol=1e-3), \
        float(jnp.max(jnp.abs(out - ref)))

    # Also exercise the absence-projection (Linear) path in-kernel.
    out2 = orphic_embedding_forward(tokens, params, use_explicit_absence=False)
    out2 = jax.block_until_ready(out2)
    ref2 = orphic_embedding_reference(tokens, params,
                                      use_explicit_absence=False)
    assert jnp.allclose(out2, ref2, atol=1e-3, rtol=1e-3), \
        float(jnp.max(jnp.abs(out2 - ref2)))

    print("KERNEL_OK")
</pallas_src>

<mosaic_0001>
module attributes {stable_mosaic.version = 11 : i64} {
  func.func @_orphic_kernel(%arg0: i32, %arg1: memref<16xi32, #tpu.memory_space<smem>>, %arg2: memref<16xi32, #tpu.memory_space<smem>>, %arg3: memref<16x1xf32, #tpu.memory_space<vmem>>, %arg4: memref<128x128xf32, #tpu.memory_space<any>>, %arg5: memref<128x128xf32, #tpu.memory_space<any>>, %arg6: memref<128x128xf32, #tpu.memory_space<any>>, %arg7: memref<16x128xf32, #tpu.memory_space<vmem>>, %arg8: memref<3x16x128xf32, #tpu.memory_space<vmem>>, %arg9: memref<3x!tpu.dma_semaphore, #tpu.memory_space<semaphore_mem>>) attributes {dimension_semantics = [#tpu.dimension_semantics<parallel>], iteration_bounds = array<i64: 1>, scalar_prefetch = 2 : i64, scratch_operands = 2 : i64, tpu.core_type = #tpu.core_type<tc>, window_params = [{transform_indices = @transform_0, window_bounds = array<i64: 16, 1>}, {}, {}, {}, {transform_indices = @transform_4, window_bounds = array<i64: 16, 128>}]} {
    %c16_i32 = arith.constant 16 : i32
    %0 = arith.muli %arg0, %c16_i32 : i32
    %c0_i32 = arith.constant 0 : i32
    %1 = arith.addi %0, %c0_i32 : i32
    %2 = arith.index_cast %1 : i32 to index
    %3 = memref.load %arg1[%2] : memref<16xi32, #tpu.memory_space<smem>>
    %c0_i32_0 = arith.constant 0 : i32
    %4 = arith.addi %0, %c0_i32_0 : i32
    %5 = arith.index_cast %4 : i32 to index
    %6 = memref.load %arg2[%5] : memref<16xi32, #tpu.memory_space<smem>>
    %c0_i32_1 = arith.constant 0 : i32
    %c0_i32_2 = arith.constant 0 : i32
    %c0_i32_3 = arith.constant 0 : i32
    %7 = tpu.memref_slice %arg4[%3, %c0_i32_3] : memref<128x128xf32, #tpu.memory_space<any>> -> memref<1x128xf32, #tpu.memory_space<any>>
    %c0_i32_4 = arith.constant 0 : i32
    %c0_i32_5 = arith.constant 0 : i32
    %8 = tpu.memref_slice %arg8[%c0_i32_1, %c0_i32_4, %c0_i32_5] : memref<3x16x128xf32, #tpu.memory_space<vmem>> -> memref<1x1x128xf32, #tpu.memory_space<vmem>>
    %9 = tpu.memref_squeeze %8 : memref<1x1x128xf32, #tpu.memory_space<vmem>> -> memref<1x128xf32, #tpu.memory_space<vmem>>
    %10 = tpu.memref_slice %arg9[%c0_i32_2] : memref<3x!tpu.dma_semaphore, #tpu.memory_space<semaphore_mem>> -> memref<1x!tpu.dma_semaphore, #tpu.memory_space<semaphore_mem>>
    %11 = tpu.memref_squeeze %10 : memref<1x!tpu.dma_semaphore, #tpu.memory_space<semaphore_mem>> -> memref<!tpu.dma_semaphore, #tpu.memory_space<semaphore_mem>>
    tpu.enqueue_dma source(%7 : memref<1x128xf32, #tpu.memory_space<any>>) target(%9 : memref<1x128xf32, #tpu.memory_space<vmem>>) target_semaphore(%11 : memref<!tpu.dma_semaphore, #tpu.memory_space<semaphore_mem>>)
    %c1_i32 = arith.constant 1 : i32
    %c1_i32_6 = arith.constant 1 : i32
    %c0_i32_7 = arith.constant 0 : i32
    %12 = tpu.memref_slice %arg5[%6, %c0_i32_7] : memref<128x128xf32, #tpu.memory_space<any>> -> memref<1x128xf32, #tpu.memory_space<any>>
    %c0_i32_8 = arith.constant 0 : i32
    %c0_i32_9 = arith.constant 0 : i32
    %13 = tpu.memref_slice %arg8[%c1_i32, %c0_i32_8, %c0_i32_9] : memref<3x16x128xf32, #tpu.memory_space<vmem>> -> memref<1x1x128xf32, #tpu.memory_space<vmem>>
    %14 = tpu.memref_squeeze %13 : memref<1x1x128xf32, #tpu.memory_space<vmem>> -> memref<1x128xf32, #tpu.memory_space<vmem>>
    %15 = tpu.memref_slice %arg9[%c1_i32_6] : memref<3x!tpu.dma_semaphore, #tpu.memory_space<semaphore_mem>> -> memref<1x!tpu.dma_semaphore, #tpu.memory_space<semaphore_mem>>
    %16 = tpu.memref_squeeze %15 : memref<1x!tpu.dma_semaphore, #tpu.memory_space<semaphore_mem>> -> memref<!tpu.dma_semaphore, #tpu.memory_space<semaphore_mem>>
    tpu.enqueue_dma source(%12 : memref<1x128xf32, #tpu.memory_space<any>>) target(%14 : memref<1x128xf32, #tpu.memory_space<vmem>>) target_semaphore(%16 : memref<!tpu.dma_semaphore, #tpu.memory_space<semaphore_mem>>)
    %c2_i32 = arith.constant 2 : i32
    %c2_i32_10 = arith.constant 2 : i32
    %c0_i32_11 = arith.constant 0 : i32
    %17 = tpu.memref_slice %arg6[%3, %c0_i32_11] : memref<128x128xf32, #tpu.memory_space<any>> -> memref<1x128xf32, #tpu.memory_space<any>>
    %c0_i32_12 = arith.constant 0 : i32
    %c0_i32_13 = arith.constant 0 : i32
    %18 = tpu.memref_slice %arg8[%c2_i32, %c0_i32_12, %c0_i32_13] : memref<3x16x128xf32, #tpu.memory_space<vmem>> -> memref<1x1x128xf32, #tpu.memory_space<vmem>>
    %19 = tpu.memref_squeeze %18 : memref<1x1x128xf32, #tpu.memory_space<vmem>> -> memref<1x128xf32, #tpu.memory_space<vmem>>
    %20 = tpu.memref_slice %arg9[%c2_i32_10] : memref<3x!tpu.dma_semaphore, #tpu.memory_space<semaphore_mem>> -> memref<1x!tpu.dma_semaphore, #tpu.memory_space<semaphore_mem>>
    %21 = tpu.memref_squeeze %20 : memref<1x!tpu.dma_semaphore, #tpu.memory_space<semaphore_mem>> -> memref<!tpu.dma_semaphore, #tpu.memory_space<semaphore_mem>>
    tpu.enqueue_dma source(%17 : memref<1x128xf32, #tpu.memory_space<any>>) target(%19 : memref<1x128xf32, #tpu.memory_space<vmem>>) target_semaphore(%21 : memref<!tpu.dma_semaphore, #tpu.memory_space<semaphore_mem>>)
    %c1_i32_14 = arith.constant 1 : i32
    %22 = arith.addi %0, %c1_i32_14 : i32
    %23 = arith.index_cast %22 : i32 to index
    %24 = memref.load %arg1[%23] : memref<16xi32, #tpu.memory_space<smem>>
    %c1_i32_15 = arith.constant 1 : i32
    %25 = arith.addi %0, %c1_i32_15 : i32
    %26 = arith.index_cast %25 : i32 to index
    %27 = memref.load %arg2[%26] : memref<16xi32, #tpu.memory_space<smem>>
    %c0_i32_16 = arith.constant 0 : i32
    %c0_i32_17 = arith.constant 0 : i32
    %c0_i32_18 = arith.constant 0 : i32
    %28 = tpu.memref_slice %arg4[%24, %c0_i32_18] : memref<128x128xf32, #tpu.memory_space<any>> -> memref<1x128xf32, #tpu.memory_space<any>>
    %c1_i32_19 = arith.constant 1 : i32
    %c0_i32_20 = arith.constant 0 : i32
    %29 = tpu.memref_slice %arg8[%c0_i32_16, %c1_i32_19, %c0_i32_20] : memref<3x16x128xf32, #tpu.memory_space<vmem>> -> memref<1x1x128xf32, #tpu.memory_space<vmem>>
    %30 = tpu.memref_squeeze %29 : memref<1x1x128xf32, #tpu.memory_space<vmem>> -> memref<1x128xf32, #tpu.memory_space<vmem>>
    %31 = tpu.memref_slice %arg9[%c0_i32_17] : memref<3x!tpu.dma_semaphore, #tpu.memory_space<semaphore_mem>> -> memref<1x!tpu.dma_semaphore, #tpu.memory_space<semaphore_mem>>
    %32 = tpu.memref_squeeze %31 : memref<1x!tpu.dma_semaphore, #tpu.memory_space<semaphore_mem>> -> memref<!tpu.dma_semaphore, #tpu.memory_space<semaphore_mem>>
    tpu.enqueue_dma source(%28 : memref<1x128xf32, #tpu.memory_space<any>>) target(%30 : memref<1x128xf32, #tpu.memory_space<vmem>>) target_semaphore(%32 : memref<!tpu.dma_semaphore, #tpu.memory_space<semaphore_mem>>)
    %c1_i32_21 = arith.constant 1 : i32
    %c1_i32_22 = arith.constant 1 : i32
    %c0_i32_23 = arith.constant 0 : i32
    %33 = tpu.memref_slice %arg5[%27, %c0_i32_23] : memref<128x128xf32, #tpu.memory_space<any>> -> memref<1x128xf32, #tpu.memory_space<any>>
    %c1_i32_24 = arith.constant 1 : i32
    %c0_i32_25 = arith.constant 0 : i32
    %34 = tpu.memref_slice %arg8[%c1_i32_21, %c1_i32_24, %c0_i32_25] : memref<3x16x128xf32, #tpu.memory_space<vmem>> -> memref<1x1x128xf32, #tpu.memory_space<vmem>>
    %35 = tpu.memref_squeeze %34 : memref<1x1x128xf32, #tpu.memory_space<vmem>> -> memref<1x128xf32, #tpu.memory_space<vmem>>
    %36 = tpu.memref_slice %arg9[%c1_i32_22] : memref<3x!tpu.dma_semaphore, #tpu.memory_space<semaphore_mem>> -> memref<1x!tpu.dma_semaphore, #tpu.memory_space<semaphore_mem>>
    %37 = tpu.memref_squeeze %36 : memref<1x!tpu.dma_semaphore, #tpu.memory_space<semaphore_mem>> -> memref<!tpu.dma_semaphore, #tpu.memory_space<semaphore_mem>>
    tpu.enqueue_dma source(%33 : memref<1x128xf32, #tpu.memory_space<any>>) target(%35 : memref<1x128xf32, #tpu.memory_space<vmem>>) target_semaphore(%37 : memref<!tpu.dma_semaphore, #tpu.memory_space<semaphore_mem>>)
    %c2_i32_26 = arith.constant 2 : i32
    %c2_i32_27 = arith.constant 2 : i32
    %c0_i32_28 = arith.constant 0 : i32
    %38 = tpu.memref_slice %arg6[%24, %c0_i32_28] : memref<128x128xf32, #tpu.memory_space<any>> -> memref<1x128xf32, #tpu.memory_space<any>>
    %c1_i32_29 = arith.constant 1 : i32
    %c0_i32_30 = arith.constant 0 : i32
    %39 = tpu.memref_slice %arg8[%c2_i32_26, %c1_i32_29, %c0_i32_30] : memref<3x16x128xf32, #tpu.memory_space<vmem>> -> memref<1x1x128xf32, #tpu.memory_space<vmem>>
    %40 = tpu.memref_squeeze %39 : memref<1x1x128xf32, #tpu.memory_space<vmem>> -> memref<1x128xf32, #tpu.memory_space<vmem>>
    %41 = tpu.memref_slice %arg9[%c2_i32_27] : memref<3x!tpu.dma_semaphore, #tpu.memory_space<semaphore_mem>> -> memref<1x!tpu.dma_semaphore, #tpu.memory_space<semaphore_mem>>
    %42 = tpu.memref_squeeze %41 : memref<1x!tpu.dma_semaphore, #tpu.memory_space<semaphore_mem>> -> memref<!tpu.dma_semaphore, #tpu.memory_space<semaphore_mem>>
    tpu.enqueue_dma source(%38 : memref<1x128xf32, #tpu.memory_space<any>>) target(%40 : memref<1x128xf32, #tpu.memory_space<vmem>>) target_semaphore(%42 : memref<!tpu.dma_semaphore, #tpu.memory_space<semaphore_mem>>)
    %c2_i32_31 = arith.constant 2 : i32
    %43 = arith.addi %0, %c2_i32_31 : i32
    %44 = arith.index_cast %43 : i32 to index
    %45 = memref.load %arg1[%44] : memref<16xi32, #tpu.memory_space<smem>>
    %c2_i32_32 = arith.constant 2 : i32
    %46 = arith.addi %0, %c2_i32_32 : i32
    %47 = arith.index_cast %46 : i32 to index
    %48 = memref.load %arg2[%47] : memref<16xi32, #tpu.memory_space<smem>>
    %c0_i32_33 = arith.constant 0 : i32
    %c0_i32_34 = arith.constant 0 : i32
    %c0_i32_35 = arith.constant 0 : i32
    %49 = tpu.memref_slice %arg4[%45, %c0_i32_35] : memref<128x128xf32, #tpu.memory_space<any>> -> memref<1x128xf32, #tpu.memory_space<any>>
    %c2_i32_36 = arith.constant 2 : i32
    %c0_i32_37 = arith.constant 0 : i32
    %50 = tpu.memref_slice %arg8[%c0_i32_33, %c2_i32_36, %c0_i32_37] : memref<3x16x128xf32, #tpu.memory_space<vmem>> -> memref<1x1x128xf32, #tpu.memory_space<vmem>>
    %51 = tpu.memref_squeeze %50 : memref<1x1x128xf32, #tpu.memory_space<vmem>> -> memref<1x128xf32, #tpu.memory_space<vmem>>
    %52 = tpu.memref_slice %arg9[%c0_i32_34] : memref<3x!tpu.dma_semaphore, #tpu.memory_space<semaphore_mem>> -> memref<1x!tpu.dma_semaphore, #tpu.memory_space<semaphore_mem>>
    %53 = tpu.memref_squeeze %52 : memref<1x!tpu.dma_semaphore, #tpu.memory_space<semaphore_mem>> -> memref<!tpu.dma_semaphore, #tpu.memory_space<semaphore_mem>>
    tpu.enqueue_dma source(%49 : memref<1x128xf32, #tpu.memory_space<any>>) target(%51 : memref<1x128xf32, #tpu.memory_space<vmem>>) target_semaphore(%53 : memref<!tpu.dma_semaphore, #tpu.memory_space<semaphore_mem>>)
    %c1_i32_38 = arith.constant 1 : i32
    %c1_i32_39 = arith.constant 1 : i32
    %c0_i32_40 = arith.constant 0 : i32
    %54 = tpu.memref_slice %arg5[%48, %c0_i32_40] : memref<128x128xf32, #tpu.memory_space<any>> -> memref<1x128xf32, #tpu.memory_space<any>>
    %c2_i32_41 = arith.constant 2 : i32
    %c0_i32_42 = arith.constant 0 : i32
    %55 = tpu.memref_slice %arg8[%c1_i32_38, %c2_i32_41, %c0_i32_42] : memref<3x16x128xf32, #tpu.memory_space<vmem>> -> memref<1x1x128xf32, #tpu.memory_space<vmem>>
    %56 = tpu.memref_squeeze %55 : memref<1x1x128xf32, #tpu.memory_space<vmem>> -> memref<1x128xf32, #tpu.memory_space<vmem>>
    %57 = tpu.memref_slice %arg9[%c1_i32_39] : memref<3x!tpu.dma_semaphore, #tpu.memory_space<semaphore_mem>> -> memref<1x!tpu.dma_semaphore, #tpu.memory_space<semaphore_mem>>
    %58 = tpu.memref_squeeze %57 : memref<1x!tpu.dma_semaphore, #tpu.memory_space<semaphore_mem>> -> memref<!tpu.dma_semaphore, #tpu.memory_space<semaphore_mem>>
    tpu.enqueue_dma source(%54 : memref<1x128xf32, #tpu.memory_space<any>>) target(%56 : memref<1x128xf32, #tpu.memory_space<vmem>>) target_semaphore(%58 : memref<!tpu.dma_semaphore, #tpu.memory_space<semaphore_mem>>)
    %c2_i32_43 = arith.constant 2 : i32
    %c2_i32_44 = arith.constant 2 : i32
    %c0_i32_45 = arith.constant 0 : i32
    %59 = tpu.memref_slice %arg6[%45, %c0_i32_45] : memref<128x128xf32, #tpu.memory_space<any>> -> memref<1x128xf32, #tpu.memory_space<any>>
    %c2_i32_46 = arith.constant 2 : i32
    %c0_i32_47 = arith.constant 0 : i32
    %60 = tpu.memref_slice %arg8[%c2_i32_43, %c2_i32_46, %c0_i32_47] : memref<3x16x128xf32, #tpu.memory_space<vmem>> -> memref<1x1x128xf32, #tpu.memory_space<vmem>>
    %61 = tpu.memref_squeeze %60 : memref<1x1x128xf32, #tpu.memory_space<vmem>> -> memref<1x128xf32, #tpu.memory_space<vmem>>
    %62 = tpu.memref_slice %arg9[%c2_i32_44] : memref<3x!tpu.dma_semaphore, #tpu.memory_space<semaphore_mem>> -> memref<1x!tpu.dma_semaphore, #tpu.memory_space<semaphore_mem>>
    %63 = tpu.memref_squeeze %62 : memref<1x!tpu.dma_semaphore, #tpu.memory_space<semaphore_mem>> -> memref<!tpu.dma_semaphore, #tpu.memory_space<semaphore_mem>>
    tpu.enqueue_dma source(%59 : memref<1x128xf32, #tpu.memory_space<any>>) target(%61 : memref<1x128xf32, #tpu.memory_space<vmem>>) target_semaphore(%63 : memref<!tpu.dma_semaphore, #tpu.memory_space<semaphore_mem>>)
    %c3_i32 = arith.constant 3 : i32
    %64 = arith.addi %0, %c3_i32 : i32
    %65 = arith.index_cast %64 : i32 to index
    %66 = memref.load %arg1[%65] : memref<16xi32, #tpu.memory_space<smem>>
    %c3_i32_48 = arith.constant 3 : i32
    %67 = arith.addi %0, %c3_i32_48 : i32
    %68 = arith.index_cast %67 : i32 to index
    %69 = memref.load %arg2[%68] : memref<16xi32, #tpu.memory_space<smem>>
    %c0_i32_49 = arith.constant 0 : i32
    %c0_i32_50 = arith.constant 0 : i32
    %c0_i32_51 = arith.constant 0 : i32
    %70 = tpu.memref_slice %arg4[%66, %c0_i32_51] : memref<128x128xf32, #tpu.memory_space<any>> -> memref<1x128xf32, #tpu.memory_space<any>>
    %c3_i32_52 = arith.constant 3 : i32
    %c0_i32_53 = arith.constant 0 : i32
    %71 = tpu.memref_slice %arg8[%c0_i32_49, %c3_i32_52, %c0_i32_53] : memref<3x16x128xf32, #tpu.memory_space<vmem>> -> memref<1x1x128xf32, #tpu.memory_space<vmem>>
    %72 = tpu.memref_squeeze %71 : memref<1x1x128xf32, #tpu.memory_space<vmem>> -> memref<1x128xf32, #tpu.memory_space<vmem>>
    %73 = tpu.memref_slice %arg9[%c0_i32_50] : memref<3x!tpu.dma_semaphore, #tpu.memory_space<semaphore_mem>> -> memref<1x!tpu.dma_semaphore, #tpu.memory_space<semaphore_mem>>
    %74 = tpu.memref_squeeze %73 : memref<1x!tpu.dma_semaphore, #tpu.memory_space<semaphore_mem>> -> memref<!tpu.dma_semaphore, #tpu.memory_space<semaphore_mem>>
    tpu.enqueue_dma source(%70 : memref<1x128xf32, #tpu.memory_space<any>>) target(%72 : memref<1x128xf32, #tpu.memory_space<vmem>>) target_semaphore(%74 : memref<!tpu.dma_semaphore, #tpu.memory_space<semaphore_mem>>)
    %c1_i32_54 = arith.constant 1 : i32
    %c1_i32_55 = arith.constant 1 : i32
    %c0_i32_56 = arith.constant 0 : i32
    %75 = tpu.memref_slice %arg5[%69, %c0_i32_56] : memref<128x128xf32, #tpu.memory_space<any>> -> memref<1x128xf32, #tpu.memory_space<any>>
    %c3_i32_57 = arith.constant 3 : i32
    %c0_i32_58 = arith.constant 0 : i32
    %76 = tpu.memref_slice %arg8[%c1_i32_54, %c3_i32_57, %c0_i32_58] : memref<3x16x128xf32, #tpu.memory_space<vmem>> -> memref<1x1x128xf32, #tpu.memory_space<vmem>>
    %77 = tpu.memref_squeeze %76 : memref<1x1x128xf32, #tpu.memory_space<vmem>> -> memref<1x128xf32, #tpu.memory_space<vmem>>
    %78 = tpu.memref_slice %arg9[%c1_i32_55] : memref<3x!tpu.dma_semaphore, #tpu.memory_space<semaphore_mem>> -> memref<1x!tpu.dma_semaphore, #tpu.memory_space<semaphore_mem>>
    %79 = tpu.memref_squeeze %78 : memref<1x!tpu.dma_semaphore, #tpu.memory_space<semaphore_mem>> -> memref<!tpu.dma_semaphore, #tpu.memory_space<semaphore_mem>>
    tpu.enqueue_dma source(%75 : memref<1x128xf32, #tpu.memory_space<any>>) target(%77 : memref<1x128xf32, #tpu.memory_space<vmem>>) target_semaphore(%79 : memref<!tpu.dma_semaphore, #tpu.memory_space<semaphore_mem>>)
    %c2_i32_59 = arith.constant 2 : i32
    %c2_i32_60 = arith.constant 2 : i32
    %c0_i32_61 = arith.constant 0 : i32
    %80 = tpu.memref_slice %arg6[%66, %c0_i32_61] : memref<128x128xf32, #tpu.memory_space<any>> -> memref<1x128xf32, #tpu.memory_space<any>>
    %c3_i32_62 = arith.constant 3 : i32
    %c0_i32_63 = arith.constant 0 : i32
    %81 = tpu.memref_slice %arg8[%c2_i32_59, %c3_i32_62, %c0_i32_63] : memref<3x16x128xf32, #tpu.memory_space<vmem>> -> memref<1x1x128xf32, #tpu.memory_space<vmem>>
    %82 = tpu.memref_squeeze %81 : memref<1x1x128xf32, #tpu.memory_space<vmem>> -> memref<1x128xf32, #tpu.memory_space<vmem>>
    %83 = tpu.memref_slice %arg9[%c2_i32_60] : memref<3x!tpu.dma_semaphore, #tpu.memory_space<semaphore_mem>> -> memref<1x!tpu.dma_semaphore, #tpu.memory_space<semaphore_mem>>
    %84 = tpu.memref_squeeze %83 : memref<1x!tpu.dma_semaphore, #tpu.memory_space<semaphore_mem>> -> memref<!tpu.dma_semaphore, #tpu.memory_space<semaphore_mem>>
    tpu.enqueue_dma source(%80 : memref<1x128xf32, #tpu.memory_space<any>>) target(%82 : memref<1x128xf32, #tpu.memory_space<vmem>>) target_semaphore(%84 : memref<!tpu.dma_semaphore, #tpu.memory_space<semaphore_mem>>)
    %c4_i32 = arith.constant 4 : i32
    %85 = arith.addi %0, %c4_i32 : i32
    %86 = arith.index_cast %85 : i32 to index
    %87 = memref.load %arg1[%86] : memref<16xi32, #tpu.memory_space<smem>>
    %c4_i32_64 = arith.constant 4 : i32
    %88 = arith.addi %0, %c4_i32_64 : i32
    %89 = arith.index_cast %88 : i32 to index
    %90 = memref.load %arg2[%89] : memref<16xi32, #tpu.memory_space<smem>>
    %c0_i32_65 = arith.constant 0 : i32
    %c0_i32_66 = arith.constant 0 : i32
    %c0_i32_67 = arith.constant 0 : i32
    %91 = tpu.memref_slice %arg4[%87, %c0_i32_67] : memref<128x128xf32, #tpu.memory_space<any>> -> memref<1x128xf32, #tpu.memory_space<any>>
    %c4_i32_68 = arith.constant 4 : i32
    %c0_i32_69 = arith.constant 0 : i32
    %92 = tpu.memref_slice %arg8[%c0_i32_65, %c4_i32_68, %c0_i32_69] : memref<3x16x128xf32, #tpu.memory_space<vmem>> -> memref<1x1x128xf32, #tpu.memory_space<vmem>>
    %93 = tpu.memref_squeeze %92 : memref<1x1x128xf32, #tpu.memory_space<vmem>> -> memref<1x128xf32, #tpu.memory_space<vmem>>
    %94 = tpu.memref_slice %arg9[%c0_i32_66] : memref<3x!tpu.dma_semaphore, #tpu.memory_space<semaphore_mem>> -> memref<1x!tpu.dma_semaphore, #tpu.memory_space<semaphore_mem>>
    %95 = tpu.memref_squeeze %94 : memref<1x!tpu.dma_semaphore, #tpu.memory_space<semaphore_mem>> -> memref<!tpu.dma_semaphore, #tpu.memory_space<semaphore_mem>>
    tpu.enqueue_dma source(%91 : memref<1x128xf32, #tpu.memory_space<any>>) target(%93 : memref<1x128xf32, #tpu.memory_space<vmem>>) target_semaphore(%95 : memref<!tpu.dma_semaphore, #tpu.memory_space<semaphore_mem>>)
    %c1_i32_70 = arith.constant 1 : i32
    %c1_i32_71 = arith.constant 1 : i32
    %c0_i32_72 = arith.constant 0 : i32
    %96 = tpu.memref_slice %arg5[%90, %c0_i32_72] : memref<128x128xf32, #tpu.memory_space<any>> -> memref<1x128xf32, #tpu.memory_space<any>>
    %c4_i32_73 = arith.constant 4 : i32
    %c0_i32_74 = arith.constant 0 : i32
    %97 = tpu.memref_slice %arg8[%c1_i32_70, %c4_i32_73, %c0_i32_74] : memref<3x16x128xf32, #tpu.memory_space<vmem>> -> memref<1x1x128xf32, #tpu.memory_space<vmem>>
    %98 = tpu.memref_squeeze %97 : memref<1x1x128xf32, #tpu.memory_space<vmem>> -> memref<1x128xf32, #tpu.memory_space<vmem>>
    %99 = tpu.memref_slice %arg9[%c1_i32_71] : memref<3x!tpu.dma_semaphore, #tpu.memory_space<semaphore_mem>> -> memref<1x!tpu.dma_semaphore, #tpu.memory_space<semaphore_mem>>
    %100 = tpu.memref_squeeze %99 : memref<1x!tpu.dma_semaphore, #tpu.memory_space<semaphore_mem>> -> memref<!tpu.dma_semaphore, #tpu.memory_space<semaphore_mem>>
    tpu.enqueue_dma source(%96 : memref<1x128xf32, #tpu.memory_space<any>>) target(%98 : memref<1x128xf32, #tpu.memory_space<vmem>>) target_semaphore(%100 : memref<!tpu.dma_semaphore, #tpu.memory_space<semaphore_mem>>)
    %c2_i32_75 = arith.constant 2 : i32
    %c2_i32_76 = arith.constant 2 : i32
    %c0_i32_77 = arith.constant 0 : i32
    %101 = tpu.memref_slice %arg6[%87, %c0_i32_77] : memref<128x128xf32, #tpu.memory_space<any>> -> memref<1x128xf32, #tpu.memory_space<any>>
    %c4_i32_78 = arith.constant 4 : i32
    %c0_i32_79 = arith.constant 0 : i32
    %102 = tpu.memref_slice %arg8[%c2_i32_75, %c4_i32_78, %c0_i32_79] : memref<3x16x128xf32, #tpu.memory_space<vmem>> -> memref<1x1x128xf32, #tpu.memory_space<vmem>>
    %103 = tpu.memref_squeeze %102 : memref<1x1x128xf32, #tpu.memory_space<vmem>> -> memref<1x128xf32, #tpu.memory_space<vmem>>
    %104 = tpu.memref_slice %arg9[%c2_i32_76] : memref<3x!tpu.dma_semaphore, #tpu.memory_space<semaphore_mem>> -> memref<1x!tpu.dma_semaphore, #tpu.memory_space<semaphore_mem>>
    %105 = tpu.memref_squeeze %104 : memref<1x!tpu.dma_semaphore, #tpu.memory_space<semaphore_mem>> -> memref<!tpu.dma_semaphore, #tpu.memory_space<semaphore_mem>>
    tpu.enqueue_dma source(%101 : memref<1x128xf32, #tpu.memory_space<any>>) target(%103 : memref<1x128xf32, #tpu.memory_space<vmem>>) target_semaphore(%105 : memref<!tpu.dma_semaphore, #tpu.memory_space<semaphore_mem>>)
    %c5_i32 = arith.constant 5 : i32
    %106 = arith.addi %0, %c5_i32 : i32
    %107 = arith.index_cast %106 : i32 to index
    %108 = memref.load %arg1[%107] : memref<16xi32, #tpu.memory_space<smem>>
    %c5_i32_80 = arith.constant 5 : i32
    %109 = arith.addi %0, %c5_i32_80 : i32
    %110 = arith.index_cast %109 : i32 to index
    %111 = memref.load %arg2[%110] : memref<16xi32, #tpu.memory_space<smem>>
    %c0_i32_81 = arith.constant 0 : i32
    %c0_i32_82 = arith.constant 0 : i32
    %c0_i32_83 = arith.constant 0 : i32
    %112 = tpu.memref_slice %arg4[%108, %c0_i32_83] : memref<128x128xf32, #tpu.memory_space<any>> -> memref<1x128xf32, #tpu.memory_space<any>>
    %c5_i32_84 = arith.constant 5 : i32
    %c0_i32_85 = arith.constant 0 : i32
    %113 = tpu.memref_slice %arg8[%c0_i32_81, %c5_i32_84, %c0_i32_85] : memref<3x16x128xf32, #tpu.memory_space<vmem>> -> memref<1x1x128xf32, #tpu.memory_space<vmem>>
    %114 = tpu.memref_squeeze %113 : memref<1x1x128xf32, #tpu.memory_space<vmem>> -> memref<1x128xf32, #tpu.memory_space<vmem>>
    %115 = tpu.memref_slice %arg9[%c0_i32_82] : memref<3x!tpu.dma_semaphore, #tpu.memory_space<semaphore_mem>> -> memref<1x!tpu.dma_semaphore, #tpu.memory_space<semaphore_mem>>
    %116 = tpu.memref_squeeze %115 : memref<1x!tpu.dma_semaphore, #tpu.memory_space<semaphore_mem>> -> memref<!tpu.dma_semaphore, #tpu.memory_space<semaphore_mem>>
    tpu.enqueue_dma source(%112 : memref<1x128xf32, #tpu.memory_space<any>>) target(%114 : memref<1x128xf32, #tpu.memory_space<vmem>>) target_semaphore(%116 : memref<!tpu.dma_semaphore, #tpu.memory_space<semaphore_mem>>)
    %c1_i32_86 = arith.constant 1 : i32
    %c1_i32_87 = arith.constant 1 : i32
    %c0_i32_88 = arith.constant 0 : i32
    %117 = tpu.memref_slice %arg5[%111, %c0_i32_88] : memref<128x128xf32, #tpu.memory_space<any>> -> memref<1x128xf32, #tpu.memory_space<any>>
    %c5_i32_89 = arith.constant 5 : i32
    %c0_i32_90 = arith.constant 0 : i32
    %118 = tpu.memref_slice %arg8[%c1_i32_86, %c5_i32_89, %c0_i32_90] : memref<3x16x128xf32, #tpu.memory_space<vmem>> -> memref<1x1x128xf32, #tpu.memory_space<vmem>>
    %119 = tpu.memref_squeeze %118 : memref<1x1x128xf32, #tpu.memory_space<vmem>> -> memref<1x128xf32, #tpu.memory_space<vmem>>
    %120 = tpu.memref_slice %arg9[%c1_i32_87] : memref<3x!tpu.dma_semaphore, #tpu.memory_space<semaphore_mem>> -> memref<1x!tpu.dma_semaphore, #tpu.memory_space<semaphore_mem>>
    %121 = tpu.memref_squeeze %120 : memref<1x!tpu.dma_semaphore, #tpu.memory_space<semaphore_mem>> -> memref<!tpu.dma_semaphore, #tpu.memory_space<semaphore_mem>>
    tpu.enqueue_dma source(%117 : memref<1x128xf32, #tpu.memory_space<any>>) target(%119 : memref<1x128xf32, #tpu.memory_space<vmem>>) target_semaphore(%121 : memref<!tpu.dma_semaphore, #tpu.memory_space<semaphore_mem>>)
    %c2_i32_91 = arith.constant 2 : i32
    %c2_i32_92 = arith.constant 2 : i32
    %c0_i32_93 = arith.constant 0 : i32
    %122 = tpu.memref_slice %arg6[%108, %c0_i32_93] : memref<128x128xf32, #tpu.memory_space<any>> -> memref<1x128xf32, #tpu.memory_space<any>>
    %c5_i32_94 = arith.constant 5 : i32
    %c0_i32_95 = arith.constant 0 : i32
    %123 = tpu.memref_slice %arg8[%c2_i32_91, %c5_i32_94, %c0_i32_95] : memref<3x16x128xf32, #tpu.memory_space<vmem>> -> memref<1x1x128xf32, #tpu.memory_space<vmem>>
    %124 = tpu.memref_squeeze %123 : memref<1x1x128xf32, #tpu.memory_space<vmem>> -> memref<1x128xf32, #tpu.memory_space<vmem>>
    %125 = tpu.memref_slice %arg9[%c2_i32_92] : memref<3x!tpu.dma_semaphore, #tpu.memory_space<semaphore_mem>> -> memref<1x!tpu.dma_semaphore, #tpu.memory_space<semaphore_mem>>
    %126 = tpu.memref_squeeze %125 : memref<1x!tpu.dma_semaphore, #tpu.memory_space<semaphore_mem>> -> memref<!tpu.dma_semaphore, #tpu.memory_space<semaphore_mem>>
    tpu.enqueue_dma source(%122 : memref<1x128xf32, #tpu.memory_space<any>>) target(%124 : memref<1x128xf32, #tpu.memory_space<vmem>>) target_semaphore(%126 : memref<!tpu.dma_semaphore, #tpu.memory_space<semaphore_mem>>)
    %c6_i32 = arith.constant 6 : i32
    %127 = arith.addi %0, %c6_i32 : i32
    %128 = arith.index_cast %127 : i32 to index
    %129 = memref.load %arg1[%128] : memref<16xi32, #tpu.memory_space<smem>>
    %c6_i32_96 = arith.constant 6 : i32
    %130 = arith.addi %0, %c6_i32_96 : i32
    %131 = arith.index_cast %130 : i32 to index
    %132 = memref.load %arg2[%131] : memref<16xi32, #tpu.memory_space<smem>>
    %c0_i32_97 = arith.constant 0 : i32
    %c0_i32_98 = arith.constant 0 : i32
    %c0_i32_99 = arith.constant 0 : i32
    %133 = tpu.memref_slice %arg4[%129, %c0_i32_99] : memref<128x128xf32, #tpu.memory_space<any>> -> memref<1x128xf32, #tpu.memory_space<any>>
    %c6_i32_100 = arith.constant 6 : i32
    %c0_i32_101 = arith.constant 0 : i32
    %134 = tpu.memref_slice %arg8[%c0_i32_97, %c6_i32_100, %c0_i32_101] : memref<3x16x128xf32, #tpu.memory_space<vmem>> -> memref<1x1x128xf32, #tpu.memory_space<vmem>>
    %135 = tpu.memref_squeeze %134 : memref<1x1x128xf32, #tpu.memory_space<vmem>> -> memref<1x128xf32, #tpu.memory_space<vmem>>
    %136 = tpu.memref_slice %arg9[%c0_i32_98] : memref<3x!tpu.dma_semaphore, #tpu.memory_space<semaphore_mem>> -> memref<1x!tpu.dma_semaphore, #tpu.memory_space<semaphore_mem>>
    %137 = tpu.memref_squeeze %136 : memref<1x!tpu.dma_semaphore, #tpu.memory_space<semaphore_mem>> -> memref<!tpu.dma_semaphore, #tpu.memory_space<semaphore_mem>>
    tpu.enqueue_dma source(%133 : memref<1x128xf32, #tpu.memory_space<any>>) target(%135 : memref<1x128xf32, #tpu.memory_space<vmem>>) target_semaphore(%137 : memref<!tpu.dma_semaphore, #tpu.memory_space<semaphore_mem>>)
    %c1_i32_102 = arith.constant 1 : i32
    %c1_i32_103 = arith.constant 1 : i32
    %c0_i32_104 = arith.constant 0 : i32
    %138 = tpu.memref_slice %arg5[%132, %c0_i32_104] : memref<128x128xf32, #tpu.memory_space<any>> -> memref<1x128xf32, #tpu.memory_space<any>>
    %c6_i32_105 = arith.constant 6 : i32
    %c0_i32_106 = arith.constant 0 : i32
    %139 = tpu.memref_slice %arg8[%c1_i32_102, %c6_i32_105, %c0_i32_106] : memref<3x16x128xf32, #tpu.memory_space<vmem>> -> memref<1x1x128xf32, #tpu.memory_space<vmem>>
    %140 = tpu.memref_squeeze %139 : memref<1x1x128xf32, #tpu.memory_space<vmem>> -> memref<1x128xf32, #tpu.memory_space<vmem>>
    %141 = tpu.memref_slice %arg9[%c1_i32_103] : memref<3x!tpu.dma_semaphore, #tpu.memory_space<semaphore_mem>> -> memref<1x!tpu.dma_semaphore, #tpu.memory_space<semaphore_mem>>
    %142 = tpu.memref_squeeze %141 : memref<1x!tpu.dma_semaphore, #tpu.memory_space<semaphore_mem>> -> memref<!tpu.dma_semaphore, #tpu.memory_space<semaphore_mem>>
    tpu.enqueue_dma source(%138 : memref<1x128xf32, #tpu.memory_space<any>>) target(%140 : memref<1x128xf32, #tpu.memory_space<vmem>>) target_semaphore(%142 : memref<!tpu.dma_semaphore, #tpu.memory_space<semaphore_mem>>)
    %c2_i32_107 = arith.constant 2 : i32
    %c2_i32_108 = arith.constant 2 : i32
    %c0_i32_109 = arith.constant 0 : i32
    %143 = tpu.memref_slice %arg6[%129, %c0_i32_109] : memref<128x128xf32, #tpu.memory_space<any>> -> memref<1x128xf32, #tpu.memory_space<any>>
    %c6_i32_110 = arith.constant 6 : i32
    %c0_i32_111 = arith.constant 0 : i32
    %144 = tpu.memref_slice %arg8[%c2_i32_107, %c6_i32_110, %c0_i32_111] : memref<3x16x128xf32, #tpu.memory_space<vmem>> -> memref<1x1x128xf32, #tpu.memory_space<vmem>>
    %145 = tpu.memref_squeeze %144 : memref<1x1x128xf32, #tpu.memory_space<vmem>> -> memref<1x128xf32, #tpu.memory_space<vmem>>
    %146 = tpu.memref_slice %arg9[%c2_i32_108] : memref<3x!tpu.dma_semaphore, #tpu.memory_space<semaphore_mem>> -> memref<1x!tpu.dma_semaphore, #tpu.memory_space<semaphore_mem>>
    %147 = tpu.memref_squeeze %146 : memref<1x!tpu.dma_semaphore, #tpu.memory_space<semaphore_mem>> -> memref<!tpu.dma_semaphore, #tpu.memory_space<semaphore_mem>>
    tpu.enqueue_dma source(%143 : memref<1x128xf32, #tpu.memory_space<any>>) target(%145 : memref<1x128xf32, #tpu.memory_space<vmem>>) target_semaphore(%147 : memref<!tpu.dma_semaphore, #tpu.memory_space<semaphore_mem>>)
    %c7_i32 = arith.constant 7 : i32
    %148 = arith.addi %0, %c7_i32 : i32
    %149 = arith.index_cast %148 : i32 to index
    %150 = memref.load %arg1[%149] : memref<16xi32, #tpu.memory_space<smem>>
    %c7_i32_112 = arith.constant 7 : i32
    %151 = arith.addi %0, %c7_i32_112 : i32
    %152 = arith.index_cast %151 : i32 to index
    %153 = memref.load %arg2[%152] : memref<16xi32, #tpu.memory_space<smem>>
    %c0_i32_113 = arith.constant 0 : i32
    %c0_i32_114 = arith.constant 0 : i32
    %c0_i32_115 = arith.constant 0 : i32
    %154 = tpu.memref_slice %arg4[%150, %c0_i32_115] : memref<128x128xf32, #tpu.memory_space<any>> -> memref<1x128xf32, #tpu.memory_space<any>>
    %c7_i32_116 = arith.constant 7 : i32
    %c0_i32_117 = arith.constant 0 : i32
    %155 = tpu.memref_slice %arg8[%c0_i32_113, %c7_i32_116, %c0_i32_117] : memref<3x16x128xf32, #tpu.memory_space<vmem>> -> memref<1x1x128xf32, #tpu.memory_space<vmem>>
    %156 = tpu.memref_squeeze %155 : memref<1x1x128xf32, #tpu.memory_space<vmem>> -> memref<1x128xf32, #tpu.memory_space<vmem>>
    %157 = tpu.memref_slice %arg9[%c0_i32_114] : memref<3x!tpu.dma_semaphore, #tpu.memory_space<semaphore_mem>> -> memref<1x!tpu.dma_semaphore, #tpu.memory_space<semaphore_mem>>
    %158 = tpu.memref_squeeze %157 : memref<1x!tpu.dma_semaphore, #tpu.memory_space<semaphore_mem>> -> memref<!tpu.dma_semaphore, #tpu.memory_space<semaphore_mem>>
    tpu.enqueue_dma source(%154 : memref<1x128xf32, #tpu.memory_space<any>>) target(%156 : memref<1x128xf32, #tpu.memory_space<vmem>>) target_semaphore(%158 : memref<!tpu.dma_semaphore, #tpu.memory_space<semaphore_mem>>)
    %c1_i32_118 = arith.constant 1 : i32
    %c1_i32_119 = arith.constant 1 : i32
    %c0_i32_120 = arith.constant 0 : i32
    %159 = tpu.memref_slice %arg5[%153, %c0_i32_120] : memref<128x128xf32, #tpu.memory_space<any>> -> memref<1x128xf32, #tpu.memory_space<any>>
    %c7_i32_121 = arith.constant 7 : i32
    %c0_i32_122 = arith.constant 0 : i32
    %160 = tpu.memref_slice %arg8[%c1_i32_118, %c7_i32_121, %c0_i32_122] : memref<3x16x128xf32, #tpu.memory_space<vmem>> -> memref<1x1x128xf32, #tpu.memory_space<vmem>>
    %161 = tpu.memref_squeeze %160 : memref<1x1x128xf32, #tpu.memory_space<vmem>> -> memref<1x128xf32, #tpu.memory_space<vmem>>
    %162 = tpu.memref_slice %arg9[%c1_i32_119] : memref<3x!tpu.dma_semaphore, #tpu.memory_space<semaphore_mem>> -> memref<1x!tpu.dma_semaphore, #tpu.memory_space<semaphore_mem>>
    %163 = tpu.memref_squeeze %162 : memref<1x!tpu.dma_semaphore, #tpu.memory_space<semaphore_mem>> -> memref<!tpu.dma_semaphore, #tpu.memory_space<semaphore_mem>>
    tpu.enqueue_dma source(%159 : memref<1x128xf32, #tpu.memory_space<any>>) target(%161 : memref<1x128xf32, #tpu.memory_space<vmem>>) target_semaphore(%163 : memref<!tpu.dma_semaphore, #tpu.memory_space<semaphore_mem>>)
    %c2_i32_123 = arith.constant 2 : i32
    %c2_i32_124 = arith.constant 2 : i32
    %c0_i32_125 = arith.constant 0 : i32
    %164 = tpu.memref_slice %arg6[%150, %c0_i32_125] : memref<128x128xf32, #tpu.memory_space<any>> -> memref<1x128xf32, #tpu.memory_space<any>>
    %c7_i32_126 = arith.constant 7 : i32
    %c0_i32_127 = arith.constant 0 : i32
    %165 = tpu.memref_slice %arg8[%c2_i32_123, %c7_i32_126, %c0_i32_127] : memref<3x16x128xf32, #tpu.memory_space<vmem>> -> memref<1x1x128xf32, #tpu.memory_space<vmem>>
    %166 = tpu.memref_squeeze %165 : memref<1x1x128xf32, #tpu.memory_space<vmem>> -> memref<1x128xf32, #tpu.memory_space<vmem>>
    %167 = tpu.memref_slice %arg9[%c2_i32_124] : memref<3x!tpu.dma_semaphore, #tpu.memory_space<semaphore_mem>> -> memref<1x!tpu.dma_semaphore, #tpu.memory_space<semaphore_mem>>
    %168 = tpu.memref_squeeze %167 : memref<1x!tpu.dma_semaphore, #tpu.memory_space<semaphore_mem>> -> memref<!tpu.dma_semaphore, #tpu.memory_space<semaphore_mem>>
    tpu.enqueue_dma source(%164 : memref<1x128xf32, #tpu.memory_space<any>>) target(%166 : memref<1x128xf32, #tpu.memory_space<vmem>>) target_semaphore(%168 : memref<!tpu.dma_semaphore, #tpu.memory_space<semaphore_mem>>)
    %c8_i32 = arith.constant 8 : i32
    %169 = arith.addi %0, %c8_i32 : i32
    %170 = arith.index_cast %169 : i32 to index
    %171 = memref.load %arg1[%170] : memref<16xi32, #tpu.memory_space<smem>>
    %c8_i32_128 = arith.constant 8 : i32
    %172 = arith.addi %0, %c8_i32_128 : i32
    %173 = arith.index_cast %172 : i32 to index
    %174 = memref.load %arg2[%173] : memref<16xi32, #tpu.memory_space<smem>>
    %c0_i32_129 = arith.constant 0 : i32
    %c0_i32_130 = arith.constant 0 : i32
    %c0_i32_131 = arith.constant 0 : i32
    %175 = tpu.memref_slice %arg4[%171, %c0_i32_131] : memref<128x128xf32, #tpu.memory_space<any>> -> memref<1x128xf32, #tpu.memory_space<any>>
    %c8_i32_132 = arith.constant 8 : i32
    %c0_i32_133 = arith.constant 0 : i32
    %176 = tpu.memref_slice %arg8[%c0_i32_129, %c8_i32_132, %c0_i32_133] : memref<3x16x128xf32, #tpu.memory_space<vmem>> -> memref<1x1x128xf32, #tpu.memory_space<vmem>>
    %177 = tpu.memref_squeeze %176 : memref<1x1x128xf32, #tpu.memory_space<vmem>> -> memref<1x128xf32, #tpu.memory_space<vmem>>
    %178 = tpu.memref_slice %arg9[%c0_i32_130] : memref<3x!tpu.dma_semaphore, #tpu.memory_space<semaphore_mem>> -> memref<1x!tpu.dma_semaphore, #tpu.memory_space<semaphore_mem>>
    %179 = tpu.memref_squeeze %178 : memref<1x!tpu.dma_semaphore, #tpu.memory_space<semaphore_mem>> -> memref<!tpu.dma_semaphore, #tpu.memory_space<semaphore_mem>>
    tpu.enqueue_dma source(%175 : memref<1x128xf32, #tpu.memory_space<any>>) target(%177 : memref<1x128xf32, #tpu.memory_space<vmem>>) target_semaphore(%179 : memref<!tpu.dma_semaphore, #tpu.memory_space<semaphore_mem>>)
    %c1_i32_134 = arith.constant 1 : i32
    %c1_i32_135 = arith.constant 1 : i32
    %c0_i32_136 = arith.constant 0 : i32
    %180 = tpu.memref_slice %arg5[%174, %c0_i32_136] : memref<128x128xf32, #tpu.memory_space<any>> -> memref<1x128xf32, #tpu.memory_space<any>>
    %c8_i32_137 = arith.constant 8 : i32
    %c0_i32_138 = arith.constant 0 : i32
    %181 = tpu.memref_slice %arg8[%c1_i32_134, %c8_i32_137, %c0_i32_138] : memref<3x16x128xf32, #tpu.memory_space<vmem>> -> memref<1x1x128xf32, #tpu.memory_space<vmem>>
    %182 = tpu.memref_squeeze %181 : memref<1x1x128xf32, #tpu.memory_space<vmem>> -> memref<1x128xf32, #tpu.memory_space<vmem>>
    %183 = tpu.memref_slice %arg9[%c1_i32_135] : memref<3x!tpu.dma_semaphore, #tpu.memory_space<semaphore_mem>> -> memref<1x!tpu.dma_semaphore, #tpu.memory_space<semaphore_mem>>
    %184 = tpu.memref_squeeze %183 : memref<1x!tpu.dma_semaphore, #tpu.memory_space<semaphore_mem>> -> memref<!tpu.dma_semaphore, #tpu.memory_space<semaphore_mem>>
    tpu.enqueue_dma source(%180 : memref<1x128xf32, #tpu.memory_space<any>>) target(%182 : memref<1x128xf32, #tpu.memory_space<vmem>>) target_semaphore(%184 : memref<!tpu.dma_semaphore, #tpu.memory_space<semaphore_mem>>)
    %c2_i32_139 = arith.constant 2 : i32
    %c2_i32_140 = arith.constant 2 : i32
    %c0_i32_141 = arith.constant 0 : i32
    %185 = tpu.memref_slice %arg6[%171, %c0_i32_141] : memref<128x128xf32, #tpu.memory_space<any>> -> memref<1x128xf32, #tpu.memory_space<any>>
    %c8_i32_142 = arith.constant 8 : i32
    %c0_i32_143 = arith.constant 0 : i32
    %186 = tpu.memref_slice %arg8[%c2_i32_139, %c8_i32_142, %c0_i32_143] : memref<3x16x128xf32, #tpu.memory_space<vmem>> -> memref<1x1x128xf32, #tpu.memory_space<vmem>>
    %187 = tpu.memref_squeeze %186 : memref<1x1x128xf32, #tpu.memory_space<vmem>> -> memref<1x128xf32, #tpu.memory_space<vmem>>
    %188 = tpu.memref_slice %arg9[%c2_i32_140] : memref<3x!tpu.dma_semaphore, #tpu.memory_space<semaphore_mem>> -> memref<1x!tpu.dma_semaphore, #tpu.memory_space<semaphore_mem>>
    %189 = tpu.memref_squeeze %188 : memref<1x!tpu.dma_semaphore, #tpu.memory_space<semaphore_mem>> -> memref<!tpu.dma_semaphore, #tpu.memory_space<semaphore_mem>>
    tpu.enqueue_dma source(%185 : memref<1x128xf32, #tpu.memory_space<any>>) target(%187 : memref<1x128xf32, #tpu.memory_space<vmem>>) target_semaphore(%189 : memref<!tpu.dma_semaphore, #tpu.memory_space<semaphore_mem>>)
    %c9_i32 = arith.constant 9 : i32
    %190 = arith.addi %0, %c9_i32 : i32
    %191 = arith.index_cast %190 : i32 to index
    %192 = memref.load %arg1[%191] : memref<16xi32, #tpu.memory_space<smem>>
    %c9_i32_144 = arith.constant 9 : i32
    %193 = arith.addi %0, %c9_i32_144 : i32
    %194 = arith.index_cast %193 : i32 to index
    %195 = memref.load %arg2[%194] : memref<16xi32, #tpu.memory_space<smem>>
    %c0_i32_145 = arith.constant 0 : i32
    %c0_i32_146 = arith.constant 0 : i32
    %c0_i32_147 = arith.constant 0 : i32
    %196 = tpu.memref_slice %arg4[%192, %c0_i32_147] : memref<128x128xf32, #tpu.memory_space<any>> -> memref<1x128xf32, #tpu.memory_space<any>>
    %c9_i32_148 = arith.constant 9 : i32
    %c0_i32_149 = arith.constant 0 : i32
    %197 = tpu.memref_slice %arg8[%c0_i32_145, %c9_i32_148, %c0_i32_149] : memref<3x16x128xf32, #tpu.memory_space<vmem>> -> memref<1x1x128xf32, #tpu.memory_space<vmem>>
    %198 = tpu.memref_squeeze %197 : memref<1x1x128xf32, #tpu.memory_space<vmem>> -> memref<1x128xf32, #tpu.memory_space<vmem>>
    %199 = tpu.memref_slice %arg9[%c0_i32_146] : memref<3x!tpu.dma_semaphore, #tpu.memory_space<semaphore_mem>> -> memref<1x!tpu.dma_semaphore, #tpu.memory_space<semaphore_mem>>
    %200 = tpu.memref_squeeze %199 : memref<1x!tpu.dma_semaphore, #tpu.memory_space<semaphore_mem>> -> memref<!tpu.dma_semaphore, #tpu.memory_space<semaphore_mem>>
    tpu.enqueue_dma source(%196 : memref<1x128xf32, #tpu.memory_space<any>>) target(%198 : memref<1x128xf32, #tpu.memory_space<vmem>>) target_semaphore(%200 : memref<!tpu.dma_semaphore, #tpu.memory_space<semaphore_mem>>)
    %c1_i32_150 = arith.constant 1 : i32
    %c1_i32_151 = arith.constant 1 : i32
    %c0_i32_152 = arith.constant 0 : i32
    %201 = tpu.memref_slice %arg5[%195, %c0_i32_152] : memref<128x128xf32, #tpu.memory_space<any>> -> memref<1x128xf32, #tpu.memory_space<any>>
    %c9_i32_153 = arith.constant 9 : i32
    %c0_i32_154 = arith.constant 0 : i32
    %202 = tpu.memref_slice %arg8[%c1_i32_150, %c9_i32_153, %c0_i32_154] : memref<3x16x128xf32, #tpu.memory_space<vmem>> -> memref<1x1x128xf32, #tpu.memory_space<vmem>>
    %203 = tpu.memref_squeeze %202 : memref<1x1x128xf32, #tpu.memory_space<vmem>> -> memref<1x128xf32, #tpu.memory_space<vmem>>
    %204 = tpu.memref_slice %arg9[%c1_i32_151] : memref<3x!tpu.dma_semaphore, #tpu.memory_space<semaphore_mem>> -> memref<1x!tpu.dma_semaphore, #tpu.memory_space<semaphore_mem>>
    %205 = tpu.memref_squeeze %204 : memref<1x!tpu.dma_semaphore, #tpu.memory_space<semaphore_mem>> -> memref<!tpu.dma_semaphore, #tpu.memory_space<semaphore_mem>>
    tpu.enqueue_dma source(%201 : memref<1x128xf32, #tpu.memory_space<any>>) target(%203 : memref<1x128xf32, #tpu.memory_space<vmem>>) target_semaphore(%205 : memref<!tpu.dma_semaphore, #tpu.memory_space<semaphore_mem>>)
    %c2_i32_155 = arith.constant 2 : i32
    %c2_i32_156 = arith.constant 2 : i32
    %c0_i32_157 = arith.constant 0 : i32
    %206 = tpu.memref_slice %arg6[%192, %c0_i32_157] : memref<128x128xf32, #tpu.memory_space<any>> -> memref<1x128xf32, #tpu.memory_space<any>>
    %c9_i32_158 = arith.constant 9 : i32
    %c0_i32_159 = arith.constant 0 : i32
    %207 = tpu.memref_slice %arg8[%c2_i32_155, %c9_i32_158, %c0_i32_159] : memref<3x16x128xf32, #tpu.memory_space<vmem>> -> memref<1x1x128xf32, #tpu.memory_space<vmem>>
    %208 = tpu.memref_squeeze %207 : memref<1x1x128xf32, #tpu.memory_space<vmem>> -> memref<1x128xf32, #tpu.memory_space<vmem>>
    %209 = tpu.memref_slice %arg9[%c2_i32_156] : memref<3x!tpu.dma_semaphore, #tpu.memory_space<semaphore_mem>> -> memref<1x!tpu.dma_semaphore, #tpu.memory_space<semaphore_mem>>
    %210 = tpu.memref_squeeze %209 : memref<1x!tpu.dma_semaphore, #tpu.memory_space<semaphore_mem>> -> memref<!tpu.dma_semaphore, #tpu.memory_space<semaphore_mem>>
    tpu.enqueue_dma source(%206 : memref<1x128xf32, #tpu.memory_space<any>>) target(%208 : memref<1x128xf32, #tpu.memory_space<vmem>>) target_semaphore(%210 : memref<!tpu.dma_semaphore, #tpu.memory_space<semaphore_mem>>)
    %c10_i32 = arith.constant 10 : i32
    %211 = arith.addi %0, %c10_i32 : i32
    %212 = arith.index_cast %211 : i32 to index
    %213 = memref.load %arg1[%212] : memref<16xi32, #tpu.memory_space<smem>>
    %c10_i32_160 = arith.constant 10 : i32
    %214 = arith.addi %0, %c10_i32_160 : i32
    %215 = arith.index_cast %214 : i32 to index
    %216 = memref.load %arg2[%215] : memref<16xi32, #tpu.memory_space<smem>>
    %c0_i32_161 = arith.constant 0 : i32
    %c0_i32_162 = arith.constant 0 : i32
    %c0_i32_163 = arith.constant 0 : i32
    %217 = tpu.memref_slice %arg4[%213, %c0_i32_163] : memref<128x128xf32, #tpu.memory_space<any>> -> memref<1x128xf32, #tpu.memory_space<any>>
    %c10_i32_164 = arith.constant 10 : i32
    %c0_i32_165 = arith.constant 0 : i32
    %218 = tpu.memref_slice %arg8[%c0_i32_161, %c10_i32_164, %c0_i32_165] : memref<3x16x128xf32, #tpu.memory_space<vmem>> -> memref<1x1x128xf32, #tpu.memory_space<vmem>>
    %219 = tpu.memref_squeeze %218 : memref<1x1x128xf32, #tpu.memory_space<vmem>> -> memref<1x128xf32, #tpu.memory_space<vmem>>
    %220 = tpu.memref_slice %arg9[%c0_i32_162] : memref<3x!tpu.dma_semaphore, #tpu.memory_space<semaphore_mem>> -> memref<1x!tpu.dma_semaphore, #tpu.memory_space<semaphore_mem>>
    %221 = tpu.memref_squeeze %220 : memref<1x!tpu.dma_semaphore, #tpu.memory_space<semaphore_mem>> -> memref<!tpu.dma_semaphore, #tpu.memory_space<semaphore_mem>>
    tpu.enqueue_dma source(%217 : memref<1x128xf32, #tpu.memory_space<any>>) target(%219 : memref<1x128xf32, #tpu.memory_space<vmem>>) target_semaphore(%221 : memref<!tpu.dma_semaphore, #tpu.memory_space<semaphore_mem>>)
    %c1_i32_166 = arith.constant 1 : i32
    %c1_i32_167 = arith.constant 1 : i32
    %c0_i32_168 = arith.constant 0 : i32
    %222 = tpu.memref_slice %arg5[%216, %c0_i32_168] : memref<128x128xf32, #tpu.memory_space<any>> -> memref<1x128xf32, #tpu.memory_space<any>>
    %c10_i32_169 = arith.constant 10 : i32
    %c0_i32_170 = arith.constant 0 : i32
    %223 = tpu.memref_slice %arg8[%c1_i32_166, %c10_i32_169, %c0_i32_170] : memref<3x16x128xf32, #tpu.memory_space<vmem>> -> memref<1x1x128xf32, #tpu.memory_space<vmem>>
    %224 = tpu.memref_squeeze %223 : memref<1x1x128xf32, #tpu.memory_space<vmem>> -> memref<1x128xf32, #tpu.memory_space<vmem>>
    %225 = tpu.memref_slice %arg9[%c1_i32_167] : memref<3x!tpu.dma_semaphore, #tpu.memory_space<semaphore_mem>> -> memref<1x!tpu.dma_semaphore, #tpu.memory_space<semaphore_mem>>
    %226 = tpu.memref_squeeze %225 : memref<1x!tpu.dma_semaphore, #tpu.memory_space<semaphore_mem>> -> memref<!tpu.dma_semaphore, #tpu.memory_space<semaphore_mem>>
    tpu.enqueue_dma source(%222 : memref<1x128xf32, #tpu.memory_space<any>>) target(%224 : memref<1x128xf32, #tpu.memory_space<vmem>>) target_semaphore(%226 : memref<!tpu.dma_semaphore, #tpu.memory_space<semaphore_mem>>)
    %c2_i32_171 = arith.constant 2 : i32
    %c2_i32_172 = arith.constant 2 : i32
    %c0_i32_173 = arith.constant 0 : i32
    %227 = tpu.memref_slice %arg6[%213, %c0_i32_173] : memref<128x128xf32, #tpu.memory_space<any>> -> memref<1x128xf32, #tpu.memory_space<any>>
    %c10_i32_174 = arith.constant 10 : i32
    %c0_i32_175 = arith.constant 0 : i32
    %228 = tpu.memref_slice %arg8[%c2_i32_171, %c10_i32_174, %c0_i32_175] : memref<3x16x128xf32, #tpu.memory_space<vmem>> -> memref<1x1x128xf32, #tpu.memory_space<vmem>>
    %229 = tpu.memref_squeeze %228 : memref<1x1x128xf32, #tpu.memory_space<vmem>> -> memref<1x128xf32, #tpu.memory_space<vmem>>
    %230 = tpu.memref_slice %arg9[%c2_i32_172] : memref<3x!tpu.dma_semaphore, #tpu.memory_space<semaphore_mem>> -> memref<1x!tpu.dma_semaphore, #tpu.memory_space<semaphore_mem>>
    %231 = tpu.memref_squeeze %230 : memref<1x!tpu.dma_semaphore, #tpu.memory_space<semaphore_mem>> -> memref<!tpu.dma_semaphore, #tpu.memory_space<semaphore_mem>>
    tpu.enqueue_dma source(%227 : memref<1x128xf32, #tpu.memory_space<any>>) target(%229 : memref<1x128xf32, #tpu.memory_space<vmem>>) target_semaphore(%231 : memref<!tpu.dma_semaphore, #tpu.memory_space<semaphore_mem>>)
    %c11_i32 = arith.constant 11 : i32
    %232 = arith.addi %0, %c11_i32 : i32
    %233 = arith.index_cast %232 : i32 to index
    %234 = memref.load %arg1[%233] : memref<16xi32, #tpu.memory_space<smem>>
    %c11_i32_176 = arith.constant 11 : i32
    %235 = arith.addi %0, %c11_i32_176 : i32
    %236 = arith.index_cast %235 : i32 to index
    %237 = memref.load %arg2[%236] : memref<16xi32, #tpu.memory_space<smem>>
    %c0_i32_177 = arith.constant 0 : i32
    %c0_i32_178 = arith.constant 0 : i32
    %c0_i32_179 = arith.constant 0 : i32
    %238 = tpu.memref_slice %arg4[%234, %c0_i32_179] : memref<128x128xf32, #tpu.memory_space<any>> -> memref<1x128xf32, #tpu.memory_space<any>>
    %c11_i32_180 = arith.constant 11 : i32
    %c0_i32_181 = arith.constant 0 : i32
    %239 = tpu.memref_slice %arg8[%c0_i32_177, %c11_i32_180, %c0_i32_181] : memref<3x16x128xf32, #tpu.memory_space<vmem>> -> memref<1x1x128xf32, #tpu.memory_space<vmem>>
    %240 = tpu.memref_squeeze %239 : memref<1x1x128xf32, #tpu.memory_space<vmem>> -> memref<1x128xf32, #tpu.memory_space<vmem>>
    %241 = tpu.memref_slice %arg9[%c0_i32_178] : memref<3x!tpu.dma_semaphore, #tpu.memory_space<semaphore_mem>> -> memref<1x!tpu.dma_semaphore, #tpu.memory_space<semaphore_mem>>
    %242 = tpu.memref_squeeze %241 : memref<1x!tpu.dma_semaphore, #tpu.memory_space<semaphore_mem>> -> memref<!tpu.dma_semaphore, #tpu.memory_space<semaphore_mem>>
    tpu.enqueue_dma source(%238 : memref<1x128xf32, #tpu.memory_space<any>>) target(%240 : memref<1x128xf32, #tpu.memory_space<vmem>>) target_semaphore(%242 : memref<!tpu.dma_semaphore, #tpu.memory_space<semaphore_mem>>)
    %c1_i32_182 = arith.constant 1 : i32
    %c1_i32_183 = arith.constant 1 : i32
    %c0_i32_184 = arith.constant 0 : i32
    %243 = tpu.memref_slice %arg5[%237, %c0_i32_184] : memref<128x128xf32, #tpu.memory_space<any>> -> memref<1x128xf32, #tpu.memory_space<any>>
    %c11_i32_185 = arith.constant 11 : i32
    %c0_i32_186 = arith.constant 0 : i32
    %244 = tpu.memref_slice %arg8[%c1_i32_182, %c11_i32_185, %c0_i32_186] : memref<3x16x128xf32, #tpu.memory_space<vmem>> -> memref<1x1x128xf32, #tpu.memory_space<vmem>>
    %245 = tpu.memref_squeeze %244 : memref<1x1x128xf32, #tpu.memory_space<vmem>> -> memref<1x128xf32, #tpu.memory_space<vmem>>
    %246 = tpu.memref_slice %arg9[%c1_i32_183] : memref<3x!tpu.dma_semaphore, #tpu.memory_space<semaphore_mem>> -> memref<1x!tpu.dma_semaphore, #tpu.memory_space<semaphore_mem>>
    %247 = tpu.memref_squeeze %246 : memref<1x!tpu.dma_semaphore, #tpu.memory_space<semaphore_mem>> -> memref<!tpu.dma_semaphore, #tpu.memory_space<semaphore_mem>>
    tpu.enqueue_dma source(%243 : memref<1x128xf32, #tpu.memory_space<any>>) target(%245 : memref<1x128xf32, #tpu.memory_space<vmem>>) target_semaphore(%247 : memref<!tpu.dma_semaphore, #tpu.memory_space<semaphore_mem>>)
    %c2_i32_187 = arith.constant 2 : i32
    %c2_i32_188 = arith.constant 2 : i32
    %c0_i32_189 = arith.constant 0 : i32
    %248 = tpu.memref_slice %arg6[%234, %c0_i32_189] : memref<128x128xf32, #tpu.memory_space<any>> -> memref<1x128xf32, #tpu.memory_space<any>>
    %c11_i32_190 = arith.constant 11 : i32
    %c0_i32_191 = arith.constant 0 : i32
    %249 = tpu.memref_slice %arg8[%c2_i32_187, %c11_i32_190, %c0_i32_191] : memref<3x16x128xf32, #tpu.memory_space<vmem>> -> memref<1x1x128xf32, #tpu.memory_space<vmem>>
    %250 = tpu.memref_squeeze %249 : memref<1x1x128xf32, #tpu.memory_space<vmem>> -> memref<1x128xf32, #tpu.memory_space<vmem>>
    %251 = tpu.memref_slice %arg9[%c2_i32_188] : memref<3x!tpu.dma_semaphore, #tpu.memory_space<semaphore_mem>> -> memref<1x!tpu.dma_semaphore, #tpu.memory_space<semaphore_mem>>
    %252 = tpu.memref_squeeze %251 : memref<1x!tpu.dma_semaphore, #tpu.memory_space<semaphore_mem>> -> memref<!tpu.dma_semaphore, #tpu.memory_space<semaphore_mem>>
    tpu.enqueue_dma source(%248 : memref<1x128xf32, #tpu.memory_space<any>>) target(%250 : memref<1x128xf32, #tpu.memory_space<vmem>>) target_semaphore(%252 : memref<!tpu.dma_semaphore, #tpu.memory_space<semaphore_mem>>)
    %c12_i32 = arith.constant 12 : i32
    %253 = arith.addi %0, %c12_i32 : i32
    %254 = arith.index_cast %253 : i32 to index
    %255 = memref.load %arg1[%254] : memref<16xi32, #tpu.memory_space<smem>>
    %c12_i32_192 = arith.constant 12 : i32
    %256 = arith.addi %0, %c12_i32_192 : i32
    %257 = arith.index_cast %256 : i32 to index
    %258 = memref.load %arg2[%257] : memref<16xi32, #tpu.memory_space<smem>>
    %c0_i32_193 = arith.constant 0 : i32
    %c0_i32_194 = arith.constant 0 : i32
    %c0_i32_195 = arith.constant 0 : i32
    %259 = tpu.memref_slice %arg4[%255, %c0_i32_195] : memref<128x128xf32, #tpu.memory_space<any>> -> memref<1x128xf32, #tpu.memory_space<any>>
    %c12_i32_196 = arith.constant 12 : i32
    %c0_i32_197 = arith.constant 0 : i32
    %260 = tpu.memref_slice %arg8[%c0_i32_193, %c12_i32_196, %c0_i32_197] : memref<3x16x128xf32, #tpu.memory_space<vmem>> -> memref<1x1x128xf32, #tpu.memory_space<vmem>>
    %261 = tpu.memref_squeeze %260 : memref<1x1x128xf32, #tpu.memory_space<vmem>> -> memref<1x128xf32, #tpu.memory_space<vmem>>
    %262 = tpu.memref_slice %arg9[%c0_i32_194] : memref<3x!tpu.dma_semaphore, #tpu.memory_space<semaphore_mem>> -> memref<1x!tpu.dma_semaphore, #tpu.memory_space<semaphore_mem>>
    %263 = tpu.memref_squeeze %262 : memref<1x!tpu.dma_semaphore, #tpu.memory_space<semaphore_mem>> -> memref<!tpu.dma_semaphore, #tpu.memory_space<semaphore_mem>>
    tpu.enqueue_dma source(%259 : memref<1x128xf32, #tpu.memory_space<any>>) target(%261 : memref<1x128xf32, #tpu.memory_space<vmem>>) target_semaphore(%263 : memref<!tpu.dma_semaphore, #tpu.memory_space<semaphore_mem>>)
    %c1_i32_198 = arith.constant 1 : i32
    %c1_i32_199 = arith.constant 1 : i32
    %c0_i32_200 = arith.constant 0 : i32
    %264 = tpu.memref_slice %arg5[%258, %c0_i32_200] : memref<128x128xf32, #tpu.memory_space<any>> -> memref<1x128xf32, #tpu.memory_space<any>>
    %c12_i32_201 = arith.constant 12 : i32
    %c0_i32_202 = arith.constant 0 : i32
    %265 = tpu.memref_slice %arg8[%c1_i32_198, %c12_i32_201, %c0_i32_202] : memref<3x16x128xf32, #tpu.memory_space<vmem>> -> memref<1x1x128xf32, #tpu.memory_space<vmem>>
    %266 = tpu.memref_squeeze %265 : memref<1x1x128xf32, #tpu.memory_space<vmem>> -> memref<1x128xf32, #tpu.memory_space<vmem>>
    %267 = tpu.memref_slice %arg9[%c1_i32_199] : memref<3x!tpu.dma_semaphore, #tpu.memory_space<semaphore_mem>> -> memref<1x!tpu.dma_semaphore, #tpu.memory_space<semaphore_mem>>
    %268 = tpu.memref_squeeze %267 : memref<1x!tpu.dma_semaphore, #tpu.memory_space<semaphore_mem>> -> memref<!tpu.dma_semaphore, #tpu.memory_space<semaphore_mem>>
    tpu.enqueue_dma source(%264 : memref<1x128xf32, #tpu.memory_space<any>>) target(%266 : memref<1x128xf32, #tpu.memory_space<vmem>>) target_semaphore(%268 : memref<!tpu.dma_semaphore, #tpu.memory_space<semaphore_mem>>)
    %c2_i32_203 = arith.constant 2 : i32
    %c2_i32_204 = arith.constant 2 : i32
    %c0_i32_205 = arith.constant 0 : i32
    %269 = tpu.memref_slice %arg6[%255, %c0_i32_205] : memref<128x128xf32, #tpu.memory_space<any>> -> memref<1x128xf32, #tpu.memory_space<any>>
    %c12_i32_206 = arith.constant 12 : i32
    %c0_i32_207 = arith.constant 0 : i32
    %270 = tpu.memref_slice %arg8[%c2_i32_203, %c12_i32_206, %c0_i32_207] : memref<3x16x128xf32, #tpu.memory_space<vmem>> -> memref<1x1x128xf32, #tpu.memory_space<vmem>>
    %271 = tpu.memref_squeeze %270 : memref<1x1x128xf32, #tpu.memory_space<vmem>> -> memref<1x128xf32, #tpu.memory_space<vmem>>
    %272 = tpu.memref_slice %arg9[%c2_i32_204] : memref<3x!tpu.dma_semaphore, #tpu.memory_space<semaphore_mem>> -> memref<1x!tpu.dma_semaphore, #tpu.memory_space<semaphore_mem>>
    %273 = tpu.memref_squeeze %272 : memref<1x!tpu.dma_semaphore, #tpu.memory_space<semaphore_mem>> -> memref<!tpu.dma_semaphore, #tpu.memory_space<semaphore_mem>>
    tpu.enqueue_dma source(%269 : memref<1x128xf32, #tpu.memory_space<any>>) target(%271 : memref<1x128xf32, #tpu.memory_space<vmem>>) target_semaphore(%273 : memref<!tpu.dma_semaphore, #tpu.memory_space<semaphore_mem>>)
    %c13_i32 = arith.constant 13 : i32
    %274 = arith.addi %0, %c13_i32 : i32
    %275 = arith.index_cast %274 : i32 to index
    %276 = memref.load %arg1[%275] : memref<16xi32, #tpu.memory_space<smem>>
    %c13_i32_208 = arith.constant 13 : i32
    %277 = arith.addi %0, %c13_i32_208 : i32
    %278 = arith.index_cast %277 : i32 to index
    %279 = memref.load %arg2[%278] : memref<16xi32, #tpu.memory_space<smem>>
    %c0_i32_209 = arith.constant 0 : i32
    %c0_i32_210 = arith.constant 0 : i32
    %c0_i32_211 = arith.constant 0 : i32
    %280 = tpu.memref_slice %arg4[%276, %c0_i32_211] : memref<128x128xf32, #tpu.memory_space<any>> -> memref<1x128xf32, #tpu.memory_space<any>>
    %c13_i32_212 = arith.constant 13 : i32
    %c0_i32_213 = arith.constant 0 : i32
    %281 = tpu.memref_slice %arg8[%c0_i32_209, %c13_i32_212, %c0_i32_213] : memref<3x16x128xf32, #tpu.memory_space<vmem>> -> memref<1x1x128xf32, #tpu.memory_space<vmem>>
    %282 = tpu.memref_squeeze %281 : memref<1x1x128xf32, #tpu.memory_space<vmem>> -> memref<1x128xf32, #tpu.memory_space<vmem>>
    %283 = tpu.memref_slice %arg9[%c0_i32_210] : memref<3x!tpu.dma_semaphore, #tpu.memory_space<semaphore_mem>> -> memref<1x!tpu.dma_semaphore, #tpu.memory_space<semaphore_mem>>
    %284 = tpu.memref_squeeze %283 : memref<1x!tpu.dma_semaphore, #tpu.memory_space<semaphore_mem>> -> memref<!tpu.dma_semaphore, #tpu.memory_space<semaphore_mem>>
    tpu.enqueue_dma source(%280 : memref<1x128xf32, #tpu.memory_space<any>>) target(%282 : memref<1x128xf32, #tpu.memory_space<vmem>>) target_semaphore(%284 : memref<!tpu.dma_semaphore, #tpu.memory_space<semaphore_mem>>)
    %c1_i32_214 = arith.constant 1 : i32
    %c1_i32_215 = arith.constant 1 : i32
    %c0_i32_216 = arith.constant 0 : i32
    %285 = tpu.memref_slice %arg5[%279, %c0_i32_216] : memref<128x128xf32, #tpu.memory_space<any>> -> memref<1x128xf32, #tpu.memory_space<any>>
    %c13_i32_217 = arith.constant 13 : i32
    %c0_i32_218 = arith.constant 0 : i32
    %286 = tpu.memref_slice %arg8[%c1_i32_214, %c13_i32_217, %c0_i32_218] : memref<3x16x128xf32, #tpu.memory_space<vmem>> -> memref<1x1x128xf32, #tpu.memory_space<vmem>>
    %287 = tpu.memref_squeeze %286 : memref<1x1x128xf32, #tpu.memory_space<vmem>> -> memref<1x128xf32, #tpu.memory_space<vmem>>
    %288 = tpu.memref_slice %arg9[%c1_i32_215] : memref<3x!tpu.dma_semaphore, #tpu.memory_space<semaphore_mem>> -> memref<1x!tpu.dma_semaphore, #tpu.memory_space<semaphore_mem>>
    %289 = tpu.memref_squeeze %288 : memref<1x!tpu.dma_semaphore, #tpu.memory_space<semaphore_mem>> -> memref<!tpu.dma_semaphore, #tpu.memory_space<semaphore_mem>>
    tpu.enqueue_dma source(%285 : memref<1x128xf32, #tpu.memory_space<any>>) target(%287 : memref<1x128xf32, #tpu.memory_space<vmem>>) target_semaphore(%289 : memref<!tpu.dma_semaphore, #tpu.memory_space<semaphore_mem>>)
    %c2_i32_219 = arith.constant 2 : i32
    %c2_i32_220 = arith.constant 2 : i32
    %c0_i32_221 = arith.constant 0 : i32
    %290 = tpu.memref_slice %arg6[%276, %c0_i32_221] : memref<128x128xf32, #tpu.memory_space<any>> -> memref<1x128xf32, #tpu.memory_space<any>>
    %c13_i32_222 = arith.constant 13 : i32
    %c0_i32_223 = arith.constant 0 : i32
    %291 = tpu.memref_slice %arg8[%c2_i32_219, %c13_i32_222, %c0_i32_223] : memref<3x16x128xf32, #tpu.memory_space<vmem>> -> memref<1x1x128xf32, #tpu.memory_space<vmem>>
    %292 = tpu.memref_squeeze %291 : memref<1x1x128xf32, #tpu.memory_space<vmem>> -> memref<1x128xf32, #tpu.memory_space<vmem>>
    %293 = tpu.memref_slice %arg9[%c2_i32_220] : memref<3x!tpu.dma_semaphore, #tpu.memory_space<semaphore_mem>> -> memref<1x!tpu.dma_semaphore, #tpu.memory_space<semaphore_mem>>
    %294 = tpu.memref_squeeze %293 : memref<1x!tpu.dma_semaphore, #tpu.memory_space<semaphore_mem>> -> memref<!tpu.dma_semaphore, #tpu.memory_space<semaphore_mem>>
    tpu.enqueue_dma source(%290 : memref<1x128xf32, #tpu.memory_space<any>>) target(%292 : memref<1x128xf32, #tpu.memory_space<vmem>>) target_semaphore(%294 : memref<!tpu.dma_semaphore, #tpu.memory_space<semaphore_mem>>)
    %c14_i32 = arith.constant 14 : i32
    %295 = arith.addi %0, %c14_i32 : i32
    %296 = arith.index_cast %295 : i32 to index
    %297 = memref.load %arg1[%296] : memref<16xi32, #tpu.memory_space<smem>>
    %c14_i32_224 = arith.constant 14 : i32
    %298 = arith.addi %0, %c14_i32_224 : i32
    %299 = arith.index_cast %298 : i32 to index
    %300 = memref.load %arg2[%299] : memref<16xi32, #tpu.memory_space<smem>>
    %c0_i32_225 = arith.constant 0 : i32
    %c0_i32_226 = arith.constant 0 : i32
    %c0_i32_227 = arith.constant 0 : i32
    %301 = tpu.memref_slice %arg4[%297, %c0_i32_227] : memref<128x128xf32, #tpu.memory_space<any>> -> memref<1x128xf32, #tpu.memory_space<any>>
    %c14_i32_228 = arith.constant 14 : i32
    %c0_i32_229 = arith.constant 0 : i32
    %302 = tpu.memref_slice %arg8[%c0_i32_225, %c14_i32_228, %c0_i32_229] : memref<3x16x128xf32, #tpu.memory_space<vmem>> -> memref<1x1x128xf32, #tpu.memory_space<vmem>>
    %303 = tpu.memref_squeeze %302 : memref<1x1x128xf32, #tpu.memory_space<vmem>> -> memref<1x128xf32, #tpu.memory_space<vmem>>
    %304 = tpu.memref_slice %arg9[%c0_i32_226] : memref<3x!tpu.dma_semaphore, #tpu.memory_space<semaphore_mem>> -> memref<1x!tpu.dma_semaphore, #tpu.memory_space<semaphore_mem>>
    %305 = tpu.memref_squeeze %304 : memref<1x!tpu.dma_semaphore, #tpu.memory_space<semaphore_mem>> -> memref<!tpu.dma_semaphore, #tpu.memory_space<semaphore_mem>>
    tpu.enqueue_dma source(%301 : memref<1x128xf32, #tpu.memory_space<any>>) target(%303 : memref<1x128xf32, #tpu.memory_space<vmem>>) target_semaphore(%305 : memref<!tpu.dma_semaphore, #tpu.memory_space<semaphore_mem>>)
    %c1_i32_230 = arith.constant 1 : i32
    %c1_i32_231 = arith.constant 1 : i32
    %c0_i32_232 = arith.constant 0 : i32
    %306 = tpu.memref_slice %arg5[%300, %c0_i32_232] : memref<128x128xf32, #tpu.memory_space<any>> -> memref<1x128xf32, #tpu.memory_space<any>>
    %c14_i32_233 = arith.constant 14 : i32
    %c0_i32_234 = arith.constant 0 : i32
    %307 = tpu.memref_slice %arg8[%c1_i32_230, %c14_i32_233, %c0_i32_234] : memref<3x16x128xf32, #tpu.memory_space<vmem>> -> memref<1x1x128xf32, #tpu.memory_space<vmem>>
    %308 = tpu.memref_squeeze %307 : memref<1x1x128xf32, #tpu.memory_space<vmem>> -> memref<1x128xf32, #tpu.memory_space<vmem>>
    %309 = tpu.memref_slice %arg9[%c1_i32_231] : memref<3x!tpu.dma_semaphore, #tpu.memory_space<semaphore_mem>> -> memref<1x!tpu.dma_semaphore, #tpu.memory_space<semaphore_mem>>
    %310 = tpu.memref_squeeze %309 : memref<1x!tpu.dma_semaphore, #tpu.memory_space<semaphore_mem>> -> memref<!tpu.dma_semaphore, #tpu.memory_space<semaphore_mem>>
    tpu.enqueue_dma source(%306 : memref<1x128xf32, #tpu.memory_space<any>>) target(%308 : memref<1x128xf32, #tpu.memory_space<vmem>>) target_semaphore(%310 : memref<!tpu.dma_semaphore, #tpu.memory_space<semaphore_mem>>)
    %c2_i32_235 = arith.constant 2 : i32
    %c2_i32_236 = arith.constant 2 : i32
    %c0_i32_237 = arith.constant 0 : i32
    %311 = tpu.memref_slice %arg6[%297, %c0_i32_237] : memref<128x128xf32, #tpu.memory_space<any>> -> memref<1x128xf32, #tpu.memory_space<any>>
    %c14_i32_238 = arith.constant 14 : i32
    %c0_i32_239 = arith.constant 0 : i32
    %312 = tpu.memref_slice %arg8[%c2_i32_235, %c14_i32_238, %c0_i32_239] : memref<3x16x128xf32, #tpu.memory_space<vmem>> -> memref<1x1x128xf32, #tpu.memory_space<vmem>>
    %313 = tpu.memref_squeeze %312 : memref<1x1x128xf32, #tpu.memory_space<vmem>> -> memref<1x128xf32, #tpu.memory_space<vmem>>
    %314 = tpu.memref_slice %arg9[%c2_i32_236] : memref<3x!tpu.dma_semaphore, #tpu.memory_space<semaphore_mem>> -> memref<1x!tpu.dma_semaphore, #tpu.memory_space<semaphore_mem>>
    %315 = tpu.memref_squeeze %314 : memref<1x!tpu.dma_semaphore, #tpu.memory_space<semaphore_mem>> -> memref<!tpu.dma_semaphore, #tpu.memory_space<semaphore_mem>>
    tpu.enqueue_dma source(%311 : memref<1x128xf32, #tpu.memory_space<any>>) target(%313 : memref<1x128xf32, #tpu.memory_space<vmem>>) target_semaphore(%315 : memref<!tpu.dma_semaphore, #tpu.memory_space<semaphore_mem>>)
    %c15_i32 = arith.constant 15 : i32
    %316 = arith.addi %0, %c15_i32 : i32
    %317 = arith.index_cast %316 : i32 to index
    %318 = memref.load %arg1[%317] : memref<16xi32, #tpu.memory_space<smem>>
    %c15_i32_240 = arith.constant 15 : i32
    %319 = arith.addi %0, %c15_i32_240 : i32
    %320 = arith.index_cast %319 : i32 to index
    %321 = memref.load %arg2[%320] : memref<16xi32, #tpu.memory_space<smem>>
    %c0_i32_241 = arith.constant 0 : i32
    %c0_i32_242 = arith.constant 0 : i32
    %c0_i32_243 = arith.constant 0 : i32
    %322 = tpu.memref_slice %arg4[%318, %c0_i32_243] : memref<128x128xf32, #tpu.memory_space<any>> -> memref<1x128xf32, #tpu.memory_space<any>>
    %c15_i32_244 = arith.constant 15 : i32
    %c0_i32_245 = arith.constant 0 : i32
    %323 = tpu.memref_slice %arg8[%c0_i32_241, %c15_i32_244, %c0_i32_245] : memref<3x16x128xf32, #tpu.memory_space<vmem>> -> memref<1x1x128xf32, #tpu.memory_space<vmem>>
    %324 = tpu.memref_squeeze %323 : memref<1x1x128xf32, #tpu.memory_space<vmem>> -> memref<1x128xf32, #tpu.memory_space<vmem>>
    %325 = tpu.memref_slice %arg9[%c0_i32_242] : memref<3x!tpu.dma_semaphore, #tpu.memory_space<semaphore_mem>> -> memref<1x!tpu.dma_semaphore, #tpu.memory_space<semaphore_mem>>
    %326 = tpu.memref_squeeze %325 : memref<1x!tpu.dma_semaphore, #tpu.memory_space<semaphore_mem>> -> memref<!tpu.dma_semaphore, #tpu.memory_space<semaphore_mem>>
    tpu.enqueue_dma source(%322 : memref<1x128xf32, #tpu.memory_space<any>>) target(%324 : memref<1x128xf32, #tpu.memory_space<vmem>>) target_semaphore(%326 : memref<!tpu.dma_semaphore, #tpu.memory_space<semaphore_mem>>)
    %c1_i32_246 = arith.constant 1 : i32
    %c1_i32_247 = arith.constant 1 : i32
    %c0_i32_248 = arith.constant 0 : i32
    %327 = tpu.memref_slice %arg5[%321, %c0_i32_248] : memref<128x128xf32, #tpu.memory_space<any>> -> memref<1x128xf32, #tpu.memory_space<any>>
    %c15_i32_249 = arith.constant 15 : i32
    %c0_i32_250 = arith.constant 0 : i32
    %328 = tpu.memref_slice %arg8[%c1_i32_246, %c15_i32_249, %c0_i32_250] : memref<3x16x128xf32, #tpu.memory_space<vmem>> -> memref<1x1x128xf32, #tpu.memory_space<vmem>>
    %329 = tpu.memref_squeeze %328 : memref<1x1x128xf32, #tpu.memory_space<vmem>> -> memref<1x128xf32, #tpu.memory_space<vmem>>
    %330 = tpu.memref_slice %arg9[%c1_i32_247] : memref<3x!tpu.dma_semaphore, #tpu.memory_space<semaphore_mem>> -> memref<1x!tpu.dma_semaphore, #tpu.memory_space<semaphore_mem>>
    %331 = tpu.memref_squeeze %330 : memref<1x!tpu.dma_semaphore, #tpu.memory_space<semaphore_mem>> -> memref<!tpu.dma_semaphore, #tpu.memory_space<semaphore_mem>>
    tpu.enqueue_dma source(%327 : memref<1x128xf32, #tpu.memory_space<any>>) target(%329 : memref<1x128xf32, #tpu.memory_space<vmem>>) target_semaphore(%331 : memref<!tpu.dma_semaphore, #tpu.memory_space<semaphore_mem>>)
    %c2_i32_251 = arith.constant 2 : i32
    %c2_i32_252 = arith.constant 2 : i32
    %c0_i32_253 = arith.constant 0 : i32
    %332 = tpu.memref_slice %arg6[%318, %c0_i32_253] : memref<128x128xf32, #tpu.memory_space<any>> -> memref<1x128xf32, #tpu.memory_space<any>>
    %c15_i32_254 = arith.constant 15 : i32
    %c0_i32_255 = arith.constant 0 : i32
    %333 = tpu.memref_slice %arg8[%c2_i32_251, %c15_i32_254, %c0_i32_255] : memref<3x16x128xf32, #tpu.memory_space<vmem>> -> memref<1x1x128xf32, #tpu.memory_space<vmem>>
    %334 = tpu.memref_squeeze %333 : memref<1x1x128xf32, #tpu.memory_space<vmem>> -> memref<1x128xf32, #tpu.memory_space<vmem>>
    %335 = tpu.memref_slice %arg9[%c2_i32_252] : memref<3x!tpu.dma_semaphore, #tpu.memory_space<semaphore_mem>> -> memref<1x!tpu.dma_semaphore, #tpu.memory_space<semaphore_mem>>
    %336 = tpu.memref_squeeze %335 : memref<1x!tpu.dma_semaphore, #tpu.memory_space<semaphore_mem>> -> memref<!tpu.dma_semaphore, #tpu.memory_space<semaphore_mem>>
    tpu.enqueue_dma source(%332 : memref<1x128xf32, #tpu.memory_space<any>>) target(%334 : memref<1x128xf32, #tpu.memory_space<vmem>>) target_semaphore(%336 : memref<!tpu.dma_semaphore, #tpu.memory_space<semaphore_mem>>)
    %c0_i32_256 = arith.constant 0 : i32
    %c0_i32_257 = arith.constant 0 : i32
    %c0_i32_258 = arith.constant 0 : i32
    %337 = tpu.memref_slice %arg4[%3, %c0_i32_258] : memref<128x128xf32, #tpu.memory_space<any>> -> memref<1x128xf32, #tpu.memory_space<any>>
    %c0_i32_259 = arith.constant 0 : i32
    %c0_i32_260 = arith.constant 0 : i32
    %338 = tpu.memref_slice %arg8[%c0_i32_256, %c0_i32_259, %c0_i32_260] : memref<3x16x128xf32, #tpu.memory_space<vmem>> -> memref<1x1x128xf32, #tpu.memory_space<vmem>>
    %339 = tpu.memref_squeeze %338 : memref<1x1x128xf32, #tpu.memory_space<vmem>> -> memref<1x128xf32, #tpu.memory_space<vmem>>
    %340 = tpu.memref_slice %arg9[%c0_i32_257] : memref<3x!tpu.dma_semaphore, #tpu.memory_space<semaphore_mem>> -> memref<1x!tpu.dma_semaphore, #tpu.memory_space<semaphore_mem>>
    %341 = tpu.memref_squeeze %340 : memref<1x!tpu.dma_semaphore, #tpu.memory_space<semaphore_mem>> -> memref<!tpu.dma_semaphore, #tpu.memory_space<semaphore_mem>>
    tpu.wait_dma2 semaphore(%341 : memref<!tpu.dma_semaphore, #tpu.memory_space<semaphore_mem>>) src(%337 : memref<1x128xf32, #tpu.memory_space<any>>) dst(%339 : memref<1x128xf32, #tpu.memory_space<vmem>>)
    %c1_i32_261 = arith.constant 1 : i32
    %c1_i32_262 = arith.constant 1 : i32
    %c0_i32_263 = arith.constant 0 : i32
    %342 = tpu.memref_slice %arg5[%6, %c0_i32_263] : memref<128x128xf32, #tpu.memory_space<any>> -> memref<1x128xf32, #tpu.memory_space<any>>
    %c0_i32_264 = arith.constant 0 : i32
    %c0_i32_265 = arith.constant 0 : i32
    %343 = tpu.memref_slice %arg8[%c1_i32_261, %c0_i32_264, %c0_i32_265] : memref<3x16x128xf32, #tpu.memory_space<vmem>> -> memref<1x1x128xf32, #tpu.memory_space<vmem>>
    %344 = tpu.memref_squeeze %343 : memref<1x1x128xf32, #tpu.memory_space<vmem>> -> memref<1x128xf32, #tpu.memory_space<vmem>>
    %345 = tpu.memref_slice %arg9[%c1_i32_262] : memref<3x!tpu.dma_semaphore, #tpu.memory_space<semaphore_mem>> -> memref<1x!tpu.dma_semaphore, #tpu.memory_space<semaphore_mem>>
    %346 = tpu.memref_squeeze %345 : memref<1x!tpu.dma_semaphore, #tpu.memory_space<semaphore_mem>> -> memref<!tpu.dma_semaphore, #tpu.memory_space<semaphore_mem>>
    tpu.wait_dma2 semaphore(%346 : memref<!tpu.dma_semaphore, #tpu.memory_space<semaphore_mem>>) src(%342 : memref<1x128xf32, #tpu.memory_space<any>>) dst(%344 : memref<1x128xf32, #tpu.memory_space<vmem>>)
    %c2_i32_266 = arith.constant 2 : i32
    %c2_i32_267 = arith.constant 2 : i32
    %c0_i32_268 = arith.constant 0 : i32
    %347 = tpu.memref_slice %arg6[%3, %c0_i32_268] : memref<128x128xf32, #tpu.memory_space<any>> -> memref<1x128xf32, #tpu.memory_space<any>>
    %c0_i32_269 = arith.constant 0 : i32
    %c0_i32_270 = arith.constant 0 : i32
    %348 = tpu.memref_slice %arg8[%c2_i32_266, %c0_i32_269, %c0_i32_270] : memref<3x16x128xf32, #tpu.memory_space<vmem>> -> memref<1x1x128xf32, #tpu.memory_space<vmem>>
    %349 = tpu.memref_squeeze %348 : memref<1x1x128xf32, #tpu.memory_space<vmem>> -> memref<1x128xf32, #tpu.memory_space<vmem>>
    %350 = tpu.memref_slice %arg9[%c2_i32_267] : memref<3x!tpu.dma_semaphore, #tpu.memory_space<semaphore_mem>> -> memref<1x!tpu.dma_semaphore, #tpu.memory_space<semaphore_mem>>
    %351 = tpu.memref_squeeze %350 : memref<1x!tpu.dma_semaphore, #tpu.memory_space<semaphore_mem>> -> memref<!tpu.dma_semaphore, #tpu.memory_space<semaphore_mem>>
    tpu.wait_dma2 semaphore(%351 : memref<!tpu.dma_semaphore, #tpu.memory_space<semaphore_mem>>) src(%347 : memref<1x128xf32, #tpu.memory_space<any>>) dst(%349 : memref<1x128xf32, #tpu.memory_space<vmem>>)
    %c0_i32_271 = arith.constant 0 : i32
    %c0_i32_272 = arith.constant 0 : i32
    %c0_i32_273 = arith.constant 0 : i32
    %352 = tpu.memref_slice %arg4[%24, %c0_i32_273] : memref<128x128xf32, #tpu.memory_space<any>> -> memref<1x128xf32, #tpu.memory_space<any>>
    %c1_i32_274 = arith.constant 1 : i32
    %c0_i32_275 = arith.constant 0 : i32
    %353 = tpu.memref_slice %arg8[%c0_i32_271, %c1_i32_274, %c0_i32_275] : memref<3x16x128xf32, #tpu.memory_space<vmem>> -> memref<1x1x128xf32, #tpu.memory_space<vmem>>
    %354 = tpu.memref_squeeze %353 : memref<1x1x128xf32, #tpu.memory_space<vmem>> -> memref<1x128xf32, #tpu.memory_space<vmem>>
    %355 = tpu.memref_slice %arg9[%c0_i32_272] : memref<3x!tpu.dma_semaphore, #tpu.memory_space<semaphore_mem>> -> memref<1x!tpu.dma_semaphore, #tpu.memory_space<semaphore_mem>>
    %356 = tpu.memref_squeeze %355 : memref<1x!tpu.dma_semaphore, #tpu.memory_space<semaphore_mem>> -> memref<!tpu.dma_semaphore, #tpu.memory_space<semaphore_mem>>
    tpu.wait_dma2 semaphore(%356 : memref<!tpu.dma_semaphore, #tpu.memory_space<semaphore_mem>>) src(%352 : memref<1x128xf32, #tpu.memory_space<any>>) dst(%354 : memref<1x128xf32, #tpu.memory_space<vmem>>)
    %c1_i32_276 = arith.constant 1 : i32
    %c1_i32_277 = arith.constant 1 : i32
    %c0_i32_278 = arith.constant 0 : i32
    %357 = tpu.memref_slice %arg5[%27, %c0_i32_278] : memref<128x128xf32, #tpu.memory_space<any>> -> memref<1x128xf32, #tpu.memory_space<any>>
    %c1_i32_279 = arith.constant 1 : i32
    %c0_i32_280 = arith.constant 0 : i32
    %358 = tpu.memref_slice %arg8[%c1_i32_276, %c1_i32_279, %c0_i32_280] : memref<3x16x128xf32, #tpu.memory_space<vmem>> -> memref<1x1x128xf32, #tpu.memory_space<vmem>>
    %359 = tpu.memref_squeeze %358 : memref<1x1x128xf32, #tpu.memory_space<vmem>> -> memref<1x128xf32, #tpu.memory_space<vmem>>
    %360 = tpu.memref_slice %arg9[%c1_i32_277] : memref<3x!tpu.dma_semaphore, #tpu.memory_space<semaphore_mem>> -> memref<1x!tpu.dma_semaphore, #tpu.memory_space<semaphore_mem>>
    %361 = tpu.memref_squeeze %360 : memref<1x!tpu.dma_semaphore, #tpu.memory_space<semaphore_mem>> -> memref<!tpu.dma_semaphore, #tpu.memory_space<semaphore_mem>>
    tpu.wait_dma2 semaphore(%361 : memref<!tpu.dma_semaphore, #tpu.memory_space<semaphore_mem>>) src(%357 : memref<1x128xf32, #tpu.memory_space<any>>) dst(%359 : memref<1x128xf32, #tpu.memory_space<vmem>>)
    %c2_i32_281 = arith.constant 2 : i32
    %c2_i32_282 = arith.constant 2 : i32
    %c0_i32_283 = arith.constant 0 : i32
    %362 = tpu.memref_slice %arg6[%24, %c0_i32_283] : memref<128x128xf32, #tpu.memory_space<any>> -> memref<1x128xf32, #tpu.memory_space<any>>
    %c1_i32_284 = arith.constant 1 : i32
    %c0_i32_285 = arith.constant 0 : i32
    %363 = tpu.memref_slice %arg8[%c2_i32_281, %c1_i32_284, %c0_i32_285] : memref<3x16x128xf32, #tpu.memory_space<vmem>> -> memref<1x1x128xf32, #tpu.memory_space<vmem>>
    %364 = tpu.memref_squeeze %363 : memref<1x1x128xf32, #tpu.memory_space<vmem>> -> memref<1x128xf32, #tpu.memory_space<vmem>>
    %365 = tpu.memref_slice %arg9[%c2_i32_282] : memref<3x!tpu.dma_semaphore, #tpu.memory_space<semaphore_mem>> -> memref<1x!tpu.dma_semaphore, #tpu.memory_space<semaphore_mem>>
    %366 = tpu.memref_squeeze %365 : memref<1x!tpu.dma_semaphore, #tpu.memory_space<semaphore_mem>> -> memref<!tpu.dma_semaphore, #tpu.memory_space<semaphore_mem>>
    tpu.wait_dma2 semaphore(%366 : memref<!tpu.dma_semaphore, #tpu.memory_space<semaphore_mem>>) src(%362 : memref<1x128xf32, #tpu.memory_space<any>>) dst(%364 : memref<1x128xf32, #tpu.memory_space<vmem>>)
    %c0_i32_286 = arith.constant 0 : i32
    %c0_i32_287 = arith.constant 0 : i32
    %c0_i32_288 = arith.constant 0 : i32
    %367 = tpu.memref_slice %arg4[%45, %c0_i32_288] : memref<128x128xf32, #tpu.memory_space<any>> -> memref<1x128xf32, #tpu.memory_space<any>>
    %c2_i32_289 = arith.constant 2 : i32
    %c0_i32_290 = arith.constant 0 : i32
    %368 = tpu.memref_slice %arg8[%c0_i32_286, %c2_i32_289, %c0_i32_290] : memref<3x16x128xf32, #tpu.memory_space<vmem>> -> memref<1x1x128xf32, #tpu.memory_space<vmem>>
    %369 = tpu.memref_squeeze %368 : memref<1x1x128xf32, #tpu.memory_space<vmem>> -> memref<1x128xf32, #tpu.memory_space<vmem>>
    %370 = tpu.memref_slice %arg9[%c0_i32_287] : memref<3x!tpu.dma_semaphore, #tpu.memory_space<semaphore_mem>> -> memref<1x!tpu.dma_semaphore, #tpu.memory_space<semaphore_mem>>
    %371 = tpu.memref_squeeze %370 : memref<1x!tpu.dma_semaphore, #tpu.memory_space<semaphore_mem>> -> memref<!tpu.dma_semaphore, #tpu.memory_space<semaphore_mem>>
    tpu.wait_dma2 semaphore(%371 : memref<!tpu.dma_semaphore, #tpu.memory_space<semaphore_mem>>) src(%367 : memref<1x128xf32, #tpu.memory_space<any>>) dst(%369 : memref<1x128xf32, #tpu.memory_space<vmem>>)
    %c1_i32_291 = arith.constant 1 : i32
    %c1_i32_292 = arith.constant 1 : i32
    %c0_i32_293 = arith.constant 0 : i32
    %372 = tpu.memref_slice %arg5[%48, %c0_i32_293] : memref<128x128xf32, #tpu.memory_space<any>> -> memref<1x128xf32, #tpu.memory_space<any>>
    %c2_i32_294 = arith.constant 2 : i32
    %c0_i32_295 = arith.constant 0 : i32
    %373 = tpu.memref_slice %arg8[%c1_i32_291, %c2_i32_294, %c0_i32_295] : memref<3x16x128xf32, #tpu.memory_space<vmem>> -> memref<1x1x128xf32, #tpu.memory_space<vmem>>
    %374 = tpu.memref_squeeze %373 : memref<1x1x128xf32, #tpu.memory_space<vmem>> -> memref<1x128xf32, #tpu.memory_space<vmem>>
    %375 = tpu.memref_slice %arg9[%c1_i32_292] : memref<3x!tpu.dma_semaphore, #tpu.memory_space<semaphore_mem>> -> memref<1x!tpu.dma_semaphore, #tpu.memory_space<semaphore_mem>>
    %376 = tpu.memref_squeeze %375 : memref<1x!tpu.dma_semaphore, #tpu.memory_space<semaphore_mem>> -> memref<!tpu.dma_semaphore, #tpu.memory_space<semaphore_mem>>
    tpu.wait_dma2 semaphore(%376 : memref<!tpu.dma_semaphore, #tpu.memory_space<semaphore_mem>>) src(%372 : memref<1x128xf32, #tpu.memory_space<any>>) dst(%374 : memref<1x128xf32, #tpu.memory_space<vmem>>)
    %c2_i32_296 = arith.constant 2 : i32
    %c2_i32_297 = arith.constant 2 : i32
    %c0_i32_298 = arith.constant 0 : i32
    %377 = tpu.memref_slice %arg6[%45, %c0_i32_298] : memref<128x128xf32, #tpu.memory_space<any>> -> memref<1x128xf32, #tpu.memory_space<any>>
    %c2_i32_299 = arith.constant 2 : i32
    %c0_i32_300 = arith.constant 0 : i32
    %378 = tpu.memref_slice %arg8[%c2_i32_296, %c2_i32_299, %c0_i32_300] : memref<3x16x128xf32, #tpu.memory_space<vmem>> -> memref<1x1x128xf32, #tpu.memory_space<vmem>>
    %379 = tpu.memref_squeeze %378 : memref<1x1x128xf32, #tpu.memory_space<vmem>> -> memref<1x128xf32, #tpu.memory_space<vmem>>
    %380 = tpu.memref_slice %arg9[%c2_i32_297] : memref<3x!tpu.dma_semaphore, #tpu.memory_space<semaphore_mem>> -> memref<1x!tpu.dma_semaphore, #tpu.memory_space<semaphore_mem>>
    %381 = tpu.memref_squeeze %380 : memref<1x!tpu.dma_semaphore, #tpu.memory_space<semaphore_mem>> -> memref<!tpu.dma_semaphore, #tpu.memory_space<semaphore_mem>>
    tpu.wait_dma2 semaphore(%381 : memref<!tpu.dma_semaphore, #tpu.memory_space<semaphore_mem>>) src(%377 : memref<1x128xf32, #tpu.memory_space<any>>) dst(%379 : memref<1x128xf32, #tpu.memory_space<vmem>>)
    %c0_i32_301 = arith.constant 0 : i32
    %c0_i32_302 = arith.constant 0 : i32
    %c0_i32_303 = arith.constant 0 : i32
    %382 = tpu.memref_slice %arg4[%66, %c0_i32_303] : memref<128x128xf32, #tpu.memory_space<any>> -> memref<1x128xf32, #tpu.memory_space<any>>
    %c3_i32_304 = arith.constant 3 : i32
    %c0_i32_305 = arith.constant 0 : i32
    %383 = tpu.memref_slice %arg8[%c0_i32_301, %c3_i32_304, %c0_i32_305] : memref<3x16x128xf32, #tpu.memory_space<vmem>> -> memref<1x1x128xf32, #tpu.memory_space<vmem>>
    %384 = tpu.memref_squeeze %383 : memref<1x1x128xf32, #tpu.memory_space<vmem>> -> memref<1x128xf32, #tpu.memory_space<vmem>>
    %385 = tpu.memref_slice %arg9[%c0_i32_302] : memref<3x!tpu.dma_semaphore, #tpu.memory_space<semaphore_mem>> -> memref<1x!tpu.dma_semaphore, #tpu.memory_space<semaphore_mem>>
    %386 = tpu.memref_squeeze %385 : memref<1x!tpu.dma_semaphore, #tpu.memory_space<semaphore_mem>> -> memref<!tpu.dma_semaphore, #tpu.memory_space<semaphore_mem>>
    tpu.wait_dma2 semaphore(%386 : memref<!tpu.dma_semaphore, #tpu.memory_space<semaphore_mem>>) src(%382 : memref<1x128xf32, #tpu.memory_space<any>>) dst(%384 : memref<1x128xf32, #tpu.memory_space<vmem>>)
    %c1_i32_306 = arith.constant 1 : i32
    %c1_i32_307 = arith.constant 1 : i32
    %c0_i32_308 = arith.constant 0 : i32
    %387 = tpu.memref_slice %arg5[%69, %c0_i32_308] : memref<128x128xf32, #tpu.memory_space<any>> -> memref<1x128xf32, #tpu.memory_space<any>>
    %c3_i32_309 = arith.constant 3 : i32
    %c0_i32_310 = arith.constant 0 : i32
    %388 = tpu.memref_slice %arg8[%c1_i32_306, %c3_i32_309, %c0_i32_310] : memref<3x16x128xf32, #tpu.memory_space<vmem>> -> memref<1x1x128xf32, #tpu.memory_space<vmem>>
    %389 = tpu.memref_squeeze %388 : memref<1x1x128xf32, #tpu.memory_space<vmem>> -> memref<1x128xf32, #tpu.memory_space<vmem>>
    %390 = tpu.memref_slice %arg9[%c1_i32_307] : memref<3x!tpu.dma_semaphore, #tpu.memory_space<semaphore_mem>> -> memref<1x!tpu.dma_semaphore, #tpu.memory_space<semaphore_mem>>
    %391 = tpu.memref_squeeze %390 : memref<1x!tpu.dma_semaphore, #tpu.memory_space<semaphore_mem>> -> memref<!tpu.dma_semaphore, #tpu.memory_space<semaphore_mem>>
    tpu.wait_dma2 semaphore(%391 : memref<!tpu.dma_semaphore, #tpu.memory_space<semaphore_mem>>) src(%387 : memref<1x128xf32, #tpu.memory_space<any>>) dst(%389 : memref<1x128xf32, #tpu.memory_space<vmem>>)
    %c2_i32_311 = arith.constant 2 : i32
    %c2_i32_312 = arith.constant 2 : i32
    %c0_i32_313 = arith.constant 0 : i32
    %392 = tpu.memref_slice %arg6[%66, %c0_i32_313] : memref<128x128xf32, #tpu.memory_space<any>> -> memref<1x128xf32, #tpu.memory_space<any>>
    %c3_i32_314 = arith.constant 3 : i32
    %c0_i32_315 = arith.constant 0 : i32
    %393 = tpu.memref_slice %arg8[%c2_i32_311, %c3_i32_314, %c0_i32_315] : memref<3x16x128xf32, #tpu.memory_space<vmem>> -> memref<1x1x128xf32, #tpu.memory_space<vmem>>
    %394 = tpu.memref_squeeze %393 : memref<1x1x128xf32, #tpu.memory_space<vmem>> -> memref<1x128xf32, #tpu.memory_space<vmem>>
    %395 = tpu.memref_slice %arg9[%c2_i32_312] : memref<3x!tpu.dma_semaphore, #tpu.memory_space<semaphore_mem>> -> memref<1x!tpu.dma_semaphore, #tpu.memory_space<semaphore_mem>>
    %396 = tpu.memref_squeeze %395 : memref<1x!tpu.dma_semaphore, #tpu.memory_space<semaphore_mem>> -> memref<!tpu.dma_semaphore, #tpu.memory_space<semaphore_mem>>
    tpu.wait_dma2 semaphore(%396 : memref<!tpu.dma_semaphore, #tpu.memory_space<semaphore_mem>>) src(%392 : memref<1x128xf32, #tpu.memory_space<any>>) dst(%394 : memref<1x128xf32, #tpu.memory_space<vmem>>)
    %c0_i32_316 = arith.constant 0 : i32
    %c0_i32_317 = arith.constant 0 : i32
    %c0_i32_318 = arith.constant 0 : i32
    %397 = tpu.memref_slice %arg4[%87, %c0_i32_318] : memref<128x128xf32, #tpu.memory_space<any>> -> memref<1x128xf32, #tpu.memory_space<any>>
    %c4_i32_319 = arith.constant 4 : i32
    %c0_i32_320 = arith.constant 0 : i32
    %398 = tpu.memref_slice %arg8[%c0_i32_316, %c4_i32_319, %c0_i32_320] : memref<3x16x128xf32, #tpu.memory_space<vmem>> -> memref<1x1x128xf32, #tpu.memory_space<vmem>>
    %399 = tpu.memref_squeeze %398 : memref<1x1x128xf32, #tpu.memory_space<vmem>> -> memref<1x128xf32, #tpu.memory_space<vmem>>
    %400 = tpu.memref_slice %arg9[%c0_i32_317] : memref<3x!tpu.dma_semaphore, #tpu.memory_space<semaphore_mem>> -> memref<1x!tpu.dma_semaphore, #tpu.memory_space<semaphore_mem>>
    %401 = tpu.memref_squeeze %400 : memref<1x!tpu.dma_semaphore, #tpu.memory_space<semaphore_mem>> -> memref<!tpu.dma_semaphore, #tpu.memory_space<semaphore_mem>>
    tpu.wait_dma2 semaphore(%401 : memref<!tpu.dma_semaphore, #tpu.memory_space<semaphore_mem>>) src(%397 : memref<1x128xf32, #tpu.memory_space<any>>) dst(%399 : memref<1x128xf32, #tpu.memory_space<vmem>>)
    %c1_i32_321 = arith.constant 1 : i32
    %c1_i32_322 = arith.constant 1 : i32
    %c0_i32_323 = arith.constant 0 : i32
    %402 = tpu.memref_slice %arg5[%90, %c0_i32_323] : memref<128x128xf32, #tpu.memory_space<any>> -> memref<1x128xf32, #tpu.memory_space<any>>
    %c4_i32_324 = arith.constant 4 : i32
    %c0_i32_325 = arith.constant 0 : i32
    %403 = tpu.memref_slice %arg8[%c1_i32_321, %c4_i32_324, %c0_i32_325] : memref<3x16x128xf32, #tpu.memory_space<vmem>> -> memref<1x1x128xf32, #tpu.memory_space<vmem>>
    %404 = tpu.memref_squeeze %403 : memref<1x1x128xf32, #tpu.memory_space<vmem>> -> memref<1x128xf32, #tpu.memory_space<vmem>>
    %405 = tpu.memref_slice %arg9[%c1_i32_322] : memref<3x!tpu.dma_semaphore, #tpu.memory_space<semaphore_mem>> -> memref<1x!tpu.dma_semaphore, #tpu.memory_space<semaphore_mem>>
    %406 = tpu.memref_squeeze %405 : memref<1x!tpu.dma_semaphore, #tpu.memory_space<semaphore_mem>> -> memref<!tpu.dma_semaphore, #tpu.memory_space<semaphore_mem>>
    tpu.wait_dma2 semaphore(%406 : memref<!tpu.dma_semaphore, #tpu.memory_space<semaphore_mem>>) src(%402 : memref<1x128xf32, #tpu.memory_space<any>>) dst(%404 : memref<1x128xf32, #tpu.memory_space<vmem>>)
    %c2_i32_326 = arith.constant 2 : i32
    %c2_i32_327 = arith.constant 2 : i32
    %c0_i32_328 = arith.constant 0 : i32
    %407 = tpu.memref_slice %arg6[%87, %c0_i32_328] : memref<128x128xf32, #tpu.memory_space<any>> -> memref<1x128xf32, #tpu.memory_space<any>>
    %c4_i32_329 = arith.constant 4 : i32
    %c0_i32_330 = arith.constant 0 : i32
    %408 = tpu.memref_slice %arg8[%c2_i32_326, %c4_i32_329, %c0_i32_330] : memref<3x16x128xf32, #tpu.memory_space<vmem>> -> memref<1x1x128xf32, #tpu.memory_space<vmem>>
    %409 = tpu.memref_squeeze %408 : memref<1x1x128xf32, #tpu.memory_space<vmem>> -> memref<1x128xf32, #tpu.memory_space<vmem>>
    %410 = tpu.memref_slice %arg9[%c2_i32_327] : memref<3x!tpu.dma_semaphore, #tpu.memory_space<semaphore_mem>> -> memref<1x!tpu.dma_semaphore, #tpu.memory_space<semaphore_mem>>
    %411 = tpu.memref_squeeze %410 : memref<1x!tpu.dma_semaphore, #tpu.memory_space<semaphore_mem>> -> memref<!tpu.dma_semaphore, #tpu.memory_space<semaphore_mem>>
    tpu.wait_dma2 semaphore(%411 : memref<!tpu.dma_semaphore, #tpu.memory_space<semaphore_mem>>) src(%407 : memref<1x128xf32, #tpu.memory_space<any>>) dst(%409 : memref<1x128xf32, #tpu.memory_space<vmem>>)
    %c0_i32_331 = arith.constant 0 : i32
    %c0_i32_332 = arith.constant 0 : i32
    %c0_i32_333 = arith.constant 0 : i32
    %412 = tpu.memref_slice %arg4[%108, %c0_i32_333] : memref<128x128xf32, #tpu.memory_space<any>> -> memref<1x128xf32, #tpu.memory_space<any>>
    %c5_i32_334 = arith.constant 5 : i32
    %c0_i32_335 = arith.constant 0 : i32
    %413 = tpu.memref_slice %arg8[%c0_i32_331, %c5_i32_334, %c0_i32_335] : memref<3x16x128xf32, #tpu.memory_space<vmem>> -> memref<1x1x128xf32, #tpu.memory_space<vmem>>
    %414 = tpu.memref_squeeze %413 : memref<1x1x128xf32, #tpu.memory_space<vmem>> -> memref<1x128xf32, #tpu.memory_space<vmem>>
    %415 = tpu.memref_slice %arg9[%c0_i32_332] : memref<3x!tpu.dma_semaphore, #tpu.memory_space<semaphore_mem>> -> memref<1x!tpu.dma_semaphore, #tpu.memory_space<semaphore_mem>>
    %416 = tpu.memref_squeeze %415 : memref<1x!tpu.dma_semaphore, #tpu.memory_space<semaphore_mem>> -> memref<!tpu.dma_semaphore, #tpu.memory_space<semaphore_mem>>
    tpu.wait_dma2 semaphore(%416 : memref<!tpu.dma_semaphore, #tpu.memory_space<semaphore_mem>>) src(%412 : memref<1x128xf32, #tpu.memory_space<any>>) dst(%414 : memref<1x128xf32, #tpu.memory_space<vmem>>)
    %c1_i32_336 = arith.constant 1 : i32
    %c1_i32_337 = arith.constant 1 : i32
    %c0_i32_338 = arith.constant 0 : i32
    %417 = tpu.memref_slice %arg5[%111, %c0_i32_338] : memref<128x128xf32, #tpu.memory_space<any>> -> memref<1x128xf32, #tpu.memory_space<any>>
    %c5_i32_339 = arith.constant 5 : i32
    %c0_i32_340 = arith.constant 0 : i32
    %418 = tpu.memref_slice %arg8[%c1_i32_336, %c5_i32_339, %c0_i32_340] : memref<3x16x128xf32, #tpu.memory_space<vmem>> -> memref<1x1x128xf32, #tpu.memory_space<vmem>>
    %419 = tpu.memref_squeeze %418 : memref<1x1x128xf32, #tpu.memory_space<vmem>> -> memref<1x128xf32, #tpu.memory_space<vmem>>
    %420 = tpu.memref_slice %arg9[%c1_i32_337] : memref<3x!tpu.dma_semaphore, #tpu.memory_space<semaphore_mem>> -> memref<1x!tpu.dma_semaphore, #tpu.memory_space<semaphore_mem>>
    %421 = tpu.memref_squeeze %420 : memref<1x!tpu.dma_semaphore, #tpu.memory_space<semaphore_mem>> -> memref<!tpu.dma_semaphore, #tpu.memory_space<semaphore_mem>>
    tpu.wait_dma2 semaphore(%421 : memref<!tpu.dma_semaphore, #tpu.memory_space<semaphore_mem>>) src(%417 : memref<1x128xf32, #tpu.memory_space<any>>) dst(%419 : memref<1x128xf32, #tpu.memory_space<vmem>>)
    %c2_i32_341 = arith.constant 2 : i32
    %c2_i32_342 = arith.constant 2 : i32
    %c0_i32_343 = arith.constant 0 : i32
    %422 = tpu.memref_slice %arg6[%108, %c0_i32_343] : memref<128x128xf32, #tpu.memory_space<any>> -> memref<1x128xf32, #tpu.memory_space<any>>
    %c5_i32_344 = arith.constant 5 : i32
    %c0_i32_345 = arith.constant 0 : i32
    %423 = tpu.memref_slice %arg8[%c2_i32_341, %c5_i32_344, %c0_i32_345] : memref<3x16x128xf32, #tpu.memory_space<vmem>> -> memref<1x1x128xf32, #tpu.memory_space<vmem>>
    %424 = tpu.memref_squeeze %423 : memref<1x1x128xf32, #tpu.memory_space<vmem>> -> memref<1x128xf32, #tpu.memory_space<vmem>>
    %425 = tpu.memref_slice %arg9[%c2_i32_342] : memref<3x!tpu.dma_semaphore, #tpu.memory_space<semaphore_mem>> -> memref<1x!tpu.dma_semaphore, #tpu.memory_space<semaphore_mem>>
    %426 = tpu.memref_squeeze %425 : memref<1x!tpu.dma_semaphore, #tpu.memory_space<semaphore_mem>> -> memref<!tpu.dma_semaphore, #tpu.memory_space<semaphore_mem>>
    tpu.wait_dma2 semaphore(%426 : memref<!tpu.dma_semaphore, #tpu.memory_space<semaphore_mem>>) src(%422 : memref<1x128xf32, #tpu.memory_space<any>>) dst(%424 : memref<1x128xf32, #tpu.memory_space<vmem>>)
    %c0_i32_346 = arith.constant 0 : i32
    %c0_i32_347 = arith.constant 0 : i32
    %c0_i32_348 = arith.constant 0 : i32
    %427 = tpu.memref_slice %arg4[%129, %c0_i32_348] : memref<128x128xf32, #tpu.memory_space<any>> -> memref<1x128xf32, #tpu.memory_space<any>>
    %c6_i32_349 = arith.constant 6 : i32
    %c0_i32_350 = arith.constant 0 : i32
    %428 = tpu.memref_slice %arg8[%c0_i32_346, %c6_i32_349, %c0_i32_350] : memref<3x16x128xf32, #tpu.memory_space<vmem>> -> memref<1x1x128xf32, #tpu.memory_space<vmem>>
    %429 = tpu.memref_squeeze %428 : memref<1x1x128xf32, #tpu.memory_space<vmem>> -> memref<1x128xf32, #tpu.memory_space<vmem>>
    %430 = tpu.memref_slice %arg9[%c0_i32_347] : memref<3x!tpu.dma_semaphore, #tpu.memory_space<semaphore_mem>> -> memref<1x!tpu.dma_semaphore, #tpu.memory_space<semaphore_mem>>
    %431 = tpu.memref_squeeze %430 : memref<1x!tpu.dma_semaphore, #tpu.memory_space<semaphore_mem>> -> memref<!tpu.dma_semaphore, #tpu.memory_space<semaphore_mem>>
    tpu.wait_dma2 semaphore(%431 : memref<!tpu.dma_semaphore, #tpu.memory_space<semaphore_mem>>) src(%427 : memref<1x128xf32, #tpu.memory_space<any>>) dst(%429 : memref<1x128xf32, #tpu.memory_space<vmem>>)
    %c1_i32_351 = arith.constant 1 : i32
    %c1_i32_352 = arith.constant 1 : i32
    %c0_i32_353 = arith.constant 0 : i32
    %432 = tpu.memref_slice %arg5[%132, %c0_i32_353] : memref<128x128xf32, #tpu.memory_space<any>> -> memref<1x128xf32, #tpu.memory_space<any>>
    %c6_i32_354 = arith.constant 6 : i32
    %c0_i32_355 = arith.constant 0 : i32
    %433 = tpu.memref_slice %arg8[%c1_i32_351, %c6_i32_354, %c0_i32_355] : memref<3x16x128xf32, #tpu.memory_space<vmem>> -> memref<1x1x128xf32, #tpu.memory_space<vmem>>
    %434 = tpu.memref_squeeze %433 : memref<1x1x128xf32, #tpu.memory_space<vmem>> -> memref<1x128xf32, #tpu.memory_space<vmem>>
    %435 = tpu.memref_slice %arg9[%c1_i32_352] : memref<3x!tpu.dma_semaphore, #tpu.memory_space<semaphore_mem>> -> memref<1x!tpu.dma_semaphore, #tpu.memory_space<semaphore_mem>>
    %436 = tpu.memref_squeeze %435 : memref<1x!tpu.dma_semaphore, #tpu.memory_space<semaphore_mem>> -> memref<!tpu.dma_semaphore, #tpu.memory_space<semaphore_mem>>
    tpu.wait_dma2 semaphore(%436 : memref<!tpu.dma_semaphore, #tpu.memory_space<semaphore_mem>>) src(%432 : memref<1x128xf32, #tpu.memory_space<any>>) dst(%434 : memref<1x128xf32, #tpu.memory_space<vmem>>)
    %c2_i32_356 = arith.constant 2 : i32
    %c2_i32_357 = arith.constant 2 : i32
    %c0_i32_358 = arith.constant 0 : i32
    %437 = tpu.memref_slice %arg6[%129, %c0_i32_358] : memref<128x128xf32, #tpu.memory_space<any>> -> memref<1x128xf32, #tpu.memory_space<any>>
    %c6_i32_359 = arith.constant 6 : i32
    %c0_i32_360 = arith.constant 0 : i32
    %438 = tpu.memref_slice %arg8[%c2_i32_356, %c6_i32_359, %c0_i32_360] : memref<3x16x128xf32, #tpu.memory_space<vmem>> -> memref<1x1x128xf32, #tpu.memory_space<vmem>>
    %439 = tpu.memref_squeeze %438 : memref<1x1x128xf32, #tpu.memory_space<vmem>> -> memref<1x128xf32, #tpu.memory_space<vmem>>
    %440 = tpu.memref_slice %arg9[%c2_i32_357] : memref<3x!tpu.dma_semaphore, #tpu.memory_space<semaphore_mem>> -> memref<1x!tpu.dma_semaphore, #tpu.memory_space<semaphore_mem>>
    %441 = tpu.memref_squeeze %440 : memref<1x!tpu.dma_semaphore, #tpu.memory_space<semaphore_mem>> -> memref<!tpu.dma_semaphore, #tpu.memory_space<semaphore_mem>>
    tpu.wait_dma2 semaphore(%441 : memref<!tpu.dma_semaphore, #tpu.memory_space<semaphore_mem>>) src(%437 : memref<1x128xf32, #tpu.memory_space<any>>) dst(%439 : memref<1x128xf32, #tpu.memory_space<vmem>>)
    %c0_i32_361 = arith.constant 0 : i32
    %c0_i32_362 = arith.constant 0 : i32
    %c0_i32_363 = arith.constant 0 : i32
    %442 = tpu.memref_slice %arg4[%150, %c0_i32_363] : memref<128x128xf32, #tpu.memory_space<any>> -> memref<1x128xf32, #tpu.memory_space<any>>
    %c7_i32_364 = arith.constant 7 : i32
    %c0_i32_365 = arith.constant 0 : i32
    %443 = tpu.memref_slice %arg8[%c0_i32_361, %c7_i32_364, %c0_i32_365] : memref<3x16x128xf32, #tpu.memory_space<vmem>> -> memref<1x1x128xf32, #tpu.memory_space<vmem>>
    %444 = tpu.memref_squeeze %443 : memref<1x1x128xf32, #tpu.memory_space<vmem>> -> memref<1x128xf32, #tpu.memory_space<vmem>>
    %445 = tpu.memref_slice %arg9[%c0_i32_362] : memref<3x!tpu.dma_semaphore, #tpu.memory_space<semaphore_mem>> -> memref<1x!tpu.dma_semaphore, #tpu.memory_space<semaphore_mem>>
    %446 = tpu.memref_squeeze %445 : memref<1x!tpu.dma_semaphore, #tpu.memory_space<semaphore_mem>> -> memref<!tpu.dma_semaphore, #tpu.memory_space<semaphore_mem>>
    tpu.wait_dma2 semaphore(%446 : memref<!tpu.dma_semaphore, #tpu.memory_space<semaphore_mem>>) src(%442 : memref<1x128xf32, #tpu.memory_space<any>>) dst(%444 : memref<1x128xf32, #tpu.memory_space<vmem>>)
    %c1_i32_366 = arith.constant 1 : i32
    %c1_i32_367 = arith.constant 1 : i32
    %c0_i32_368 = arith.constant 0 : i32
    %447 = tpu.memref_slice %arg5[%153, %c0_i32_368] : memref<128x128xf32, #tpu.memory_space<any>> -> memref<1x128xf32, #tpu.memory_space<any>>
    %c7_i32_369 = arith.constant 7 : i32
    %c0_i32_370 = arith.constant 0 : i32
    %448 = tpu.memref_slice %arg8[%c1_i32_366, %c7_i32_369, %c0_i32_370] : memref<3x16x128xf32, #tpu.memory_space<vmem>> -> memref<1x1x128xf32, #tpu.memory_space<vmem>>
    %449 = tpu.memref_squeeze %448 : memref<1x1x128xf32, #tpu.memory_space<vmem>> -> memref<1x128xf32, #tpu.memory_space<vmem>>
    %450 = tpu.memref_slice %arg9[%c1_i32_367] : memref<3x!tpu.dma_semaphore, #tpu.memory_space<semaphore_mem>> -> memref<1x!tpu.dma_semaphore, #tpu.memory_space<semaphore_mem>>
    %451 = tpu.memref_squeeze %450 : memref<1x!tpu.dma_semaphore, #tpu.memory_space<semaphore_mem>> -> memref<!tpu.dma_semaphore, #tpu.memory_space<semaphore_mem>>
    tpu.wait_dma2 semaphore(%451 : memref<!tpu.dma_semaphore, #tpu.memory_space<semaphore_mem>>) src(%447 : memref<1x128xf32, #tpu.memory_space<any>>) dst(%449 : memref<1x128xf32, #tpu.memory_space<vmem>>)
    %c2_i32_371 = arith.constant 2 : i32
    %c2_i32_372 = arith.constant 2 : i32
    %c0_i32_373 = arith.constant 0 : i32
    %452 = tpu.memref_slice %arg6[%150, %c0_i32_373] : memref<128x128xf32, #tpu.memory_space<any>> -> memref<1x128xf32, #tpu.memory_space<any>>
    %c7_i32_374 = arith.constant 7 : i32
    %c0_i32_375 = arith.constant 0 : i32
    %453 = tpu.memref_slice %arg8[%c2_i32_371, %c7_i32_374, %c0_i32_375] : memref<3x16x128xf32, #tpu.memory_space<vmem>> -> memref<1x1x128xf32, #tpu.memory_space<vmem>>
    %454 = tpu.memref_squeeze %453 : memref<1x1x128xf32, #tpu.memory_space<vmem>> -> memref<1x128xf32, #tpu.memory_space<vmem>>
    %455 = tpu.memref_slice %arg9[%c2_i32_372] : memref<3x!tpu.dma_semaphore, #tpu.memory_space<semaphore_mem>> -> memref<1x!tpu.dma_semaphore, #tpu.memory_space<semaphore_mem>>
    %456 = tpu.memref_squeeze %455 : memref<1x!tpu.dma_semaphore, #tpu.memory_space<semaphore_mem>> -> memref<!tpu.dma_semaphore, #tpu.memory_space<semaphore_mem>>
    tpu.wait_dma2 semaphore(%456 : memref<!tpu.dma_semaphore, #tpu.memory_space<semaphore_mem>>) src(%452 : memref<1x128xf32, #tpu.memory_space<any>>) dst(%454 : memref<1x128xf32, #tpu.memory_space<vmem>>)
    %c0_i32_376 = arith.constant 0 : i32
    %c0_i32_377 = arith.constant 0 : i32
    %c0_i32_378 = arith.constant 0 : i32
    %457 = tpu.memref_slice %arg4[%171, %c0_i32_378] : memref<128x128xf32, #tpu.memory_space<any>> -> memref<1x128xf32, #tpu.memory_space<any>>
    %c8_i32_379 = arith.constant 8 : i32
    %c0_i32_380 = arith.constant 0 : i32
    %458 = tpu.memref_slice %arg8[%c0_i32_376, %c8_i32_379, %c0_i32_380] : memref<3x16x128xf32, #tpu.memory_space<vmem>> -> memref<1x1x128xf32, #tpu.memory_space<vmem>>
    %459 = tpu.memref_squeeze %458 : memref<1x1x128xf32, #tpu.memory_space<vmem>> -> memref<1x128xf32, #tpu.memory_space<vmem>>
    %460 = tpu.memref_slice %arg9[%c0_i32_377] : memref<3x!tpu.dma_semaphore, #tpu.memory_space<semaphore_mem>> -> memref<1x!tpu.dma_semaphore, #tpu.memory_space<semaphore_mem>>
    %461 = tpu.memref_squeeze %460 : memref<1x!tpu.dma_semaphore, #tpu.memory_space<semaphore_mem>> -> memref<!tpu.dma_semaphore, #tpu.memory_space<semaphore_mem>>
    tpu.wait_dma2 semaphore(%461 : memref<!tpu.dma_semaphore, #tpu.memory_space<semaphore_mem>>) src(%457 : memref<1x128xf32, #tpu.memory_space<any>>) dst(%459 : memref<1x128xf32, #tpu.memory_space<vmem>>)
    %c1_i32_381 = arith.constant 1 : i32
    %c1_i32_382 = arith.constant 1 : i32
    %c0_i32_383 = arith.constant 0 : i32
    %462 = tpu.memref_slice %arg5[%174, %c0_i32_383] : memref<128x128xf32, #tpu.memory_space<any>> -> memref<1x128xf32, #tpu.memory_space<any>>
    %c8_i32_384 = arith.constant 8 : i32
    %c0_i32_385 = arith.constant 0 : i32
    %463 = tpu.memref_slice %arg8[%c1_i32_381, %c8_i32_384, %c0_i32_385] : memref<3x16x128xf32, #tpu.memory_space<vmem>> -> memref<1x1x128xf32, #tpu.memory_space<vmem>>
    %464 = tpu.memref_squeeze %463 : memref<1x1x128xf32, #tpu.memory_space<vmem>> -> memref<1x128xf32, #tpu.memory_space<vmem>>
    %465 = tpu.memref_slice %arg9[%c1_i32_382] : memref<3x!tpu.dma_semaphore, #tpu.memory_space<semaphore_mem>> -> memref<1x!tpu.dma_semaphore, #tpu.memory_space<semaphore_mem>>
    %466 = tpu.memref_squeeze %465 : memref<1x!tpu.dma_semaphore, #tpu.memory_space<semaphore_mem>> -> memref<!tpu.dma_semaphore, #tpu.memory_space<semaphore_mem>>
    tpu.wait_dma2 semaphore(%466 : memref<!tpu.dma_semaphore, #tpu.memory_space<semaphore_mem>>) src(%462 : memref<1x128xf32, #tpu.memory_space<any>>) dst(%464 : memref<1x128xf32, #tpu.memory_space<vmem>>)
    %c2_i32_386 = arith.constant 2 : i32
    %c2_i32_387 = arith.constant 2 : i32
    %c0_i32_388 = arith.constant 0 : i32
    %467 = tpu.memref_slice %arg6[%171, %c0_i32_388] : memref<128x128xf32, #tpu.memory_space<any>> -> memref<1x128xf32, #tpu.memory_space<any>>
    %c8_i32_389 = arith.constant 8 : i32
    %c0_i32_390 = arith.constant 0 : i32
    %468 = tpu.memref_slice %arg8[%c2_i32_386, %c8_i32_389, %c0_i32_390] : memref<3x16x128xf32, #tpu.memory_space<vmem>> -> memref<1x1x128xf32, #tpu.memory_space<vmem>>
    %469 = tpu.memref_squeeze %468 : memref<1x1x128xf32, #tpu.memory_space<vmem>> -> memref<1x128xf32, #tpu.memory_space<vmem>>
    %470 = tpu.memref_slice %arg9[%c2_i32_387] : memref<3x!tpu.dma_semaphore, #tpu.memory_space<semaphore_mem>> -> memref<1x!tpu.dma_semaphore, #tpu.memory_space<semaphore_mem>>
    %471 = tpu.memref_squeeze %470 : memref<1x!tpu.dma_semaphore, #tpu.memory_space<semaphore_mem>> -> memref<!tpu.dma_semaphore, #tpu.memory_space<semaphore_mem>>
    tpu.wait_dma2 semaphore(%471 : memref<!tpu.dma_semaphore, #tpu.memory_space<semaphore_mem>>) src(%467 : memref<1x128xf32, #tpu.memory_space<any>>) dst(%469 : memref<1x128xf32, #tpu.memory_space<vmem>>)
    %c0_i32_391 = arith.constant 0 : i32
    %c0_i32_392 = arith.constant 0 : i32
    %c0_i32_393 = arith.constant 0 : i32
    %472 = tpu.memref_slice %arg4[%192, %c0_i32_393] : memref<128x128xf32, #tpu.memory_space<any>> -> memref<1x128xf32, #tpu.memory_space<any>>
    %c9_i32_394 = arith.constant 9 : i32
    %c0_i32_395 = arith.constant 0 : i32
    %473 = tpu.memref_slice %arg8[%c0_i32_391, %c9_i32_394, %c0_i32_395] : memref<3x16x128xf32, #tpu.memory_space<vmem>> -> memref<1x1x128xf32, #tpu.memory_space<vmem>>
    %474 = tpu.memref_squeeze %473 : memref<1x1x128xf32, #tpu.memory_space<vmem>> -> memref<1x128xf32, #tpu.memory_space<vmem>>
    %475 = tpu.memref_slice %arg9[%c0_i32_392] : memref<3x!tpu.dma_semaphore, #tpu.memory_space<semaphore_mem>> -> memref<1x!tpu.dma_semaphore, #tpu.memory_space<semaphore_mem>>
    %476 = tpu.memref_squeeze %475 : memref<1x!tpu.dma_semaphore, #tpu.memory_space<semaphore_mem>> -> memref<!tpu.dma_semaphore, #tpu.memory_space<semaphore_mem>>
    tpu.wait_dma2 semaphore(%476 : memref<!tpu.dma_semaphore, #tpu.memory_space<semaphore_mem>>) src(%472 : memref<1x128xf32, #tpu.memory_space<any>>) dst(%474 : memref<1x128xf32, #tpu.memory_space<vmem>>)
    %c1_i32_396 = arith.constant 1 : i32
    %c1_i32_397 = arith.constant 1 : i32
    %c0_i32_398 = arith.constant 0 : i32
    %477 = tpu.memref_slice %arg5[%195, %c0_i32_398] : memref<128x128xf32, #tpu.memory_space<any>> -> memref<1x128xf32, #tpu.memory_space<any>>
    %c9_i32_399 = arith.constant 9 : i32
    %c0_i32_400 = arith.constant 0 : i32
    %478 = tpu.memref_slice %arg8[%c1_i32_396, %c9_i32_399, %c0_i32_400] : memref<3x16x128xf32, #tpu.memory_space<vmem>> -> memref<1x1x128xf32, #tpu.memory_space<vmem>>
    %479 = tpu.memref_squeeze %478 : memref<1x1x128xf32, #tpu.memory_space<vmem>> -> memref<1x128xf32, #tpu.memory_space<vmem>>
    %480 = tpu.memref_slice %arg9[%c1_i32_397] : memref<3x!tpu.dma_semaphore, #tpu.memory_space<semaphore_mem>> -> memref<1x!tpu.dma_semaphore, #tpu.memory_space<semaphore_mem>>
    %481 = tpu.memref_squeeze %480 : memref<1x!tpu.dma_semaphore, #tpu.memory_space<semaphore_mem>> -> memref<!tpu.dma_semaphore, #tpu.memory_space<semaphore_mem>>
    tpu.wait_dma2 semaphore(%481 : memref<!tpu.dma_semaphore, #tpu.memory_space<semaphore_mem>>) src(%477 : memref<1x128xf32, #tpu.memory_space<any>>) dst(%479 : memref<1x128xf32, #tpu.memory_space<vmem>>)
    %c2_i32_401 = arith.constant 2 : i32
    %c2_i32_402 = arith.constant 2 : i32
    %c0_i32_403 = arith.constant 0 : i32
    %482 = tpu.memref_slice %arg6[%192, %c0_i32_403] : memref<128x128xf32, #tpu.memory_space<any>> -> memref<1x128xf32, #tpu.memory_space<any>>
    %c9_i32_404 = arith.constant 9 : i32
    %c0_i32_405 = arith.constant 0 : i32
    %483 = tpu.memref_slice %arg8[%c2_i32_401, %c9_i32_404, %c0_i32_405] : memref<3x16x128xf32, #tpu.memory_space<vmem>> -> memref<1x1x128xf32, #tpu.memory_space<vmem>>
    %484 = tpu.memref_squeeze %483 : memref<1x1x128xf32, #tpu.memory_space<vmem>> -> memref<1x128xf32, #tpu.memory_space<vmem>>
    %485 = tpu.memref_slice %arg9[%c2_i32_402] : memref<3x!tpu.dma_semaphore, #tpu.memory_space<semaphore_mem>> -> memref<1x!tpu.dma_semaphore, #tpu.memory_space<semaphore_mem>>
    %486 = tpu.memref_squeeze %485 : memref<1x!tpu.dma_semaphore, #tpu.memory_space<semaphore_mem>> -> memref<!tpu.dma_semaphore, #tpu.memory_space<semaphore_mem>>
    tpu.wait_dma2 semaphore(%486 : memref<!tpu.dma_semaphore, #tpu.memory_space<semaphore_mem>>) src(%482 : memref<1x128xf32, #tpu.memory_space<any>>) dst(%484 : memref<1x128xf32, #tpu.memory_space<vmem>>)
    %c0_i32_406 = arith.constant 0 : i32
    %c0_i32_407 = arith.constant 0 : i32
    %c0_i32_408 = arith.constant 0 : i32
    %487 = tpu.memref_slice %arg4[%213, %c0_i32_408] : memref<128x128xf32, #tpu.memory_space<any>> -> memref<1x128xf32, #tpu.memory_space<any>>
    %c10_i32_409 = arith.constant 10 : i32
    %c0_i32_410 = arith.constant 0 : i32
    %488 = tpu.memref_slice %arg8[%c0_i32_406, %c10_i32_409, %c0_i32_410] : memref<3x16x128xf32, #tpu.memory_space<vmem>> -> memref<1x1x128xf32, #tpu.memory_space<vmem>>
    %489 = tpu.memref_squeeze %488 : memref<1x1x128xf32, #tpu.memory_space<vmem>> -> memref<1x128xf32, #tpu.memory_space<vmem>>
    %490 = tpu.memref_slice %arg9[%c0_i32_407] : memref<3x!tpu.dma_semaphore, #tpu.memory_space<semaphore_mem>> -> memref<1x!tpu.dma_semaphore, #tpu.memory_space<semaphore_mem>>
    %491 = tpu.memref_squeeze %490 : memref<1x!tpu.dma_semaphore, #tpu.memory_space<semaphore_mem>> -> memref<!tpu.dma_semaphore, #tpu.memory_space<semaphore_mem>>
    tpu.wait_dma2 semaphore(%491 : memref<!tpu.dma_semaphore, #tpu.memory_space<semaphore_mem>>) src(%487 : memref<1x128xf32, #tpu.memory_space<any>>) dst(%489 : memref<1x128xf32, #tpu.memory_space<vmem>>)
    %c1_i32_411 = arith.constant 1 : i32
    %c1_i32_412 = arith.constant 1 : i32
    %c0_i32_413 = arith.constant 0 : i32
    %492 = tpu.memref_slice %arg5[%216, %c0_i32_413] : memref<128x128xf32, #tpu.memory_space<any>> -> memref<1x128xf32, #tpu.memory_space<any>>
    %c10_i32_414 = arith.constant 10 : i32
    %c0_i32_415 = arith.constant 0 : i32
    %493 = tpu.memref_slice %arg8[%c1_i32_411, %c10_i32_414, %c0_i32_415] : memref<3x16x128xf32, #tpu.memory_space<vmem>> -> memref<1x1x128xf32, #tpu.memory_space<vmem>>
    %494 = tpu.memref_squeeze %493 : memref<1x1x128xf32, #tpu.memory_space<vmem>> -> memref<1x128xf32, #tpu.memory_space<vmem>>
    %495 = tpu.memref_slice %arg9[%c1_i32_412] : memref<3x!tpu.dma_semaphore, #tpu.memory_space<semaphore_mem>> -> memref<1x!tpu.dma_semaphore, #tpu.memory_space<semaphore_mem>>
    %496 = tpu.memref_squeeze %495 : memref<1x!tpu.dma_semaphore, #tpu.memory_space<semaphore_mem>> -> memref<!tpu.dma_semaphore, #tpu.memory_space<semaphore_mem>>
    tpu.wait_dma2 semaphore(%496 : memref<!tpu.dma_semaphore, #tpu.memory_space<semaphore_mem>>) src(%492 : memref<1x128xf32, #tpu.memory_space<any>>) dst(%494 : memref<1x128xf32, #tpu.memory_space<vmem>>)
    %c2_i32_416 = arith.constant 2 : i32
    %c2_i32_417 = arith.constant 2 : i32
    %c0_i32_418 = arith.constant 0 : i32
    %497 = tpu.memref_slice %arg6[%213, %c0_i32_418] : memref<128x128xf32, #tpu.memory_space<any>> -> memref<1x128xf32, #tpu.memory_space<any>>
    %c10_i32_419 = arith.constant 10 : i32
    %c0_i32_420 = arith.constant 0 : i32
    %498 = tpu.memref_slice %arg8[%c2_i32_416, %c10_i32_419, %c0_i32_420] : memref<3x16x128xf32, #tpu.memory_space<vmem>> -> memref<1x1x128xf32, #tpu.memory_space<vmem>>
    %499 = tpu.memref_squeeze %498 : memref<1x1x128xf32, #tpu.memory_space<vmem>> -> memref<1x128xf32, #tpu.memory_space<vmem>>
    %500 = tpu.memref_slice %arg9[%c2_i32_417] : memref<3x!tpu.dma_semaphore, #tpu.memory_space<semaphore_mem>> -> memref<1x!tpu.dma_semaphore, #tpu.memory_space<semaphore_mem>>
    %501 = tpu.memref_squeeze %500 : memref<1x!tpu.dma_semaphore, #tpu.memory_space<semaphore_mem>> -> memref<!tpu.dma_semaphore, #tpu.memory_space<semaphore_mem>>
    tpu.wait_dma2 semaphore(%501 : memref<!tpu.dma_semaphore, #tpu.memory_space<semaphore_mem>>) src(%497 : memref<1x128xf32, #tpu.memory_space<any>>) dst(%499 : memref<1x128xf32, #tpu.memory_space<vmem>>)
    %c0_i32_421 = arith.constant 0 : i32
    %c0_i32_422 = arith.constant 0 : i32
    %c0_i32_423 = arith.constant 0 : i32
    %502 = tpu.memref_slice %arg4[%234, %c0_i32_423] : memref<128x128xf32, #tpu.memory_space<any>> -> memref<1x128xf32, #tpu.memory_space<any>>
    %c11_i32_424 = arith.constant 11 : i32
    %c0_i32_425 = arith.constant 0 : i32
    %503 = tpu.memref_slice %arg8[%c0_i32_421, %c11_i32_424, %c0_i32_425] : memref<3x16x128xf32, #tpu.memory_space<vmem>> -> memref<1x1x128xf32, #tpu.memory_space<vmem>>
    %504 = tpu.memref_squeeze %503 : memref<1x1x128xf32, #tpu.memory_space<vmem>> -> memref<1x128xf32, #tpu.memory_space<vmem>>
    %505 = tpu.memref_slice %arg9[%c0_i32_422] : memref<3x!tpu.dma_semaphore, #tpu.memory_space<semaphore_mem>> -> memref<1x!tpu.dma_semaphore, #tpu.memory_space<semaphore_mem>>
    %506 = tpu.memref_squeeze %505 : memref<1x!tpu.dma_semaphore, #tpu.memory_space<semaphore_mem>> -> memref<!tpu.dma_semaphore, #tpu.memory_space<semaphore_mem>>
    tpu.wait_dma2 semaphore(%506 : memref<!tpu.dma_semaphore, #tpu.memory_space<semaphore_mem>>) src(%502 : memref<1x128xf32, #tpu.memory_space<any>>) dst(%504 : memref<1x128xf32, #tpu.memory_space<vmem>>)
    %c1_i32_426 = arith.constant 1 : i32
    %c1_i32_427 = arith.constant 1 : i32
    %c0_i32_428 = arith.constant 0 : i32
    %507 = tpu.memref_slice %arg5[%237, %c0_i32_428] : memref<128x128xf32, #tpu.memory_space<any>> -> memref<1x128xf32, #tpu.memory_space<any>>
    %c11_i32_429 = arith.constant 11 : i32
    %c0_i32_430 = arith.constant 0 : i32
    %508 = tpu.memref_slice %arg8[%c1_i32_426, %c11_i32_429, %c0_i32_430] : memref<3x16x128xf32, #tpu.memory_space<vmem>> -> memref<1x1x128xf32, #tpu.memory_space<vmem>>
    %509 = tpu.memref_squeeze %508 : memref<1x1x128xf32, #tpu.memory_space<vmem>> -> memref<1x128xf32, #tpu.memory_space<vmem>>
    %510 = tpu.memref_slice %arg9[%c1_i32_427] : memref<3x!tpu.dma_semaphore, #tpu.memory_space<semaphore_mem>> -> memref<1x!tpu.dma_semaphore, #tpu.memory_space<semaphore_mem>>
    %511 = tpu.memref_squeeze %510 : memref<1x!tpu.dma_semaphore, #tpu.memory_space<semaphore_mem>> -> memref<!tpu.dma_semaphore, #tpu.memory_space<semaphore_mem>>
    tpu.wait_dma2 semaphore(%511 : memref<!tpu.dma_semaphore, #tpu.memory_space<semaphore_mem>>) src(%507 : memref<1x128xf32, #tpu.memory_space<any>>) dst(%509 : memref<1x128xf32, #tpu.memory_space<vmem>>)
    %c2_i32_431 = arith.constant 2 : i32
    %c2_i32_432 = arith.constant 2 : i32
    %c0_i32_433 = arith.constant 0 : i32
    %512 = tpu.memref_slice %arg6[%234, %c0_i32_433] : memref<128x128xf32, #tpu.memory_space<any>> -> memref<1x128xf32, #tpu.memory_space<any>>
    %c11_i32_434 = arith.constant 11 : i32
    %c0_i32_435 = arith.constant 0 : i32
    %513 = tpu.memref_slice %arg8[%c2_i32_431, %c11_i32_434, %c0_i32_435] : memref<3x16x128xf32, #tpu.memory_space<vmem>> -> memref<1x1x128xf32, #tpu.memory_space<vmem>>
    %514 = tpu.memref_squeeze %513 : memref<1x1x128xf32, #tpu.memory_space<vmem>> -> memref<1x128xf32, #tpu.memory_space<vmem>>
    %515 = tpu.memref_slice %arg9[%c2_i32_432] : memref<3x!tpu.dma_semaphore, #tpu.memory_space<semaphore_mem>> -> memref<1x!tpu.dma_semaphore, #tpu.memory_space<semaphore_mem>>
    %516 = tpu.memref_squeeze %515 : memref<1x!tpu.dma_semaphore, #tpu.memory_space<semaphore_mem>> -> memref<!tpu.dma_semaphore, #tpu.memory_space<semaphore_mem>>
    tpu.wait_dma2 semaphore(%516 : memref<!tpu.dma_semaphore, #tpu.memory_space<semaphore_mem>>) src(%512 : memref<1x128xf32, #tpu.memory_space<any>>) dst(%514 : memref<1x128xf32, #tpu.memory_space<vmem>>)
    %c0_i32_436 = arith.constant 0 : i32
    %c0_i32_437 = arith.constant 0 : i32
    %c0_i32_438 = arith.constant 0 : i32
    %517 = tpu.memref_slice %arg4[%255, %c0_i32_438] : memref<128x128xf32, #tpu.memory_space<any>> -> memref<1x128xf32, #tpu.memory_space<any>>
    %c12_i32_439 = arith.constant 12 : i32
    %c0_i32_440 = arith.constant 0 : i32
    %518 = tpu.memref_slice %arg8[%c0_i32_436, %c12_i32_439, %c0_i32_440] : memref<3x16x128xf32, #tpu.memory_space<vmem>> -> memref<1x1x128xf32, #tpu.memory_space<vmem>>
    %519 = tpu.memref_squeeze %518 : memref<1x1x128xf32, #tpu.memory_space<vmem>> -> memref<1x128xf32, #tpu.memory_space<vmem>>
    %520 = tpu.memref_slice %arg9[%c0_i32_437] : memref<3x!tpu.dma_semaphore, #tpu.memory_space<semaphore_mem>> -> memref<1x!tpu.dma_semaphore, #tpu.memory_space<semaphore_mem>>
    %521 = tpu.memref_squeeze %520 : memref<1x!tpu.dma_semaphore, #tpu.memory_space<semaphore_mem>> -> memref<!tpu.dma_semaphore, #tpu.memory_space<semaphore_mem>>
    tpu.wait_dma2 semaphore(%521 : memref<!tpu.dma_semaphore, #tpu.memory_space<semaphore_mem>>) src(%517 : memref<1x128xf32, #tpu.memory_space<any>>) dst(%519 : memref<1x128xf32, #tpu.memory_space<vmem>>)
    %c1_i32_441 = arith.constant 1 : i32
    %c1_i32_442 = arith.constant 1 : i32
    %c0_i32_443 = arith.constant 0 : i32
    %522 = tpu.memref_slice %arg5[%258, %c0_i32_443] : memref<128x128xf32, #tpu.memory_space<any>> -> memref<1x128xf32, #tpu.memory_space<any>>
    %c12_i32_444 = arith.constant 12 : i32
    %c0_i32_445 = arith.constant 0 : i32
    %523 = tpu.memref_slice %arg8[%c1_i32_441, %c12_i32_444, %c0_i32_445] : memref<3x16x128xf32, #tpu.memory_space<vmem>> -> memref<1x1x128xf32, #tpu.memory_space<vmem>>
    %524 = tpu.memref_squeeze %523 : memref<1x1x128xf32, #tpu.memory_space<vmem>> -> memref<1x128xf32, #tpu.memory_space<vmem>>
    %525 = tpu.memref_slice %arg9[%c1_i32_442] : memref<3x!tpu.dma_semaphore, #tpu.memory_space<semaphore_mem>> -> memref<1x!tpu.dma_semaphore, #tpu.memory_space<semaphore_mem>>
    %526 = tpu.memref_squeeze %525 : memref<1x!tpu.dma_semaphore, #tpu.memory_space<semaphore_mem>> -> memref<!tpu.dma_semaphore, #tpu.memory_space<semaphore_mem>>
    tpu.wait_dma2 semaphore(%526 : memref<!tpu.dma_semaphore, #tpu.memory_space<semaphore_mem>>) src(%522 : memref<1x128xf32, #tpu.memory_space<any>>) dst(%524 : memref<1x128xf32, #tpu.memory_space<vmem>>)
    %c2_i32_446 = arith.constant 2 : i32
    %c2_i32_447 = arith.constant 2 : i32
    %c0_i32_448 = arith.constant 0 : i32
    %527 = tpu.memref_slice %arg6[%255, %c0_i32_448] : memref<128x128xf32, #tpu.memory_space<any>> -> memref<1x128xf32, #tpu.memory_space<any>>
    %c12_i32_449 = arith.constant 12 : i32
    %c0_i32_450 = arith.constant 0 : i32
    %528 = tpu.memref_slice %arg8[%c2_i32_446, %c12_i32_449, %c0_i32_450] : memref<3x16x128xf32, #tpu.memory_space<vmem>> -> memref<1x1x128xf32, #tpu.memory_space<vmem>>
    %529 = tpu.memref_squeeze %528 : memref<1x1x128xf32, #tpu.memory_space<vmem>> -> memref<1x128xf32, #tpu.memory_space<vmem>>
    %530 = tpu.memref_slice %arg9[%c2_i32_447] : memref<3x!tpu.dma_semaphore, #tpu.memory_space<semaphore_mem>> -> memref<1x!tpu.dma_semaphore, #tpu.memory_space<semaphore_mem>>
    %531 = tpu.memref_squeeze %530 : memref<1x!tpu.dma_semaphore, #tpu.memory_space<semaphore_mem>> -> memref<!tpu.dma_semaphore, #tpu.memory_space<semaphore_mem>>
    tpu.wait_dma2 semaphore(%531 : memref<!tpu.dma_semaphore, #tpu.memory_space<semaphore_mem>>) src(%527 : memref<1x128xf32, #tpu.memory_space<any>>) dst(%529 : memref<1x128xf32, #tpu.memory_space<vmem>>)
    %c0_i32_451 = arith.constant 0 : i32
    %c0_i32_452 = arith.constant 0 : i32
    %c0_i32_453 = arith.constant 0 : i32
    %532 = tpu.memref_slice %arg4[%276, %c0_i32_453] : memref<128x128xf32, #tpu.memory_space<any>> -> memref<1x128xf32, #tpu.memory_space<any>>
    %c13_i32_454 = arith.constant 13 : i32
    %c0_i32_455 = arith.constant 0 : i32
    %533 = tpu.memref_slice %arg8[%c0_i32_451, %c13_i32_454, %c0_i32_455] : memref<3x16x128xf32, #tpu.memory_space<vmem>> -> memref<1x1x128xf32, #tpu.memory_space<vmem>>
    %534 = tpu.memref_squeeze %533 : memref<1x1x128xf32, #tpu.memory_space<vmem>> -> memref<1x128xf32, #tpu.memory_space<vmem>>
    %535 = tpu.memref_slice %arg9[%c0_i32_452] : memref<3x!tpu.dma_semaphore, #tpu.memory_space<semaphore_mem>> -> memref<1x!tpu.dma_semaphore, #tpu.memory_space<semaphore_mem>>
    %536 = tpu.memref_squeeze %535 : memref<1x!tpu.dma_semaphore, #tpu.memory_space<semaphore_mem>> -> memref<!tpu.dma_semaphore, #tpu.memory_space<semaphore_mem>>
    tpu.wait_dma2 semaphore(%536 : memref<!tpu.dma_semaphore, #tpu.memory_space<semaphore_mem>>) src(%532 : memref<1x128xf32, #tpu.memory_space<any>>) dst(%534 : memref<1x128xf32, #tpu.memory_space<vmem>>)
    %c1_i32_456 = arith.constant 1 : i32
    %c1_i32_457 = arith.constant 1 : i32
    %c0_i32_458 = arith.constant 0 : i32
    %537 = tpu.memref_slice %arg5[%279, %c0_i32_458] : memref<128x128xf32, #tpu.memory_space<any>> -> memref<1x128xf32, #tpu.memory_space<any>>
    %c13_i32_459 = arith.constant 13 : i32
    %c0_i32_460 = arith.constant 0 : i32
    %538 = tpu.memref_slice %arg8[%c1_i32_456, %c13_i32_459, %c0_i32_460] : memref<3x16x128xf32, #tpu.memory_space<vmem>> -> memref<1x1x128xf32, #tpu.memory_space<vmem>>
    %539 = tpu.memref_squeeze %538 : memref<1x1x128xf32, #tpu.memory_space<vmem>> -> memref<1x128xf32, #tpu.memory_space<vmem>>
    %540 = tpu.memref_slice %arg9[%c1_i32_457] : memref<3x!tpu.dma_semaphore, #tpu.memory_space<semaphore_mem>> -> memref<1x!tpu.dma_semaphore, #tpu.memory_space<semaphore_mem>>
    %541 = tpu.memref_squeeze %540 : memref<1x!tpu.dma_semaphore, #tpu.memory_space<semaphore_mem>> -> memref<!tpu.dma_semaphore, #tpu.memory_space<semaphore_mem>>
    tpu.wait_dma2 semaphore(%541 : memref<!tpu.dma_semaphore, #tpu.memory_space<semaphore_mem>>) src(%537 : memref<1x128xf32, #tpu.memory_space<any>>) dst(%539 : memref<1x128xf32, #tpu.memory_space<vmem>>)
    %c2_i32_461 = arith.constant 2 : i32
    %c2_i32_462 = arith.constant 2 : i32
    %c0_i32_463 = arith.constant 0 : i32
    %542 = tpu.memref_slice %arg6[%276, %c0_i32_463] : memref<128x128xf32, #tpu.memory_space<any>> -> memref<1x128xf32, #tpu.memory_space<any>>
    %c13_i32_464 = arith.constant 13 : i32
    %c0_i32_465 = arith.constant 0 : i32
    %543 = tpu.memref_slice %arg8[%c2_i32_461, %c13_i32_464, %c0_i32_465] : memref<3x16x128xf32, #tpu.memory_space<vmem>> -> memref<1x1x128xf32, #tpu.memory_space<vmem>>
    %544 = tpu.memref_squeeze %543 : memref<1x1x128xf32, #tpu.memory_space<vmem>> -> memref<1x128xf32, #tpu.memory_space<vmem>>
    %545 = tpu.memref_slice %arg9[%c2_i32_462] : memref<3x!tpu.dma_semaphore, #tpu.memory_space<semaphore_mem>> -> memref<1x!tpu.dma_semaphore, #tpu.memory_space<semaphore_mem>>
    %546 = tpu.memref_squeeze %545 : memref<1x!tpu.dma_semaphore, #tpu.memory_space<semaphore_mem>> -> memref<!tpu.dma_semaphore, #tpu.memory_space<semaphore_mem>>
    tpu.wait_dma2 semaphore(%546 : memref<!tpu.dma_semaphore, #tpu.memory_space<semaphore_mem>>) src(%542 : memref<1x128xf32, #tpu.memory_space<any>>) dst(%544 : memref<1x128xf32, #tpu.memory_space<vmem>>)
    %c0_i32_466 = arith.constant 0 : i32
    %c0_i32_467 = arith.constant 0 : i32
    %c0_i32_468 = arith.constant 0 : i32
    %547 = tpu.memref_slice %arg4[%297, %c0_i32_468] : memref<128x128xf32, #tpu.memory_space<any>> -> memref<1x128xf32, #tpu.memory_space<any>>
    %c14_i32_469 = arith.constant 14 : i32
    %c0_i32_470 = arith.constant 0 : i32
    %548 = tpu.memref_slice %arg8[%c0_i32_466, %c14_i32_469, %c0_i32_470] : memref<3x16x128xf32, #tpu.memory_space<vmem>> -> memref<1x1x128xf32, #tpu.memory_space<vmem>>
    %549 = tpu.memref_squeeze %548 : memref<1x1x128xf32, #tpu.memory_space<vmem>> -> memref<1x128xf32, #tpu.memory_space<vmem>>
    %550 = tpu.memref_slice %arg9[%c0_i32_467] : memref<3x!tpu.dma_semaphore, #tpu.memory_space<semaphore_mem>> -> memref<1x!tpu.dma_semaphore, #tpu.memory_space<semaphore_mem>>
    %551 = tpu.memref_squeeze %550 : memref<1x!tpu.dma_semaphore, #tpu.memory_space<semaphore_mem>> -> memref<!tpu.dma_semaphore, #tpu.memory_space<semaphore_mem>>
    tpu.wait_dma2 semaphore(%551 : memref<!tpu.dma_semaphore, #tpu.memory_space<semaphore_mem>>) src(%547 : memref<1x128xf32, #tpu.memory_space<any>>) dst(%549 : memref<1x128xf32, #tpu.memory_space<vmem>>)
    %c1_i32_471 = arith.constant 1 : i32
    %c1_i32_472 = arith.constant 1 : i32
    %c0_i32_473 = arith.constant 0 : i32
    %552 = tpu.memref_slice %arg5[%300, %c0_i32_473] : memref<128x128xf32, #tpu.memory_space<any>> -> memref<1x128xf32, #tpu.memory_space<any>>
    %c14_i32_474 = arith.constant 14 : i32
    %c0_i32_475 = arith.constant 0 : i32
    %553 = tpu.memref_slice %arg8[%c1_i32_471, %c14_i32_474, %c0_i32_475] : memref<3x16x128xf32, #tpu.memory_space<vmem>> -> memref<1x1x128xf32, #tpu.memory_space<vmem>>
    %554 = tpu.memref_squeeze %553 : memref<1x1x128xf32, #tpu.memory_space<vmem>> -> memref<1x128xf32, #tpu.memory_space<vmem>>
    %555 = tpu.memref_slice %arg9[%c1_i32_472] : memref<3x!tpu.dma_semaphore, #tpu.memory_space<semaphore_mem>> -> memref<1x!tpu.dma_semaphore, #tpu.memory_space<semaphore_mem>>
    %556 = tpu.memref_squeeze %555 : memref<1x!tpu.dma_semaphore, #tpu.memory_space<semaphore_mem>> -> memref<!tpu.dma_semaphore, #tpu.memory_space<semaphore_mem>>
    tpu.wait_dma2 semaphore(%556 : memref<!tpu.dma_semaphore, #tpu.memory_space<semaphore_mem>>) src(%552 : memref<1x128xf32, #tpu.memory_space<any>>) dst(%554 : memref<1x128xf32, #tpu.memory_space<vmem>>)
    %c2_i32_476 = arith.constant 2 : i32
    %c2_i32_477 = arith.constant 2 : i32
    %c0_i32_478 = arith.constant 0 : i32
    %557 = tpu.memref_slice %arg6[%297, %c0_i32_478] : memref<128x128xf32, #tpu.memory_space<any>> -> memref<1x128xf32, #tpu.memory_space<any>>
    %c14_i32_479 = arith.constant 14 : i32
    %c0_i32_480 = arith.constant 0 : i32
    %558 = tpu.memref_slice %arg8[%c2_i32_476, %c14_i32_479, %c0_i32_480] : memref<3x16x128xf32, #tpu.memory_space<vmem>> -> memref<1x1x128xf32, #tpu.memory_space<vmem>>
    %559 = tpu.memref_squeeze %558 : memref<1x1x128xf32, #tpu.memory_space<vmem>> -> memref<1x128xf32, #tpu.memory_space<vmem>>
    %560 = tpu.memref_slice %arg9[%c2_i32_477] : memref<3x!tpu.dma_semaphore, #tpu.memory_space<semaphore_mem>> -> memref<1x!tpu.dma_semaphore, #tpu.memory_space<semaphore_mem>>
    %561 = tpu.memref_squeeze %560 : memref<1x!tpu.dma_semaphore, #tpu.memory_space<semaphore_mem>> -> memref<!tpu.dma_semaphore, #tpu.memory_space<semaphore_mem>>
    tpu.wait_dma2 semaphore(%561 : memref<!tpu.dma_semaphore, #tpu.memory_space<semaphore_mem>>) src(%557 : memref<1x128xf32, #tpu.memory_space<any>>) dst(%559 : memref<1x128xf32, #tpu.memory_space<vmem>>)
    %c0_i32_481 = arith.constant 0 : i32
    %c0_i32_482 = arith.constant 0 : i32
    %c0_i32_483 = arith.constant 0 : i32
    %562 = tpu.memref_slice %arg4[%318, %c0_i32_483] : memref<128x128xf32, #tpu.memory_space<any>> -> memref<1x128xf32, #tpu.memory_space<any>>
    %c15_i32_484 = arith.constant 15 : i32
    %c0_i32_485 = arith.constant 0 : i32
    %563 = tpu.memref_slice %arg8[%c0_i32_481, %c15_i32_484, %c0_i32_485] : memref<3x16x128xf32, #tpu.memory_space<vmem>> -> memref<1x1x128xf32, #tpu.memory_space<vmem>>
    %564 = tpu.memref_squeeze %563 : memref<1x1x128xf32, #tpu.memory_space<vmem>> -> memref<1x128xf32, #tpu.memory_space<vmem>>
    %565 = tpu.memref_slice %arg9[%c0_i32_482] : memref<3x!tpu.dma_semaphore, #tpu.memory_space<semaphore_mem>> -> memref<1x!tpu.dma_semaphore, #tpu.memory_space<semaphore_mem>>
    %566 = tpu.memref_squeeze %565 : memref<1x!tpu.dma_semaphore, #tpu.memory_space<semaphore_mem>> -> memref<!tpu.dma_semaphore, #tpu.memory_space<semaphore_mem>>
    tpu.wait_dma2 semaphore(%566 : memref<!tpu.dma_semaphore, #tpu.memory_space<semaphore_mem>>) src(%562 : memref<1x128xf32, #tpu.memory_space<any>>) dst(%564 : memref<1x128xf32, #tpu.memory_space<vmem>>)
    %c1_i32_486 = arith.constant 1 : i32
    %c1_i32_487 = arith.constant 1 : i32
    %c0_i32_488 = arith.constant 0 : i32
    %567 = tpu.memref_slice %arg5[%321, %c0_i32_488] : memref<128x128xf32, #tpu.memory_space<any>> -> memref<1x128xf32, #tpu.memory_space<any>>
    %c15_i32_489 = arith.constant 15 : i32
    %c0_i32_490 = arith.constant 0 : i32
    %568 = tpu.memref_slice %arg8[%c1_i32_486, %c15_i32_489, %c0_i32_490] : memref<3x16x128xf32, #tpu.memory_space<vmem>> -> memref<1x1x128xf32, #tpu.memory_space<vmem>>
    %569 = tpu.memref_squeeze %568 : memref<1x1x128xf32, #tpu.memory_space<vmem>> -> memref<1x128xf32, #tpu.memory_space<vmem>>
    %570 = tpu.memref_slice %arg9[%c1_i32_487] : memref<3x!tpu.dma_semaphore, #tpu.memory_space<semaphore_mem>> -> memref<1x!tpu.dma_semaphore, #tpu.memory_space<semaphore_mem>>
    %571 = tpu.memref_squeeze %570 : memref<1x!tpu.dma_semaphore, #tpu.memory_space<semaphore_mem>> -> memref<!tpu.dma_semaphore, #tpu.memory_space<semaphore_mem>>
    tpu.wait_dma2 semaphore(%571 : memref<!tpu.dma_semaphore, #tpu.memory_space<semaphore_mem>>) src(%567 : memref<1x128xf32, #tpu.memory_space<any>>) dst(%569 : memref<1x128xf32, #tpu.memory_space<vmem>>)
    %c2_i32_491 = arith.constant 2 : i32
    %c2_i32_492 = arith.constant 2 : i32
    %c0_i32_493 = arith.constant 0 : i32
    %572 = tpu.memref_slice %arg6[%318, %c0_i32_493] : memref<128x128xf32, #tpu.memory_space<any>> -> memref<1x128xf32, #tpu.memory_space<any>>
    %c15_i32_494 = arith.constant 15 : i32
    %c0_i32_495 = arith.constant 0 : i32
    %573 = tpu.memref_slice %arg8[%c2_i32_491, %c15_i32_494, %c0_i32_495] : memref<3x16x128xf32, #tpu.memory_space<vmem>> -> memref<1x1x128xf32, #tpu.memory_space<vmem>>
    %574 = tpu.memref_squeeze %573 : memref<1x1x128xf32, #tpu.memory_space<vmem>> -> memref<1x128xf32, #tpu.memory_space<vmem>>
    %575 = tpu.memref_slice %arg9[%c2_i32_492] : memref<3x!tpu.dma_semaphore, #tpu.memory_space<semaphore_mem>> -> memref<1x!tpu.dma_semaphore, #tpu.memory_space<semaphore_mem>>
    %576 = tpu.memref_squeeze %575 : memref<1x!tpu.dma_semaphore, #tpu.memory_space<semaphore_mem>> -> memref<!tpu.dma_semaphore, #tpu.memory_space<semaphore_mem>>
    tpu.wait_dma2 semaphore(%576 : memref<!tpu.dma_semaphore, #tpu.memory_space<semaphore_mem>>) src(%572 : memref<1x128xf32, #tpu.memory_space<any>>) dst(%574 : memref<1x128xf32, #tpu.memory_space<vmem>>)
    %c0 = arith.constant 0 : index
    %c0_496 = arith.constant 0 : index
    %c0_497 = arith.constant 0 : index
    %577 = vector.load %arg8[%c0, %c0_496, %c0_497] : memref<3x16x128xf32, #tpu.memory_space<vmem>>, vector<1x16x128xf32>
    %578 = vector.shape_cast %577 : vector<1x16x128xf32> to vector<16x128xf32>
    %c1 = arith.constant 1 : index
    %c0_498 = arith.constant 0 : index
    %c0_499 = arith.constant 0 : index
    %579 = vector.load %arg8[%c1, %c0_498, %c0_499] : memref<3x16x128xf32, #tpu.memory_space<vmem>>, vector<1x16x128xf32>
    %580 = vector.shape_cast %579 : vector<1x16x128xf32> to vector<16x128xf32>
    %c2 = arith.constant 2 : index
    %c0_500 = arith.constant 0 : index
    %c0_501 = arith.constant 0 : index
    %581 = vector.load %arg8[%c2, %c0_500, %c0_501] : memref<3x16x128xf32, #tpu.memory_space<vmem>>, vector<1x16x128xf32>
    %582 = vector.shape_cast %581 : vector<1x16x128xf32> to vector<16x128xf32>
    %c0_502 = arith.constant 0 : index
    %c0_503 = arith.constant 0 : index
    %583 = vector.load %arg3[%c0_502, %c0_503] : memref<16x1xf32, #tpu.memory_space<vmem>>, vector<16x1xf32>
    %cst = arith.constant 5.000000e-01 : f32
    %584 = vector.broadcast %cst : f32 to vector<16x128xf32>
    %585 = arith.mulf %584, %578 : vector<16x128xf32>
    %cst_504 = arith.constant 5.000000e-01 : f32
    %586 = vector.broadcast %cst_504 : f32 to vector<16x128xf32>
    %587 = arith.mulf %586, %580 : vector<16x128xf32>
    %588 = arith.addf %585, %587 : vector<16x128xf32>
    %589 = vector.broadcast %583 : vector<16x1xf32> to vector<16x128xf32>
    %590 = arith.mulf %582, %589 : vector<16x128xf32>
    %591 = arith.addf %588, %590 : vector<16x128xf32>
    %c0_505 = arith.constant 0 : index
    %c0_506 = arith.constant 0 : index
    %592 = vector.load %arg7[%c0_505, %c0_506] : memref<16x128xf32, #tpu.memory_space<vmem>>, vector<16x128xf32>
    tpu.vector_store %arg7[%c0_505, %c0_506], %591 {strides = array<i32>} : memref<16x128xf32, #tpu.memory_space<vmem>>, vector<16x128xf32>,
    return
  }
  func.func @transform_0(%arg0: i32, %arg1: memref<16xi32, #tpu.memory_space<smem>>, %arg2: memref<16xi32, #tpu.memory_space<smem>>) -> (i32, i32) {
    %c0_i32 = arith.constant 0 : i32
    %c0_i32_0 = arith.constant 0 : i32
    return %arg0, %c0_i32 : i32, i32
  }
  func.func @transform_4(%arg0: i32, %arg1: memref<16xi32, #tpu.memory_space<smem>>, %arg2: memref<16xi32, #tpu.memory_space<smem>>) -> (i32, i32) {
    %c0_i32 = arith.constant 0 : i32
    %c0_i32_0 = arith.constant 0 : i32
    return %arg0, %c0_i32 : i32, i32
  }
}

</mosaic_0001>

<bundles_post_ra>
// kernel: tpu_custom_call.1
= control target key start
LH: loop header
LB: loop body
LE: loop exit
PB: predicated region body
PF: predicated region fallthrough
CT: control target
= control target key end

     0   :  { %s2397_s27 = smov [#allocation5]   ;;  %s2398_s28 = smov [#allocation6]   ;;  %s2971_s0 = inlined_call_operand.vmem [shape: s32[16], index: 0, kind: input, shape index: {}]   ;;  %s2972_s2 = inlined_call_operand.vmem [shape: f32[16,1], index: 2, kind: input, shape index: {}]   ;;  %s2973_s3 = inlined_call_operand.hbm [shape: f32[128,128], index: 3, kind: input, shape index: {}]   ;;  %s2974_s4 = inlined_call_operand.hbm [shape: f32[128,128], index: 4, kind: input, shape index: {}]   ;;  %s2975_s5 = inlined_call_operand.hbm [shape: f32[128,128], index: 5, kind: input, shape index: {}]   ;;  %s2976_s6 = inlined_call_operand.hbm [shape: f32[16,128], index: 6, kind: output, shape index: {}]   ;;  %s2977_s1 = inlined_call_operand.vmem [shape: s32[16], index: 1, kind: input, shape index: {}]  }
   0x1   :  { %s12_s23 = sshll.u32 %s2971_s0, 4  ;;  %s17_s26 = sshll.u32 %s2977_s1, 4  ;;  %s13_s23 = int_to_ptr.vmem [resolvable:$true] %s12_s23  ;;  %s18_s26 = int_to_ptr.vmem [resolvable:$true] %s17_s26 }
   0x2   :  { %15 = dma.vmem_to_smem %s13_s23, 16, %s2397_s27, [#allocation4] }
   0x3   :  { %20 = dma.vmem_to_smem %s18_s26, 16, %s2398_s28, [#allocation4] }
   0x4   :  { %2297 = dma.done.wait [#allocation4], 32 }
   0x5   :  { %2298 = vsyncadd [#allocation4], 4294967264 }
   0x6   :  { %23 = sfence }
   0x7   :  { %24 = vsyncpa [#allocation8], 0  ;;  %s2492_s29 = sld [smem:[#allocation5]]  ;;  %s2399_s30 = smov [#allocation2]  }
   0x8   :  { %s40_s0 = sshll.u32 %s2399_s30, 4  ;;  %s29_s7 = sld [smem:[#allocation6]]  ;;  %s41_s0 = int_to_ptr.vmem [resolvable:$true] %s40_s0 }
   0x9   :  { %s2400_s8 = smov [#allocation2 + $0x10]   ;;  %s2401_s9 = smov [#allocation2 + $0x20]  }
   0xa   :  { %s2494_s1 = sshll.u32 %s2400_s8, 4  ;;  %s2497_s10 = sshll.u32 %s2401_s9, 4  ;;  %s57_s1 = int_to_ptr.vmem [resolvable:$true] %s2494_s1  ;;  %s73_s10 = int_to_ptr.vmem [resolvable:$true] %s2497_s10 }
   0xb   :  { %s2500_s11 = sld [smem:[#allocation5 + $0x1]]  ;;  %s2516_s27 = scalar_lea.hbm %s2973_s3, 128 }
   0xd   :  { %s30_s14 = scalar_lea.hbm %s2973_s3, %s2492_s29  ;;  %s60_s17 = scalar_lea.hbm %s2975_s5, %s2492_s29 }
   0xe   :  { %s38_s18 = sshll.u32 %s30_s14, 4  ;;  %s44_s21 = scalar_lea.hbm %s2974_s4, %s29_s7  ;;  %s39_s18 = int_to_ptr.hbm [resolvable:$true] %s38_s18 }
   0xf   :  { %s54_s22 = sshll.u32 %s44_s21, 4  ;;  %s1121_s23 = sshra.s32 %s39_s18, 4  ;;  %s1122_s23 = int_to_ptr.hbm [resolvable:$true] %s1121_s23  ;;  %s55_s22 = int_to_ptr.hbm [resolvable:$true] %s54_s22 }
  0x10   :  { %s1123_s24 = scalar_lea.hbm %s1122_s23, 1  ;;  %p1126_p1 = scmp.lt.s32.totalorder %s1122_s23, %s2973_s3 }
  0x11   :  { %p1124_p0 = scmp.ne.s32.totalorder %s1122_s23, %s1123_s24  ;;  %p1127_p2 = scmp.lt.s32.totalorder %s2516_s27, %s1123_s24 }
  0x13   :  { %p1128_p3 = por %p1127_p2, %p1126_p1 }
  0x15   :  { %p1129_p4 = pnand %p1128_p3, %p1124_p0 }
  0x17   :  { %1132 = shalt.err (!%p1129_p4)  }
  0x18   :  { %43 = dma.hbm_to_vmem [thread:$0]  %s39_s18, 16, %s41_s0, [#allocation3] }
  0x19   :  { %s70_s29 = sshll.u32 %s60_s17, 4  ;;  %s1145_s7 = sshra.s32 %s55_s22, 4  ;;  %s1146_s7 = int_to_ptr.hbm [resolvable:$true] %s1145_s7  ;;  %s71_s29 = int_to_ptr.hbm [resolvable:$true] %s70_s29 }
  0x1a   :  { %s1147_s8 = scalar_lea.hbm %s1146_s7, 1  ;;  %s2525_s13 = scalar_lea.hbm %s2974_s4, 128 }
  0x1b   :  { %p1148_p5 = scmp.ne.s32.totalorder %s1146_s7, %s1147_s8  ;;  %p1150_p6 = scmp.lt.s32.totalorder %s1146_s7, %s2974_s4 }
  0x1c   :  { %p1151_p7 = scmp.lt.s32.totalorder %s2525_s13, %s1147_s8 }
  0x1e   :  { %p1152_p8 = por %p1151_p7, %p1150_p6 }
  0x20   :  { %p1153_p9 = pnand %p1152_p8, %p1148_p5 }
  0x22   :  { %1156 = shalt.err (!%p1153_p9)  }
  0x23   :  { %59 = dma.hbm_to_vmem [thread:$0]  %s55_s22, 16, %s57_s1, [#allocation3 + $0x1] }
  0x24   :  { %s79_s17 = scalar_lea.hbm %s2973_s3, %s2500_s11  ;;  %s1169_s18 = sshra.s32 %s71_s29, 4  ;;  %s1170_s18 = int_to_ptr.hbm [resolvable:$true] %s1169_s18 }
  0x25   :  { %s1171_s19 = scalar_lea.hbm %s1170_s18, 1  ;;  %s2540_s23 = scalar_lea.hbm %s2975_s5, 128 }
  0x26   :  { %p1172_p10 = scmp.ne.s32.totalorder %s1170_s18, %s1171_s19  ;;  %p1174_p11 = scmp.lt.s32.totalorder %s1170_s18, %s2975_s5 }
  0x27   :  { %p1175_p12 = scmp.lt.s32.totalorder %s2540_s23, %s1171_s19 }
  0x29   :  { %p1176_p13 = por %p1175_p12, %p1174_p11 }
  0x2b   :  { %p1177_p0 = pnand %p1176_p13, %p1172_p10 }
  0x2d   :  { %1180 = shalt.err (!%p1177_p0)  }
  0x2e   :  { %75 = dma.hbm_to_vmem [thread:$0]  %s71_s29, 16, %s73_s10, [#allocation3 + $0x2] }
  0x2f   :  { %s88_s1 = sshll.u32 %s79_s17, 4  ;;  %s2402_s22 = smov [#allocation2 + $0x1]   ;;  %s89_s1 = int_to_ptr.hbm [resolvable:$true] %s88_s1 }
  0x30   :  { %s90_s26 = sshll.u32 %s2402_s22, 4  ;;  %s1010_s28 = sld [smem:[#allocation6 + $0x1]]  ;;  %s91_s26 = int_to_ptr.vmem [resolvable:$true] %s90_s26 }
  0x31   :  { %s1193_s30 = sshra.s32 %s89_s1, 4  ;;  %s1194_s30 = int_to_ptr.hbm [resolvable:$true] %s1193_s30 }
  0x32   :  { %s1195_s7 = scalar_lea.hbm %s1194_s30, 1  ;;  %p1198_p2 = scmp.lt.s32.totalorder %s1194_s30, %s2973_s3 }
  0x33   :  { %p1196_p1 = scmp.ne.s32.totalorder %s1194_s30, %s1195_s7  ;;  %p1199_p3 = scmp.lt.s32.totalorder %s2516_s27, %s1195_s7 }
  0x35   :  { %p1200_p4 = por %p1199_p3, %p1198_p2 }
  0x37   :  { %p1201_p5 = pnand %p1200_p4, %p1196_p1 }
  0x39   :  { %1204 = shalt.err (!%p1201_p5)  }
  0x3a   :  { %93 = dma.hbm_to_vmem [thread:$0]  %s89_s1, 16, %s91_s26, [#allocation3] }
  0x3b   :  { %s109_s12 = scalar_lea.hbm %s2975_s5, %s2500_s11  ;;  %s2403_s14 = smov [#allocation2 + $0x11]  }
  0x3c   :  { %s105_s15 = sshll.u32 %s2403_s14, 4  ;;  %s2556_s0 = sshll.u32 %s109_s12, 4  ;;  %s106_s15 = int_to_ptr.vmem [resolvable:$true] %s105_s15  ;;  %s119_s0 = int_to_ptr.hbm [resolvable:$true] %s2556_s0 }
  0x3d   :  { %s2559_s16 = sld [smem:[#allocation5 + $0x2]]  ;;  %s94_s19 = scalar_lea.hbm %s2974_s4, %s1010_s28 }
  0x3e   :  { %s2404_s20 = smov [#allocation2 + $0x21]   ;;  %s103_s24 = sshll.u32 %s94_s19, 4  ;;  %s104_s24 = int_to_ptr.hbm [resolvable:$true] %s103_s24 }
  0x3f   :  { %s120_s21 = sshll.u32 %s2404_s20, 4  ;;  %s1217_s11 = sshra.s32 %s104_s24, 4  ;;  %s121_s21 = int_to_ptr.vmem [resolvable:$true] %s120_s21  ;;  %s1218_s11 = int_to_ptr.hbm [resolvable:$true] %s1217_s11 }
  0x40   :  { %s1219_s25 = scalar_lea.hbm %s1218_s11, 1  ;;  %p1222_p7 = scmp.lt.s32.totalorder %s1218_s11, %s2974_s4 }
  0x41   :  { %p1220_p6 = scmp.ne.s32.totalorder %s1218_s11, %s1219_s25  ;;  %p1223_p8 = scmp.lt.s32.totalorder %s2525_s13, %s1219_s25 }
  0x43   :  { %p1224_p9 = por %p1223_p8, %p1222_p7 }
  0x45   :  { %p1225_p10 = pnand %p1224_p9, %p1220_p6 }
  0x47   :  { %1228 = shalt.err (!%p1225_p10)  }
  0x48   :  { %108 = dma.hbm_to_vmem [thread:$0]  %s104_s24, 16, %s106_s15, [#allocation3 + $0x1] }
  0x49   :  { %s1241_s26 = sshra.s32 %s119_s0, 4  ;;  %s1242_s26 = int_to_ptr.hbm [resolvable:$true] %s1241_s26 }
  0x4a   :  { %s1243_s28 = scalar_lea.hbm %s1242_s26, 1  ;;  %p1246_p12 = scmp.lt.s32.totalorder %s1242_s26, %s2975_s5 }
  0x4b   :  { %p1244_p11 = scmp.ne.s32.totalorder %s1242_s26, %s1243_s28  ;;  %p1247_p13 = scmp.lt.s32.totalorder %s2540_s23, %s1243_s28 }
  0x4d   :  { %p1248_p0 = por %p1247_p13, %p1246_p12 }
  0x4f   :  { %p1249_p1 = pnand %p1248_p0, %p1244_p11 }
  0x51   :  { %1252 = shalt.err (!%p1249_p1)  }
  0x52   :  { %123 = dma.hbm_to_vmem [thread:$0]  %s119_s0, 16, %s121_s21, [#allocation3 + $0x2] }
  0x53   :  { %s127_s10 = scalar_lea.hbm %s2973_s3, %s2559_s16  ;;  %s2405_s29 = smov [#allocation2 + $0x2]  }
  0x54   :  { %s138_s12 = sshll.u32 %s2405_s29, 4  ;;  %s136_s14 = sshll.u32 %s127_s10, 4  ;;  %s139_s12 = int_to_ptr.vmem [resolvable:$true] %s138_s12  ;;  %s137_s14 = int_to_ptr.hbm [resolvable:$true] %s136_s14 }
  0x55   :  { %s1012_s15 = sld [smem:[#allocation6 + $0x2]]  ;;  %s1265_s17 = sshra.s32 %s137_s14, 4  ;;  %s1266_s17 = int_to_ptr.hbm [resolvable:$true] %s1265_s17 }
  0x56   :  { %s1267_s18 = scalar_lea.hbm %s1266_s17, 1  ;;  %p1270_p3 = scmp.lt.s32.totalorder %s1266_s17, %s2973_s3 }
  0x57   :  { %p1268_p2 = scmp.ne.s32.totalorder %s1266_s17, %s1267_s18  ;;  %p1271_p4 = scmp.lt.s32.totalorder %s2516_s27, %s1267_s18 }
  0x59   :  { %p1272_p5 = por %p1271_p4, %p1270_p3 }
  0x5b   :  { %p1273_p6 = pnand %p1272_p5, %p1268_p2 }
  0x5d   :  { %1276 = shalt.err (!%p1273_p6)  }
  0x5e   :  { %141 = dma.hbm_to_vmem [thread:$0]  %s137_s14, 16, %s139_s12, [#allocation3] }
  0x5f   :  { %s157_s24 = scalar_lea.hbm %s2975_s5, %s2559_s16  ;;  %s2406_s11 = smov [#allocation2 + $0x12]  }
  0x60   :  { %s153_s25 = sshll.u32 %s2406_s11, 4  ;;  %s2584_s1 = sshll.u32 %s157_s24, 4  ;;  %s154_s25 = int_to_ptr.vmem [resolvable:$true] %s153_s25  ;;  %s167_s1 = int_to_ptr.hbm [resolvable:$true] %s2584_s1 }
  0x61   :  { %s2587_s22 = sld [smem:[#allocation5 + $0x3]]  ;;  %s142_s30 = scalar_lea.hbm %s2974_s4, %s1012_s15 }
  0x62   :  { %s2407_s7 = smov [#allocation2 + $0x22]   ;;  %s151_s9 = sshll.u32 %s142_s30, 4  ;;  %s152_s9 = int_to_ptr.hbm [resolvable:$true] %s151_s9 }
  0x63   :  { %s168_s8 = sshll.u32 %s2407_s7, 4  ;;  %s1289_s16 = sshra.s32 %s152_s9, 4  ;;  %s169_s8 = int_to_ptr.vmem [resolvable:$true] %s168_s8  ;;  %s1290_s16 = int_to_ptr.hbm [resolvable:$true] %s1289_s16 }
  0x64   :  { %s1291_s10 = scalar_lea.hbm %s1290_s16, 1  ;;  %p1294_p8 = scmp.lt.s32.totalorder %s1290_s16, %s2974_s4 }
  0x65   :  { %p1292_p7 = scmp.ne.s32.totalorder %s1290_s16, %s1291_s10  ;;  %p1295_p9 = scmp.lt.s32.totalorder %s2525_s13, %s1291_s10 }
  0x67   :  { %p1296_p10 = por %p1295_p9, %p1294_p8 }
  0x69   :  { %p1297_p11 = pnand %p1296_p10, %p1292_p7 }
  0x6b   :  { %1300 = shalt.err (!%p1297_p11)  }
  0x6c   :  { %156 = dma.hbm_to_vmem [thread:$0]  %s152_s9, 16, %s154_s25, [#allocation3 + $0x1] }
  0x6d   :  { %s1313_s14 = sshra.s32 %s167_s1, 4  ;;  %s1314_s14 = int_to_ptr.hbm [resolvable:$true] %s1313_s14 }
  0x6e   :  { %s1315_s15 = scalar_lea.hbm %s1314_s14, 1  ;;  %p1318_p13 = scmp.lt.s32.totalorder %s1314_s14, %s2975_s5 }
  0x6f   :  { %p1316_p12 = scmp.ne.s32.totalorder %s1314_s14, %s1315_s15  ;;  %p1319_p0 = scmp.lt.s32.totalorder %s2540_s23, %s1315_s15 }
  0x71   :  { %p1320_p1 = por %p1319_p0, %p1318_p13 }
  0x73   :  { %p1321_p2 = pnand %p1320_p1, %p1316_p12 }
  0x75   :  { %1324 = shalt.err (!%p1321_p2)  }
  0x76   :  { %171 = dma.hbm_to_vmem [thread:$0]  %s167_s1, 16, %s169_s8, [#allocation3 + $0x2] }
  0x77   :  { %s175_s0 = scalar_lea.hbm %s2973_s3, %s2587_s22  ;;  %s2408_s21 = smov [#allocation2 + $0x3]  }
  0x78   :  { %s186_s24 = sshll.u32 %s2408_s21, 4  ;;  %s184_s11 = sshll.u32 %s175_s0, 4  ;;  %s187_s24 = int_to_ptr.vmem [resolvable:$true] %s186_s24  ;;  %s185_s11 = int_to_ptr.hbm [resolvable:$true] %s184_s11 }
  0x79   :  { %s1014_s25 = sld [smem:[#allocation6 + $0x3]]  ;;  %s1337_s26 = sshra.s32 %s185_s11, 4  ;;  %s1338_s26 = int_to_ptr.hbm [resolvable:$true] %s1337_s26 }
  0x7a   :  { %s1339_s28 = scalar_lea.hbm %s1338_s26, 1  ;;  %p1342_p4 = scmp.lt.s32.totalorder %s1338_s26, %s2973_s3 }
  0x7b   :  { %p1340_p3 = scmp.ne.s32.totalorder %s1338_s26, %s1339_s28  ;;  %p1343_p5 = scmp.lt.s32.totalorder %s2516_s27, %s1339_s28 }
  0x7d   :  { %p1344_p6 = por %p1343_p5, %p1342_p4 }
  0x7f   :  { %p1345_p7 = pnand %p1344_p6, %p1340_p3 }
  0x81   :  { %1348 = shalt.err (!%p1345_p7)  }
  0x82   :  { %189 = dma.hbm_to_vmem [thread:$0]  %s185_s11, 16, %s187_s24, [#allocation3] }
  0x83   :  { %s205_s9 = scalar_lea.hbm %s2975_s5, %s2587_s22  ;;  %s2409_s16 = smov [#allocation2 + $0x13]  }
  0x84   :  { %s201_s10 = sshll.u32 %s2409_s16, 4  ;;  %s2612_s29 = sshll.u32 %s205_s9, 4  ;;  %s202_s10 = int_to_ptr.vmem [resolvable:$true] %s201_s10  ;;  %s215_s29 = int_to_ptr.hbm [resolvable:$true] %s2612_s29 }
  0x85   :  { %s2615_s12 = sld [smem:[#allocation5 + $0x4]]  ;;  %s190_s17 = scalar_lea.hbm %s2974_s4, %s1014_s25 }
  0x86   :  { %s2410_s18 = smov [#allocation2 + $0x23]   ;;  %s199_s20 = sshll.u32 %s190_s17, 4  ;;  %s200_s20 = int_to_ptr.hbm [resolvable:$true] %s199_s20 }
  0x87   :  { %s216_s19 = sshll.u32 %s2410_s18, 4  ;;  %s1361_s22 = sshra.s32 %s200_s20, 4  ;;  %s217_s19 = int_to_ptr.vmem [resolvable:$true] %s216_s19  ;;  %s1362_s22 = int_to_ptr.hbm [resolvable:$true] %s1361_s22 }
  0x88   :  { %s1363_s0 = scalar_lea.hbm %s1362_s22, 1  ;;  %p1366_p9 = scmp.lt.s32.totalorder %s1362_s22, %s2974_s4 }
  0x89   :  { %p1364_p8 = scmp.ne.s32.totalorder %s1362_s22, %s1363_s0  ;;  %p1367_p10 = scmp.lt.s32.totalorder %s2525_s13, %s1363_s0 }
  0x8b   :  { %p1368_p11 = por %p1367_p10, %p1366_p9 }
  0x8d   :  { %p1369_p12 = pnand %p1368_p11, %p1364_p8 }
  0x8f   :  { %1372 = shalt.err (!%p1369_p12)  }
  0x90   :  { %204 = dma.hbm_to_vmem [thread:$0]  %s200_s20, 16, %s202_s10, [#allocation3 + $0x1] }
  0x91   :  { %s1385_s11 = sshra.s32 %s215_s29, 4  ;;  %s1386_s11 = int_to_ptr.hbm [resolvable:$true] %s1385_s11 }
  0x92   :  { %s1387_s25 = scalar_lea.hbm %s1386_s11, 1  ;;  %p1390_p0 = scmp.lt.s32.totalorder %s1386_s11, %s2975_s5 }
  0x93   :  { %p1388_p13 = scmp.ne.s32.totalorder %s1386_s11, %s1387_s25  ;;  %p1391_p1 = scmp.lt.s32.totalorder %s2540_s23, %s1387_s25 }
  0x95   :  { %p1392_p2 = por %p1391_p1, %p1390_p0 }
  0x97   :  { %p1393_p3 = pnand %p1392_p2, %p1388_p13 }
  0x99   :  { %1396 = shalt.err (!%p1393_p3)  }
  0x9a   :  { %219 = dma.hbm_to_vmem [thread:$0]  %s215_s29, 16, %s217_s19, [#allocation3 + $0x2] }
  0x9b   :  { %s223_s1 = scalar_lea.hbm %s2973_s3, %s2615_s12  ;;  %s2411_s8 = smov [#allocation2 + $0x4]  }
  0x9c   :  { %s234_s9 = sshll.u32 %s2411_s8, 4  ;;  %s232_s16 = sshll.u32 %s223_s1, 4  ;;  %s235_s9 = int_to_ptr.vmem [resolvable:$true] %s234_s9  ;;  %s233_s16 = int_to_ptr.hbm [resolvable:$true] %s232_s16 }
  0x9d   :  { %s1016_s10 = sld [smem:[#allocation6 + $0x4]]  ;;  %s1409_s14 = sshra.s32 %s233_s16, 4  ;;  %s1410_s14 = int_to_ptr.hbm [resolvable:$true] %s1409_s14 }
  0x9e   :  { %s1411_s15 = scalar_lea.hbm %s1410_s14, 1  ;;  %p1414_p5 = scmp.lt.s32.totalorder %s1410_s14, %s2973_s3 }
  0x9f   :  { %p1412_p4 = scmp.ne.s32.totalorder %s1410_s14, %s1411_s15  ;;  %p1415_p6 = scmp.lt.s32.totalorder %s2516_s27, %s1411_s15 }
  0xa1   :  { %p1416_p7 = por %p1415_p6, %p1414_p5 }
  0xa3   :  { %p1417_p8 = pnand %p1416_p7, %p1412_p4 }
  0xa5   :  { %1420 = shalt.err (!%p1417_p8)  }
  0xa6   :  { %237 = dma.hbm_to_vmem [thread:$0]  %s233_s16, 16, %s235_s9, [#allocation3] }
  0xa7   :  { %s253_s20 = scalar_lea.hbm %s2975_s5, %s2615_s12  ;;  %s2412_s22 = smov [#allocation2 + $0x14]  }
  0xa8   :  { %s249_s0 = sshll.u32 %s2412_s22, 4  ;;  %s2640_s21 = sshll.u32 %s253_s20, 4  ;;  %s250_s0 = int_to_ptr.vmem [resolvable:$true] %s249_s0  ;;  %s263_s21 = int_to_ptr.hbm [resolvable:$true] %s2640_s21 }
  0xa9   :  { %s2643_s24 = sld [smem:[#allocation5 + $0x5]]  ;;  %s238_s26 = scalar_lea.hbm %s2974_s4, %s1016_s10 }
  0xaa   :  { %s2413_s28 = smov [#allocation2 + $0x24]   ;;  %s247_s7 = sshll.u32 %s238_s26, 4  ;;  %s248_s7 = int_to_ptr.hbm [resolvable:$true] %s247_s7 }
  0xab   :  { %s264_s30 = sshll.u32 %s2413_s28, 4  ;;  %s1433_s12 = sshra.s32 %s248_s7, 4  ;;  %s265_s30 = int_to_ptr.vmem [resolvable:$true] %s264_s30  ;;  %s1434_s12 = int_to_ptr.hbm [resolvable:$true] %s1433_s12 }
  0xac   :  { %s1435_s1 = scalar_lea.hbm %s1434_s12, 1  ;;  %p1438_p10 = scmp.lt.s32.totalorder %s1434_s12, %s2974_s4 }
  0xad   :  { %p1436_p9 = scmp.ne.s32.totalorder %s1434_s12, %s1435_s1  ;;  %p1439_p11 = scmp.lt.s32.totalorder %s2525_s13, %s1435_s1 }
  0xaf   :  { %p1440_p12 = por %p1439_p11, %p1438_p10 }
  0xb1   :  { %p1441_p13 = pnand %p1440_p12, %p1436_p9 }
  0xb3   :  { %1444 = shalt.err (!%p1441_p13)  }
  0xb4   :  { %252 = dma.hbm_to_vmem [thread:$0]  %s248_s7, 16, %s250_s0, [#allocation3 + $0x1] }
  0xb5   :  { %s1457_s16 = sshra.s32 %s263_s21, 4  ;;  %s1458_s16 = int_to_ptr.hbm [resolvable:$true] %s1457_s16 }
  0xb6   :  { %s1459_s10 = scalar_lea.hbm %s1458_s16, 1  ;;  %p1462_p1 = scmp.lt.s32.totalorder %s1458_s16, %s2975_s5 }
  0xb7   :  { %p1460_p0 = scmp.ne.s32.totalorder %s1458_s16, %s1459_s10  ;;  %p1463_p2 = scmp.lt.s32.totalorder %s2540_s23, %s1459_s10 }
  0xb9   :  { %p1464_p3 = por %p1463_p2, %p1462_p1 }
  0xbb   :  { %p1465_p4 = pnand %p1464_p3, %p1460_p0 }
  0xbd   :  { %1468 = shalt.err (!%p1465_p4)  }
  0xbe   :  { %267 = dma.hbm_to_vmem [thread:$0]  %s263_s21, 16, %s265_s30, [#allocation3 + $0x2] }
  0xbf   :  { %s271_s29 = scalar_lea.hbm %s2973_s3, %s2643_s24  ;;  %s2414_s19 = smov [#allocation2 + $0x5]  }
  0xc0   :  { %s282_s20 = sshll.u32 %s2414_s19, 4  ;;  %s280_s22 = sshll.u32 %s271_s29, 4  ;;  %s283_s20 = int_to_ptr.vmem [resolvable:$true] %s282_s20  ;;  %s281_s22 = int_to_ptr.hbm [resolvable:$true] %s280_s22 }
  0xc1   :  { %s1018_s0 = sld [smem:[#allocation6 + $0x5]]  ;;  %s1481_s11 = sshra.s32 %s281_s22, 4  ;;  %s1482_s11 = int_to_ptr.hbm [resolvable:$true] %s1481_s11 }
  0xc2   :  { %s1483_s25 = scalar_lea.hbm %s1482_s11, 1  ;;  %p1486_p6 = scmp.lt.s32.totalorder %s1482_s11, %s2973_s3 }
  0xc3   :  { %p1484_p5 = scmp.ne.s32.totalorder %s1482_s11, %s1483_s25  ;;  %p1487_p7 = scmp.lt.s32.totalorder %s2516_s27, %s1483_s25 }
  0xc5   :  { %p1488_p8 = por %p1487_p7, %p1486_p6 }
  0xc7   :  { %p1489_p9 = pnand %p1488_p8, %p1484_p5 }
  0xc9   :  { %1492 = shalt.err (!%p1489_p9)  }
  0xca   :  { %285 = dma.hbm_to_vmem [thread:$0]  %s281_s22, 16, %s283_s20, [#allocation3] }
  0xcb   :  { %s301_s7 = scalar_lea.hbm %s2975_s5, %s2643_s24  ;;  %s2415_s12 = smov [#allocation2 + $0x15]  }
  0xcc   :  { %s297_s1 = sshll.u32 %s2415_s12, 4  ;;  %s2668_s8 = sshll.u32 %s301_s7, 4  ;;  %s298_s1 = int_to_ptr.vmem [resolvable:$true] %s297_s1  ;;  %s311_s8 = int_to_ptr.hbm [resolvable:$true] %s2668_s8 }
  0xcd   :  { %s2671_s9 = sld [smem:[#allocation5 + $0x6]]  ;;  %s286_s14 = scalar_lea.hbm %s2974_s4, %s1018_s0 }
  0xce   :  { %s2416_s15 = smov [#allocation2 + $0x25]   ;;  %s295_s18 = sshll.u32 %s286_s14, 4  ;;  %s296_s18 = int_to_ptr.hbm [resolvable:$true] %s295_s18 }
  0xcf   :  { %s312_s17 = sshll.u32 %s2416_s15, 4  ;;  %s1505_s24 = sshra.s32 %s296_s18, 4  ;;  %s313_s17 = int_to_ptr.vmem [resolvable:$true] %s312_s17  ;;  %s1506_s24 = int_to_ptr.hbm [resolvable:$true] %s1505_s24 }
  0xd0   :  { %s1507_s29 = scalar_lea.hbm %s1506_s24, 1  ;;  %p1510_p11 = scmp.lt.s32.totalorder %s1506_s24, %s2974_s4 }
  0xd1   :  { %p1508_p10 = scmp.ne.s32.totalorder %s1506_s24, %s1507_s29  ;;  %p1511_p12 = scmp.lt.s32.totalorder %s2525_s13, %s1507_s29 }
  0xd3   :  { %p1512_p13 = por %p1511_p12, %p1510_p11 }
  0xd5   :  { %p1513_p0 = pnand %p1512_p13, %p1508_p10 }
  0xd7   :  { %1516 = shalt.err (!%p1513_p0)  }
  0xd8   :  { %300 = dma.hbm_to_vmem [thread:$0]  %s296_s18, 16, %s298_s1, [#allocation3 + $0x1] }
  0xd9   :  { %s1529_s22 = sshra.s32 %s311_s8, 4  ;;  %s1530_s22 = int_to_ptr.hbm [resolvable:$true] %s1529_s22 }
  0xda   :  { %s1531_s0 = scalar_lea.hbm %s1530_s22, 1  ;;  %p1534_p2 = scmp.lt.s32.totalorder %s1530_s22, %s2975_s5 }
  0xdb   :  { %p1532_p1 = scmp.ne.s32.totalorder %s1530_s22, %s1531_s0  ;;  %p1535_p3 = scmp.lt.s32.totalorder %s2540_s23, %s1531_s0 }
  0xdd   :  { %p1536_p4 = por %p1535_p3, %p1534_p2 }
  0xdf   :  { %p1537_p5 = pnand %p1536_p4, %p1532_p1 }
  0xe1   :  { %1540 = shalt.err (!%p1537_p5)  }
  0xe2   :  { %315 = dma.hbm_to_vmem [thread:$0]  %s311_s8, 16, %s313_s17, [#allocation3 + $0x2] }
  0xe3   :  { %s319_s21 = scalar_lea.hbm %s2973_s3, %s2671_s9  ;;  %s2417_s30 = smov [#allocation2 + $0x6]  }
  0xe4   :  { %s330_s7 = sshll.u32 %s2417_s30, 4  ;;  %s328_s12 = sshll.u32 %s319_s21, 4  ;;  %s331_s7 = int_to_ptr.vmem [resolvable:$true] %s330_s7  ;;  %s329_s12 = int_to_ptr.hbm [resolvable:$true] %s328_s12 }
  0xe5   :  { %s1020_s1 = sld [smem:[#allocation6 + $0x6]]  ;;  %s1553_s16 = sshra.s32 %s329_s12, 4  ;;  %s1554_s16 = int_to_ptr.hbm [resolvable:$true] %s1553_s16 }
  0xe6   :  { %s1555_s10 = scalar_lea.hbm %s1554_s16, 1  ;;  %p1558_p7 = scmp.lt.s32.totalorder %s1554_s16, %s2973_s3 }
  0xe7   :  { %p1556_p6 = scmp.ne.s32.totalorder %s1554_s16, %s1555_s10  ;;  %p1559_p8 = scmp.lt.s32.totalorder %s2516_s27, %s1555_s10 }
  0xe9   :  { %p1560_p9 = por %p1559_p8, %p1558_p7 }
  0xeb   :  { %p1561_p10 = pnand %p1560_p9, %p1556_p6 }
  0xed   :  { %1564 = shalt.err (!%p1561_p10)  }
  0xee   :  { %333 = dma.hbm_to_vmem [thread:$0]  %s329_s12, 16, %s331_s7, [#allocation3] }
  0xef   :  { %s349_s18 = scalar_lea.hbm %s2975_s5, %s2671_s9  ;;  %s2418_s24 = smov [#allocation2 + $0x16]  }
  0xf0   :  { %s345_s29 = sshll.u32 %s2418_s24, 4  ;;  %s2696_s19 = sshll.u32 %s349_s18, 4  ;;  %s346_s29 = int_to_ptr.vmem [resolvable:$true] %s345_s29  ;;  %s359_s19 = int_to_ptr.hbm [resolvable:$true] %s2696_s19 }
  0xf1   :  { %s2699_s20 = sld [smem:[#allocation5 + $0x7]]  ;;  %s334_s11 = scalar_lea.hbm %s2974_s4, %s1020_s1 }
  0xf2   :  { %s2419_s25 = smov [#allocation2 + $0x26]   ;;  %s343_s28 = sshll.u32 %s334_s11, 4  ;;  %s344_s28 = int_to_ptr.hbm [resolvable:$true] %s343_s28 }
  0xf3   :  { %s360_s26 = sshll.u32 %s2419_s25, 4  ;;  %s1577_s9 = sshra.s32 %s344_s28, 4  ;;  %s361_s26 = int_to_ptr.vmem [resolvable:$true] %s360_s26  ;;  %s1578_s9 = int_to_ptr.hbm [resolvable:$true] %s1577_s9 }
  0xf4   :  { %s1579_s21 = scalar_lea.hbm %s1578_s9, 1  ;;  %p1582_p12 = scmp.lt.s32.totalorder %s1578_s9, %s2974_s4 }
  0xf5   :  { %p1580_p11 = scmp.ne.s32.totalorder %s1578_s9, %s1579_s21  ;;  %p1583_p13 = scmp.lt.s32.totalorder %s2525_s13, %s1579_s21 }
  0xf7   :  { %p1584_p0 = por %p1583_p13, %p1582_p12 }
  0xf9   :  { %p1585_p1 = pnand %p1584_p0, %p1580_p11 }
  0xfb   :  { %1588 = shalt.err (!%p1585_p1)  }
  0xfc   :  { %348 = dma.hbm_to_vmem [thread:$0]  %s344_s28, 16, %s346_s29, [#allocation3 + $0x1] }
  0xfd   :  { %s1601_s12 = sshra.s32 %s359_s19, 4  ;;  %s1602_s12 = int_to_ptr.hbm [resolvable:$true] %s1601_s12 }
  0xfe   :  { %s1603_s1 = scalar_lea.hbm %s1602_s12, 1  ;;  %p1606_p3 = scmp.lt.s32.totalorder %s1602_s12, %s2975_s5 }
  0xff   :  { %p1604_p2 = scmp.ne.s32.totalorder %s1602_s12, %s1603_s1  ;;  %p1607_p4 = scmp.lt.s32.totalorder %s2540_s23, %s1603_s1 }
 0x101   :  { %p1608_p5 = por %p1607_p4, %p1606_p3 }
 0x103   :  { %p1609_p6 = pnand %p1608_p5, %p1604_p2 }
 0x105   :  { %1612 = shalt.err (!%p1609_p6)  }
 0x106   :  { %363 = dma.hbm_to_vmem [thread:$0]  %s359_s19, 16, %s361_s26, [#allocation3 + $0x2] }
 0x107   :  { %s367_s8 = scalar_lea.hbm %s2973_s3, %s2699_s20  ;;  %s2420_s17 = smov [#allocation2 + $0x7]  }
 0x108   :  { %s378_s18 = sshll.u32 %s2420_s17, 4  ;;  %s376_s24 = sshll.u32 %s367_s8, 4  ;;  %s379_s18 = int_to_ptr.vmem [resolvable:$true] %s378_s18  ;;  %s377_s24 = int_to_ptr.hbm [resolvable:$true] %s376_s24 }
 0x109   :  { %s1022_s29 = sld [smem:[#allocation6 + $0x7]]  ;;  %s1625_s22 = sshra.s32 %s377_s24, 4  ;;  %s1626_s22 = int_to_ptr.hbm [resolvable:$true] %s1625_s22 }
 0x10a   :  { %s1627_s0 = scalar_lea.hbm %s1626_s22, 1  ;;  %p1630_p8 = scmp.lt.s32.totalorder %s1626_s22, %s2973_s3 }
 0x10b   :  { %p1628_p7 = scmp.ne.s32.totalorder %s1626_s22, %s1627_s0  ;;  %p1631_p9 = scmp.lt.s32.totalorder %s2516_s27, %s1627_s0 }
 0x10d   :  { %p1632_p10 = por %p1631_p9, %p1630_p8 }
 0x10f   :  { %p1633_p11 = pnand %p1632_p10, %p1628_p7 }
 0x111   :  { %1636 = shalt.err (!%p1633_p11)  }
 0x112   :  { %381 = dma.hbm_to_vmem [thread:$0]  %s377_s24, 16, %s379_s18, [#allocation3] }
 0x113   :  { %s397_s28 = scalar_lea.hbm %s2975_s5, %s2699_s20  ;;  %s2421_s9 = smov [#allocation2 + $0x17]  }
 0x114   :  { %s393_s21 = sshll.u32 %s2421_s9, 4  ;;  %s2724_s30 = sshll.u32 %s397_s28, 4  ;;  %s394_s21 = int_to_ptr.vmem [resolvable:$true] %s393_s21  ;;  %s407_s30 = int_to_ptr.hbm [resolvable:$true] %s2724_s30 }
 0x115   :  { %s2727_s7 = sld [smem:[#allocation5 + $0x8]]  ;;  %s382_s16 = scalar_lea.hbm %s2974_s4, %s1022_s29 }
 0x116   :  { %s2422_s10 = smov [#allocation2 + $0x27]   ;;  %s391_s15 = sshll.u32 %s382_s16, 4  ;;  %s392_s15 = int_to_ptr.hbm [resolvable:$true] %s391_s15 }
 0x117   :  { %s408_s14 = sshll.u32 %s2422_s10, 4  ;;  %s1649_s20 = sshra.s32 %s392_s15, 4  ;;  %s409_s14 = int_to_ptr.vmem [resolvable:$true] %s408_s14  ;;  %s1650_s20 = int_to_ptr.hbm [resolvable:$true] %s1649_s20 }
 0x118   :  { %s1651_s8 = scalar_lea.hbm %s1650_s20, 1  ;;  %p1654_p13 = scmp.lt.s32.totalorder %s1650_s20, %s2974_s4 }
 0x119   :  { %p1652_p12 = scmp.ne.s32.totalorder %s1650_s20, %s1651_s8  ;;  %p1655_p0 = scmp.lt.s32.totalorder %s2525_s13, %s1651_s8 }
 0x11b   :  { %p1656_p1 = por %p1655_p0, %p1654_p13 }
 0x11d   :  { %p1657_p2 = pnand %p1656_p1, %p1652_p12 }
 0x11f   :  { %1660 = shalt.err (!%p1657_p2)  }
 0x120   :  { %396 = dma.hbm_to_vmem [thread:$0]  %s392_s15, 16, %s394_s21, [#allocation3 + $0x1] }
 0x121   :  { %s1673_s24 = sshra.s32 %s407_s30, 4  ;;  %s1674_s24 = int_to_ptr.hbm [resolvable:$true] %s1673_s24 }
 0x122   :  { %s1675_s29 = scalar_lea.hbm %s1674_s24, 1  ;;  %p1678_p4 = scmp.lt.s32.totalorder %s1674_s24, %s2975_s5 }
 0x123   :  { %p1676_p3 = scmp.ne.s32.totalorder %s1674_s24, %s1675_s29  ;;  %p1679_p5 = scmp.lt.s32.totalorder %s2540_s23, %s1675_s29 }
 0x125   :  { %p1680_p6 = por %p1679_p5, %p1678_p4 }
 0x127   :  { %p1681_p7 = pnand %p1680_p6, %p1676_p3 }
 0x129   :  { %1684 = shalt.err (!%p1681_p7)  }
 0x12a   :  { %411 = dma.hbm_to_vmem [thread:$0]  %s407_s30, 16, %s409_s14, [#allocation3 + $0x2] }
 0x12b   :  { %s415_s19 = scalar_lea.hbm %s2973_s3, %s2727_s7  ;;  %s2423_s26 = smov [#allocation2 + $0x8]  }
 0x12c   :  { %s426_s28 = sshll.u32 %s2423_s26, 4  ;;  %s424_s9 = sshll.u32 %s415_s19, 4  ;;  %s427_s28 = int_to_ptr.vmem [resolvable:$true] %s426_s28  ;;  %s425_s9 = int_to_ptr.hbm [resolvable:$true] %s424_s9 }
 0x12d   :  { %s1024_s21 = sld [smem:[#allocation6 + $0x8]]  ;;  %s1697_s12 = sshra.s32 %s425_s9, 4  ;;  %s1698_s12 = int_to_ptr.hbm [resolvable:$true] %s1697_s12 }
 0x12e   :  { %s1699_s1 = scalar_lea.hbm %s1698_s12, 1  ;;  %p1702_p9 = scmp.lt.s32.totalorder %s1698_s12, %s2973_s3 }
 0x12f   :  { %p1700_p8 = scmp.ne.s32.totalorder %s1698_s12, %s1699_s1  ;;  %p1703_p10 = scmp.lt.s32.totalorder %s2516_s27, %s1699_s1 }
 0x131   :  { %p1704_p11 = por %p1703_p10, %p1702_p9 }
 0x133   :  { %p1705_p12 = pnand %p1704_p11, %p1700_p8 }
 0x135   :  { %1708 = shalt.err (!%p1705_p12)  }
 0x136   :  { %429 = dma.hbm_to_vmem [thread:$0]  %s425_s9, 16, %s427_s28, [#allocation3] }
 0x137   :  { %s445_s15 = scalar_lea.hbm %s2975_s5, %s2727_s7  ;;  %s2424_s20 = smov [#allocation2 + $0x18]  }
 0x138   :  { %s441_s8 = sshll.u32 %s2424_s20, 4  ;;  %s2752_s17 = sshll.u32 %s445_s15, 4  ;;  %s442_s8 = int_to_ptr.vmem [resolvable:$true] %s441_s8  ;;  %s455_s17 = int_to_ptr.hbm [resolvable:$true] %s2752_s17 }
 0x139   :  { %s2755_s18 = sld [smem:[#allocation5 + $0x9]]  ;;  %s430_s22 = scalar_lea.hbm %s2974_s4, %s1024_s21 }
 0x13a   :  { %s2425_s0 = smov [#allocation2 + $0x28]   ;;  %s439_s25 = sshll.u32 %s430_s22, 4  ;;  %s440_s25 = int_to_ptr.hbm [resolvable:$true] %s439_s25 }
 0x13b   :  { %s456_s11 = sshll.u32 %s2425_s0, 4  ;;  %s1721_s7 = sshra.s32 %s440_s25, 4  ;;  %s457_s11 = int_to_ptr.vmem [resolvable:$true] %s456_s11  ;;  %s1722_s7 = int_to_ptr.hbm [resolvable:$true] %s1721_s7 }
 0x13c   :  { %s1723_s19 = scalar_lea.hbm %s1722_s7, 1  ;;  %p1726_p0 = scmp.lt.s32.totalorder %s1722_s7, %s2974_s4 }
 0x13d   :  { %p1724_p13 = scmp.ne.s32.totalorder %s1722_s7, %s1723_s19  ;;  %p1727_p1 = scmp.lt.s32.totalorder %s2525_s13, %s1723_s19 }
 0x13f   :  { %p1728_p2 = por %p1727_p1, %p1726_p0 }
 0x141   :  { %p1729_p3 = pnand %p1728_p2, %p1724_p13 }
 0x143   :  { %1732 = shalt.err (!%p1729_p3)  }
 0x144   :  { %444 = dma.hbm_to_vmem [thread:$0]  %s440_s25, 16, %s442_s8, [#allocation3 + $0x1] }
 0x145   :  { %s1745_s9 = sshra.s32 %s455_s17, 4  ;;  %s1746_s9 = int_to_ptr.hbm [resolvable:$true] %s1745_s9 }
 0x146   :  { %s1747_s21 = scalar_lea.hbm %s1746_s9, 1  ;;  %p1750_p5 = scmp.lt.s32.totalorder %s1746_s9, %s2975_s5 }
 0x147   :  { %p1748_p4 = scmp.ne.s32.totalorder %s1746_s9, %s1747_s21  ;;  %p1751_p6 = scmp.lt.s32.totalorder %s2540_s23, %s1747_s21 }
 0x149   :  { %p1752_p7 = por %p1751_p6, %p1750_p5 }
 0x14b   :  { %p1753_p8 = pnand %p1752_p7, %p1748_p4 }
 0x14d   :  { %1756 = shalt.err (!%p1753_p8)  }
 0x14e   :  { %459 = dma.hbm_to_vmem [thread:$0]  %s455_s17, 16, %s457_s11, [#allocation3 + $0x2] }
 0x14f   :  { %s463_s30 = scalar_lea.hbm %s2973_s3, %s2755_s18  ;;  %s2426_s14 = smov [#allocation2 + $0x9]  }
 0x150   :  { %s474_s15 = sshll.u32 %s2426_s14, 4  ;;  %s472_s20 = sshll.u32 %s463_s30, 4  ;;  %s475_s15 = int_to_ptr.vmem [resolvable:$true] %s474_s15  ;;  %s473_s20 = int_to_ptr.hbm [resolvable:$true] %s472_s20 }
 0x151   :  { %s1026_s8 = sld [smem:[#allocation6 + $0x9]]  ;;  %s1769_s24 = sshra.s32 %s473_s20, 4  ;;  %s1770_s24 = int_to_ptr.hbm [resolvable:$true] %s1769_s24 }
 0x152   :  { %s1771_s29 = scalar_lea.hbm %s1770_s24, 1  ;;  %p1774_p10 = scmp.lt.s32.totalorder %s1770_s24, %s2973_s3 }
 0x153   :  { %p1772_p9 = scmp.ne.s32.totalorder %s1770_s24, %s1771_s29  ;;  %p1775_p11 = scmp.lt.s32.totalorder %s2516_s27, %s1771_s29 }
 0x155   :  { %p1776_p12 = por %p1775_p11, %p1774_p10 }
 0x157   :  { %p1777_p13 = pnand %p1776_p12, %p1772_p9 }
 0x159   :  { %1780 = shalt.err (!%p1777_p13)  }
 0x15a   :  { %477 = dma.hbm_to_vmem [thread:$0]  %s473_s20, 16, %s475_s15, [#allocation3] }
 0x15b   :  { %s493_s25 = scalar_lea.hbm %s2975_s5, %s2755_s18  ;;  %s2427_s7 = smov [#allocation2 + $0x19]  }
 0x15c   :  { %s489_s19 = sshll.u32 %s2427_s7, 4  ;;  %s2780_s26 = sshll.u32 %s493_s25, 4  ;;  %s490_s19 = int_to_ptr.vmem [resolvable:$true] %s489_s19  ;;  %s503_s26 = int_to_ptr.hbm [resolvable:$true] %s2780_s26 }
 0x15d   :  { %s2783_s28 = sld [smem:[#allocation5 + $0xa]]  ;;  %s478_s12 = scalar_lea.hbm %s2974_s4, %s1026_s8 }
 0x15e   :  { %s2428_s1 = smov [#allocation2 + $0x29]   ;;  %s487_s10 = sshll.u32 %s478_s12, 4  ;;  %s488_s10 = int_to_ptr.hbm [resolvable:$true] %s487_s10 }
 0x15f   :  { %s504_s16 = sshll.u32 %s2428_s1, 4  ;;  %s1793_s18 = sshra.s32 %s488_s10, 4  ;;  %s505_s16 = int_to_ptr.vmem [resolvable:$true] %s504_s16  ;;  %s1794_s18 = int_to_ptr.hbm [resolvable:$true] %s1793_s18 }
 0x160   :  { %s1795_s30 = scalar_lea.hbm %s1794_s18, 1  ;;  %p1798_p1 = scmp.lt.s32.totalorder %s1794_s18, %s2974_s4 }
 0x161   :  { %p1796_p0 = scmp.ne.s32.totalorder %s1794_s18, %s1795_s30  ;;  %p1799_p2 = scmp.lt.s32.totalorder %s2525_s13, %s1795_s30 }
 0x163   :  { %p1800_p3 = por %p1799_p2, %p1798_p1 }
 0x165   :  { %p1801_p4 = pnand %p1800_p3, %p1796_p0 }
 0x167   :  { %1804 = shalt.err (!%p1801_p4)  }
 0x168   :  { %492 = dma.hbm_to_vmem [thread:$0]  %s488_s10, 16, %s490_s19, [#allocation3 + $0x1] }
 0x169   :  { %s1817_s20 = sshra.s32 %s503_s26, 4  ;;  %s1818_s20 = int_to_ptr.hbm [resolvable:$true] %s1817_s20 }
 0x16a   :  { %s1819_s8 = scalar_lea.hbm %s1818_s20, 1  ;;  %p1822_p6 = scmp.lt.s32.totalorder %s1818_s20, %s2975_s5 }
 0x16b   :  { %p1820_p5 = scmp.ne.s32.totalorder %s1818_s20, %s1819_s8  ;;  %p1823_p7 = scmp.lt.s32.totalorder %s2540_s23, %s1819_s8 }
 0x16d   :  { %p1824_p8 = por %p1823_p7, %p1822_p6 }
 0x16f   :  { %p1825_p9 = pnand %p1824_p8, %p1820_p5 }
 0x171   :  { %1828 = shalt.err (!%p1825_p9)  }
 0x172   :  { %507 = dma.hbm_to_vmem [thread:$0]  %s503_s26, 16, %s505_s16, [#allocation3 + $0x2] }
 0x173   :  { %s511_s17 = scalar_lea.hbm %s2973_s3, %s2783_s28  ;;  %s2429_s11 = smov [#allocation2 + $0xa]  }
 0x174   :  { %s522_s25 = sshll.u32 %s2429_s11, 4  ;;  %s520_s7 = sshll.u32 %s511_s17, 4  ;;  %s523_s25 = int_to_ptr.vmem [resolvable:$true] %s522_s25  ;;  %s521_s7 = int_to_ptr.hbm [resolvable:$true] %s520_s7 }
 0x175   :  { %s1028_s19 = sld [smem:[#allocation6 + $0xa]]  ;;  %s1841_s9 = sshra.s32 %s521_s7, 4  ;;  %s1842_s9 = int_to_ptr.hbm [resolvable:$true] %s1841_s9 }
 0x176   :  { %s1843_s21 = scalar_lea.hbm %s1842_s9, 1  ;;  %p1846_p11 = scmp.lt.s32.totalorder %s1842_s9, %s2973_s3 }
 0x177   :  { %p1844_p10 = scmp.ne.s32.totalorder %s1842_s9, %s1843_s21  ;;  %p1847_p12 = scmp.lt.s32.totalorder %s2516_s27, %s1843_s21 }
 0x179   :  { %p1848_p13 = por %p1847_p12, %p1846_p11 }
 0x17b   :  { %p1849_p0 = pnand %p1848_p13, %p1844_p10 }
 0x17d   :  { %1852 = shalt.err (!%p1849_p0)  }
 0x17e   :  { %525 = dma.hbm_to_vmem [thread:$0]  %s521_s7, 16, %s523_s25, [#allocation3] }
 0x17f   :  { %s541_s10 = scalar_lea.hbm %s2975_s5, %s2783_s28  ;;  %s2430_s18 = smov [#allocation2 + $0x1a]  }
 0x180   :  { %s537_s30 = sshll.u32 %s2430_s18, 4  ;;  %s2808_s14 = sshll.u32 %s541_s10, 4  ;;  %s538_s30 = int_to_ptr.vmem [resolvable:$true] %s537_s30  ;;  %s551_s14 = int_to_ptr.hbm [resolvable:$true] %s2808_s14 }
 0x181   :  { %s2811_s15 = sld [smem:[#allocation5 + $0xb]]  ;;  %s526_s24 = scalar_lea.hbm %s2974_s4, %s1028_s19 }
 0x182   :  { %s2431_s29 = smov [#allocation2 + $0x2a]   ;;  %s535_s0 = sshll.u32 %s526_s24, 4  ;;  %s536_s0 = int_to_ptr.hbm [resolvable:$true] %s535_s0 }
 0x183   :  { %s552_s22 = sshll.u32 %s2431_s29, 4  ;;  %s1865_s28 = sshra.s32 %s536_s0, 4  ;;  %s553_s22 = int_to_ptr.vmem [resolvable:$true] %s552_s22  ;;  %s1866_s28 = int_to_ptr.hbm [resolvable:$true] %s1865_s28 }
 0x184   :  { %s1867_s17 = scalar_lea.hbm %s1866_s28, 1  ;;  %p1870_p2 = scmp.lt.s32.totalorder %s1866_s28, %s2974_s4 }
 0x185   :  { %p1868_p1 = scmp.ne.s32.totalorder %s1866_s28, %s1867_s17  ;;  %p1871_p3 = scmp.lt.s32.totalorder %s2525_s13, %s1867_s17 }
 0x187   :  { %p1872_p4 = por %p1871_p3, %p1870_p2 }
 0x189   :  { %p1873_p5 = pnand %p1872_p4, %p1868_p1 }
 0x18b   :  { %1876 = shalt.err (!%p1873_p5)  }
 0x18c   :  { %540 = dma.hbm_to_vmem [thread:$0]  %s536_s0, 16, %s538_s30, [#allocation3 + $0x1] }
 0x18d   :  { %s1889_s7 = sshra.s32 %s551_s14, 4  ;;  %s1890_s7 = int_to_ptr.hbm [resolvable:$true] %s1889_s7 }
 0x18e   :  { %s1891_s19 = scalar_lea.hbm %s1890_s7, 1  ;;  %p1894_p7 = scmp.lt.s32.totalorder %s1890_s7, %s2975_s5 }
 0x18f   :  { %p1892_p6 = scmp.ne.s32.totalorder %s1890_s7, %s1891_s19  ;;  %p1895_p8 = scmp.lt.s32.totalorder %s2540_s23, %s1891_s19 }
 0x191   :  { %p1896_p9 = por %p1895_p8, %p1894_p7 }
 0x193   :  { %p1897_p10 = pnand %p1896_p9, %p1892_p6 }
 0x195   :  { %1900 = shalt.err (!%p1897_p10)  }
 0x196   :  { %555 = dma.hbm_to_vmem [thread:$0]  %s551_s14, 16, %s553_s22, [#allocation3 + $0x2] }
 0x197   :  { %s559_s26 = scalar_lea.hbm %s2973_s3, %s2811_s15  ;;  %s2432_s16 = smov [#allocation2 + $0xb]  }
 0x198   :  { %s570_s10 = sshll.u32 %s2432_s16, 4  ;;  %s568_s18 = sshll.u32 %s559_s26, 4  ;;  %s571_s10 = int_to_ptr.vmem [resolvable:$true] %s570_s10  ;;  %s569_s18 = int_to_ptr.hbm [resolvable:$true] %s568_s18 }
 0x199   :  { %s1030_s30 = sld [smem:[#allocation6 + $0xb]]  ;;  %s1913_s20 = sshra.s32 %s569_s18, 4  ;;  %s1914_s20 = int_to_ptr.hbm [resolvable:$true] %s1913_s20 }
 0x19a   :  { %s1915_s8 = scalar_lea.hbm %s1914_s20, 1  ;;  %p1918_p12 = scmp.lt.s32.totalorder %s1914_s20, %s2973_s3 }
 0x19b   :  { %p1916_p11 = scmp.ne.s32.totalorder %s1914_s20, %s1915_s8  ;;  %p1919_p13 = scmp.lt.s32.totalorder %s2516_s27, %s1915_s8 }
 0x19d   :  { %p1920_p0 = por %p1919_p13, %p1918_p12 }
 0x19f   :  { %p1921_p1 = pnand %p1920_p0, %p1916_p11 }
 0x1a1   :  { %1924 = shalt.err (!%p1921_p1)  }
 0x1a2   :  { %573 = dma.hbm_to_vmem [thread:$0]  %s569_s18, 16, %s571_s10, [#allocation3] }
 0x1a3   :  { %s589_s0 = scalar_lea.hbm %s2975_s5, %s2811_s15  ;;  %s2433_s28 = smov [#allocation2 + $0x1b]  }
 0x1a4   :  { %s585_s17 = sshll.u32 %s2433_s28, 4  ;;  %s2836_s11 = sshll.u32 %s589_s0, 4  ;;  %s586_s17 = int_to_ptr.vmem [resolvable:$true] %s585_s17  ;;  %s599_s11 = int_to_ptr.hbm [resolvable:$true] %s2836_s11 }
 0x1a5   :  { %s2839_s25 = sld [smem:[#allocation5 + $0xc]]  ;;  %s574_s9 = scalar_lea.hbm %s2974_s4, %s1030_s30 }
 0x1a6   :  { %s2434_s21 = smov [#allocation2 + $0x2b]   ;;  %s583_s1 = sshll.u32 %s574_s9, 4  ;;  %s584_s1 = int_to_ptr.hbm [resolvable:$true] %s583_s1 }
 0x1a7   :  { %s600_s12 = sshll.u32 %s2434_s21, 4  ;;  %s1937_s15 = sshra.s32 %s584_s1, 4  ;;  %s601_s12 = int_to_ptr.vmem [resolvable:$true] %s600_s12  ;;  %s1938_s15 = int_to_ptr.hbm [resolvable:$true] %s1937_s15 }
 0x1a8   :  { %s1939_s26 = scalar_lea.hbm %s1938_s15, 1  ;;  %p1942_p3 = scmp.lt.s32.totalorder %s1938_s15, %s2974_s4 }
 0x1a9   :  { %p1940_p2 = scmp.ne.s32.totalorder %s1938_s15, %s1939_s26  ;;  %p1943_p4 = scmp.lt.s32.totalorder %s2525_s13, %s1939_s26 }
 0x1ab   :  { %p1944_p5 = por %p1943_p4, %p1942_p3 }
 0x1ad   :  { %p1945_p6 = pnand %p1944_p5, %p1940_p2 }
 0x1af   :  { %1948 = shalt.err (!%p1945_p6)  }
 0x1b0   :  { %588 = dma.hbm_to_vmem [thread:$0]  %s584_s1, 16, %s586_s17, [#allocation3 + $0x1] }
 0x1b1   :  { %s1961_s18 = sshra.s32 %s599_s11, 4  ;;  %s1962_s18 = int_to_ptr.hbm [resolvable:$true] %s1961_s18 }
 0x1b2   :  { %s1963_s30 = scalar_lea.hbm %s1962_s18, 1  ;;  %p1966_p8 = scmp.lt.s32.totalorder %s1962_s18, %s2975_s5 }
 0x1b3   :  { %p1964_p7 = scmp.ne.s32.totalorder %s1962_s18, %s1963_s30  ;;  %p1967_p9 = scmp.lt.s32.totalorder %s2540_s23, %s1963_s30 }
 0x1b5   :  { %p1968_p10 = por %p1967_p9, %p1966_p8 }
 0x1b7   :  { %p1969_p11 = pnand %p1968_p10, %p1964_p7 }
 0x1b9   :  { %1972 = shalt.err (!%p1969_p11)  }
 0x1ba   :  { %603 = dma.hbm_to_vmem [thread:$0]  %s599_s11, 16, %s601_s12, [#allocation3 + $0x2] }
 0x1bb   :  { %s607_s14 = scalar_lea.hbm %s2973_s3, %s2839_s25  ;;  %s2435_s22 = smov [#allocation2 + $0xc]  }
 0x1bc   :  { %s618_s0 = sshll.u32 %s2435_s22, 4  ;;  %s616_s28 = sshll.u32 %s607_s14, 4  ;;  %s619_s0 = int_to_ptr.vmem [resolvable:$true] %s618_s0  ;;  %s617_s28 = int_to_ptr.hbm [resolvable:$true] %s616_s28 }
 0x1bd   :  { %s1032_s17 = sld [smem:[#allocation6 + $0xc]]  ;;  %s1985_s7 = sshra.s32 %s617_s28, 4  ;;  %s1986_s7 = int_to_ptr.hbm [resolvable:$true] %s1985_s7 }
 0x1be   :  { %s1987_s19 = scalar_lea.hbm %s1986_s7, 1  ;;  %p1990_p13 = scmp.lt.s32.totalorder %s1986_s7, %s2973_s3 }
 0x1bf   :  { %p1988_p12 = scmp.ne.s32.totalorder %s1986_s7, %s1987_s19  ;;  %p1991_p0 = scmp.lt.s32.totalorder %s2516_s27, %s1987_s19 }
 0x1c1   :  { %p1992_p1 = por %p1991_p0, %p1990_p13 }
 0x1c3   :  { %p1993_p2 = pnand %p1992_p1, %p1988_p12 }
 0x1c5   :  { %1996 = shalt.err (!%p1993_p2)  }
 0x1c6   :  { %621 = dma.hbm_to_vmem [thread:$0]  %s617_s28, 16, %s619_s0, [#allocation3] }
 0x1c7   :  { %s637_s1 = scalar_lea.hbm %s2975_s5, %s2839_s25  ;;  %s2436_s15 = smov [#allocation2 + $0x1c]  }
 0x1c8   :  { %s633_s26 = sshll.u32 %s2436_s15, 4  ;;  %s2864_s16 = sshll.u32 %s637_s1, 4  ;;  %s634_s26 = int_to_ptr.vmem [resolvable:$true] %s633_s26  ;;  %s647_s16 = int_to_ptr.hbm [resolvable:$true] %s2864_s16 }
 0x1c9   :  { %s2867_s10 = sld [smem:[#allocation5 + $0xd]]  ;;  %s622_s20 = scalar_lea.hbm %s2974_s4, %s1032_s17 }
 0x1ca   :  { %s2437_s8 = smov [#allocation2 + $0x2c]   ;;  %s631_s29 = sshll.u32 %s622_s20, 4  ;;  %s632_s29 = int_to_ptr.hbm [resolvable:$true] %s631_s29 }
 0x1cb   :  { %s648_s24 = sshll.u32 %s2437_s8, 4  ;;  %s2009_s25 = sshra.s32 %s632_s29, 4  ;;  %s649_s24 = int_to_ptr.vmem [resolvable:$true] %s648_s24  ;;  %s2010_s25 = int_to_ptr.hbm [resolvable:$true] %s2009_s25 }
 0x1cc   :  { %s2011_s14 = scalar_lea.hbm %s2010_s25, 1  ;;  %p2014_p4 = scmp.lt.s32.totalorder %s2010_s25, %s2974_s4 }
 0x1cd   :  { %p2012_p3 = scmp.ne.s32.totalorder %s2010_s25, %s2011_s14  ;;  %p2015_p5 = scmp.lt.s32.totalorder %s2525_s13, %s2011_s14 }
 0x1cf   :  { %p2016_p6 = por %p2015_p5, %p2014_p4 }
 0x1d1   :  { %p2017_p7 = pnand %p2016_p6, %p2012_p3 }
 0x1d3   :  { %2020 = shalt.err (!%p2017_p7)  }
 0x1d4   :  { %636 = dma.hbm_to_vmem [thread:$0]  %s632_s29, 16, %s634_s26, [#allocation3 + $0x1] }
 0x1d5   :  { %s2033_s28 = sshra.s32 %s647_s16, 4  ;;  %s2034_s28 = int_to_ptr.hbm [resolvable:$true] %s2033_s28 }
 0x1d6   :  { %s2035_s17 = scalar_lea.hbm %s2034_s28, 1  ;;  %p2038_p9 = scmp.lt.s32.totalorder %s2034_s28, %s2975_s5 }
 0x1d7   :  { %p2036_p8 = scmp.ne.s32.totalorder %s2034_s28, %s2035_s17  ;;  %p2039_p10 = scmp.lt.s32.totalorder %s2540_s23, %s2035_s17 }
 0x1d9   :  { %p2040_p11 = por %p2039_p10, %p2038_p9 }
 0x1db   :  { %p2041_p12 = pnand %p2040_p11, %p2036_p8 }
 0x1dd   :  { %2044 = shalt.err (!%p2041_p12)  }
 0x1de   :  { %651 = dma.hbm_to_vmem [thread:$0]  %s647_s16, 16, %s649_s24, [#allocation3 + $0x2] }
 0x1df   :  { %s655_s11 = scalar_lea.hbm %s2973_s3, %s2867_s10  ;;  %s2438_s12 = smov [#allocation2 + $0xd]  }
 0x1e0   :  { %s666_s1 = sshll.u32 %s2438_s12, 4  ;;  %s664_s15 = sshll.u32 %s655_s11, 4  ;;  %s667_s1 = int_to_ptr.vmem [resolvable:$true] %s666_s1  ;;  %s665_s15 = int_to_ptr.hbm [resolvable:$true] %s664_s15 }
 0x1e1   :  { %s1034_s26 = sld [smem:[#allocation6 + $0xd]]  ;;  %s2057_s18 = sshra.s32 %s665_s15, 4  ;;  %s2058_s18 = int_to_ptr.hbm [resolvable:$true] %s2057_s18 }
 0x1e2   :  { %s2059_s30 = scalar_lea.hbm %s2058_s18, 1  ;;  %p2062_p0 = scmp.lt.s32.totalorder %s2058_s18, %s2973_s3 }
 0x1e3   :  { %p2060_p13 = scmp.ne.s32.totalorder %s2058_s18, %s2059_s30  ;;  %p2063_p1 = scmp.lt.s32.totalorder %s2516_s27, %s2059_s30 }
 0x1e5   :  { %p2064_p2 = por %p2063_p1, %p2062_p0 }
 0x1e7   :  { %p2065_p3 = pnand %p2064_p2, %p2060_p13 }
 0x1e9   :  { %2068 = shalt.err (!%p2065_p3)  }
 0x1ea   :  { %669 = dma.hbm_to_vmem [thread:$0]  %s665_s15, 16, %s667_s1, [#allocation3] }
 0x1eb   :  { %s685_s29 = scalar_lea.hbm %s2975_s5, %s2867_s10  ;;  %s2439_s25 = smov [#allocation2 + $0x1d]  }
 0x1ec   :  { %s681_s14 = sshll.u32 %s2439_s25, 4  ;;  %s2892_s22 = sshll.u32 %s685_s29, 4  ;;  %s682_s14 = int_to_ptr.vmem [resolvable:$true] %s681_s14  ;;  %s695_s22 = int_to_ptr.hbm [resolvable:$true] %s2892_s22 }
 0x1ed   :  { %s2895_s0 = sld [smem:[#allocation5 + $0xe]]  ;;  %s670_s7 = scalar_lea.hbm %s2974_s4, %s1034_s26 }
 0x1ee   :  { %s2440_s19 = smov [#allocation2 + $0x2d]   ;;  %s679_s21 = sshll.u32 %s670_s7, 4  ;;  %s680_s21 = int_to_ptr.hbm [resolvable:$true] %s679_s21 }
 0x1ef   :  { %s696_s9 = sshll.u32 %s2440_s19, 4  ;;  %s2081_s10 = sshra.s32 %s680_s21, 4  ;;  %s697_s9 = int_to_ptr.vmem [resolvable:$true] %s696_s9  ;;  %s2082_s10 = int_to_ptr.hbm [resolvable:$true] %s2081_s10 }
 0x1f0   :  { %s2083_s11 = scalar_lea.hbm %s2082_s10, 1  ;;  %p2086_p5 = scmp.lt.s32.totalorder %s2082_s10, %s2974_s4 }
 0x1f1   :  { %p2084_p4 = scmp.ne.s32.totalorder %s2082_s10, %s2083_s11  ;;  %p2087_p6 = scmp.lt.s32.totalorder %s2525_s13, %s2083_s11 }
 0x1f3   :  { %p2088_p7 = por %p2087_p6, %p2086_p5 }
 0x1f5   :  { %p2089_p8 = pnand %p2088_p7, %p2084_p4 }
 0x1f7   :  { %2092 = shalt.err (!%p2089_p8)  }
 0x1f8   :  { %684 = dma.hbm_to_vmem [thread:$0]  %s680_s21, 16, %s682_s14, [#allocation3 + $0x1] }
 0x1f9   :  { %s2105_s15 = sshra.s32 %s695_s22, 4  ;;  %s2106_s15 = int_to_ptr.hbm [resolvable:$true] %s2105_s15 }
 0x1fa   :  { %s2107_s26 = scalar_lea.hbm %s2106_s15, 1  ;;  %p2110_p10 = scmp.lt.s32.totalorder %s2106_s15, %s2975_s5 }
 0x1fb   :  { %p2108_p9 = scmp.ne.s32.totalorder %s2106_s15, %s2107_s26  ;;  %p2111_p11 = scmp.lt.s32.totalorder %s2540_s23, %s2107_s26 }
 0x1fd   :  { %p2112_p12 = por %p2111_p11, %p2110_p10 }
 0x1ff   :  { %p2113_p13 = pnand %p2112_p12, %p2108_p9 }
 0x201   :  { %2116 = shalt.err (!%p2113_p13)  }
 0x202   :  { %699 = dma.hbm_to_vmem [thread:$0]  %s695_s22, 16, %s697_s9, [#allocation3 + $0x2] }
 0x203   :  { %s703_s16 = scalar_lea.hbm %s2973_s3, %s2895_s0  ;;  %s2441_s24 = smov [#allocation2 + $0xe]  }
 0x204   :  { %s714_s29 = sshll.u32 %s2441_s24, 4  ;;  %s712_s25 = sshll.u32 %s703_s16, 4  ;;  %s715_s29 = int_to_ptr.vmem [resolvable:$true] %s714_s29  ;;  %s713_s25 = int_to_ptr.hbm [resolvable:$true] %s712_s25 }
 0x205   :  { %s1036_s14 = sld [smem:[#allocation6 + $0xe]]  ;;  %s2129_s28 = sshra.s32 %s713_s25, 4  ;;  %s2130_s28 = int_to_ptr.hbm [resolvable:$true] %s2129_s28 }
 0x206   :  { %s2131_s17 = scalar_lea.hbm %s2130_s28, 1  ;;  %p2134_p1 = scmp.lt.s32.totalorder %s2130_s28, %s2973_s3 }
 0x207   :  { %p2132_p0 = scmp.ne.s32.totalorder %s2130_s28, %s2131_s17  ;;  %p2135_p2 = scmp.lt.s32.totalorder %s2516_s27, %s2131_s17 }
 0x209   :  { %p2136_p3 = por %p2135_p2, %p2134_p1 }
 0x20b   :  { %p2137_p4 = pnand %p2136_p3, %p2132_p0 }
 0x20d   :  { %2140 = shalt.err (!%p2137_p4)  }
 0x20e   :  { %717 = dma.hbm_to_vmem [thread:$0]  %s713_s25, 16, %s715_s29, [#allocation3] }
 0x20f   :  { %s733_s21 = scalar_lea.hbm %s2975_s5, %s2895_s0  ;;  %s2442_s10 = smov [#allocation2 + $0x1e]  }
 0x210   :  { %s729_s11 = sshll.u32 %s2442_s10, 4  ;;  %s2920_s12 = sshll.u32 %s733_s21, 4  ;;  %s730_s11 = int_to_ptr.vmem [resolvable:$true] %s729_s11  ;;  %s743_s12 = int_to_ptr.hbm [resolvable:$true] %s2920_s12 }
 0x211   :  { %s2923_s1 = sld [smem:[#allocation5 + $0xf]]  ;;  %s718_s18 = scalar_lea.hbm %s2974_s4, %s1036_s14 }
 0x212   :  { %s2443_s30 = smov [#allocation2 + $0x2e]   ;;  %s727_s8 = sshll.u32 %s718_s18, 4  ;;  %s728_s8 = int_to_ptr.hbm [resolvable:$true] %s727_s8 }
 0x213   :  { %s744_s20 = sshll.u32 %s2443_s30, 4  ;;  %s2153_s0 = sshra.s32 %s728_s8, 4  ;;  %s745_s20 = int_to_ptr.vmem [resolvable:$true] %s744_s20  ;;  %s2154_s0 = int_to_ptr.hbm [resolvable:$true] %s2153_s0 }
 0x214   :  { %s2155_s16 = scalar_lea.hbm %s2154_s0, 1  ;;  %p2158_p6 = scmp.lt.s32.totalorder %s2154_s0, %s2974_s4 }
 0x215   :  { %p2156_p5 = scmp.ne.s32.totalorder %s2154_s0, %s2155_s16  ;;  %p2159_p7 = scmp.lt.s32.totalorder %s2525_s13, %s2155_s16 }
 0x217   :  { %p2160_p8 = por %p2159_p7, %p2158_p6 }
 0x219   :  { %p2161_p9 = pnand %p2160_p8, %p2156_p5 }
 0x21b   :  { %2164 = shalt.err (!%p2161_p9)  }
 0x21c   :  { %732 = dma.hbm_to_vmem [thread:$0]  %s728_s8, 16, %s730_s11, [#allocation3 + $0x1] }
 0x21d   :  { %s2177_s25 = sshra.s32 %s743_s12, 4  ;;  %s2178_s25 = int_to_ptr.hbm [resolvable:$true] %s2177_s25 }
 0x21e   :  { %s2179_s14 = scalar_lea.hbm %s2178_s25, 1  ;;  %p2182_p11 = scmp.lt.s32.totalorder %s2178_s25, %s2975_s5 }
 0x21f   :  { %p2180_p10 = scmp.ne.s32.totalorder %s2178_s25, %s2179_s14  ;;  %p2183_p12 = scmp.lt.s32.totalorder %s2540_s23, %s2179_s14 }
 0x221   :  { %p2184_p13 = por %p2183_p12, %p2182_p11 }
 0x223   :  { %p2185_p0 = pnand %p2184_p13, %p2180_p10 }
 0x225   :  { %2188 = shalt.err (!%p2185_p0)  }
 0x226   :  { %747 = dma.hbm_to_vmem [thread:$0]  %s743_s12, 16, %s745_s20, [#allocation3 + $0x2] }
 0x227   :  { %s751_s22 = scalar_lea.hbm %s2973_s3, %s2923_s1  ;;  %s2444_s9 = smov [#allocation2 + $0xf]  }
 0x228   :  { %s762_s21 = sshll.u32 %s2444_s9, 4  ;;  %s760_s10 = sshll.u32 %s751_s22, 4  ;;  %s763_s21 = int_to_ptr.vmem [resolvable:$true] %s762_s21  ;;  %s761_s10 = int_to_ptr.hbm [resolvable:$true] %s760_s10 }
 0x229   :  { %s1038_s11 = sld [smem:[#allocation6 + $0xf]]  ;;  %s2201_s15 = sshra.s32 %s761_s10, 4  ;;  %s2202_s15 = int_to_ptr.hbm [resolvable:$true] %s2201_s15 }
 0x22a   :  { %s2203_s26 = scalar_lea.hbm %s2202_s15, 1  ;;  %p2206_p2 = scmp.lt.s32.totalorder %s2202_s15, %s2973_s3 }
 0x22b   :  { %p2204_p1 = scmp.ne.s32.totalorder %s2202_s15, %s2203_s26  ;;  %p2207_p3 = scmp.lt.s32.totalorder %s2516_s27, %s2203_s26 }
 0x22d   :  { %p2208_p4 = por %p2207_p3, %p2206_p2 }
 0x22f   :  { %p2209_p5 = pnand %p2208_p4, %p2204_p1 }
 0x231   :  { %2212 = shalt.err (!%p2209_p5)  }
 0x232   :  { %765 = dma.hbm_to_vmem [thread:$0]  %s761_s10, 16, %s763_s21, [#allocation3] }
 0x233   :  { %s781_s8 = scalar_lea.hbm %s2975_s5, %s2923_s1  ;;  %s2445_s0 = smov [#allocation2 + $0x1f]  }
 0x234   :  { %s777_s16 = sshll.u32 %s2445_s0, 4  ;;  %s2948_s24 = sshll.u32 %s781_s8, 4  ;;  %s778_s16 = int_to_ptr.vmem [resolvable:$true] %s777_s16  ;;  %s791_s24 = int_to_ptr.hbm [resolvable:$true] %s2948_s24 }
 0x235   :  { %s766_s27 = scalar_lea.hbm %s2974_s4, %s1038_s11  ;;  %s2446_s25 = smov [#allocation2 + $0x2f]  }
 0x236   :  { %s792_s14 = sshll.u32 %s2446_s25, 4  ;;  %s775_s28 = sshll.u32 %s766_s27, 4  ;;  %s793_s14 = int_to_ptr.vmem [resolvable:$true] %s792_s14  ;;  %s776_s28 = int_to_ptr.hbm [resolvable:$true] %s775_s28 }
 0x237   :  { %s2225_s17 = sshra.s32 %s776_s28, 4  ;;  %s2226_s17 = int_to_ptr.hbm [resolvable:$true] %s2225_s17 }
 0x238   :  { %s2227_s1 = scalar_lea.hbm %s2226_s17, 1  ;;  %p2230_p7 = scmp.lt.s32.totalorder %s2226_s17, %s2974_s4 }
 0x239   :  { %p2228_p6 = scmp.ne.s32.totalorder %s2226_s17, %s2227_s1  ;;  %p2231_p8 = scmp.lt.s32.totalorder %s2525_s13, %s2227_s1 }
 0x23b   :  { %p2232_p9 = por %p2231_p8, %p2230_p7 }
 0x23d   :  { %p2233_p10 = pnand %p2232_p9, %p2228_p6 }
 0x23f   :  { %2236 = shalt.err (!%p2233_p10)  }
 0x240   :  { %780 = dma.hbm_to_vmem [thread:$0]  %s776_s28, 16, %s778_s16, [#allocation3 + $0x1] }
 0x241   :  { %s2249_s22 = sshra.s32 %s791_s24, 4  ;;  %s2250_s22 = int_to_ptr.hbm [resolvable:$true] %s2249_s22 }
 0x242   :  { %s2251_s9 = scalar_lea.hbm %s2250_s22, 1  ;;  %p2254_p12 = scmp.lt.s32.totalorder %s2250_s22, %s2975_s5 }
 0x243   :  { %p2252_p11 = scmp.ne.s32.totalorder %s2250_s22, %s2251_s9  ;;  %p2255_p13 = scmp.lt.s32.totalorder %s2540_s23, %s2251_s9 }
 0x245   :  { %p2256_p0 = por %p2255_p13, %p2254_p12 }
 0x247   :  { %p2257_p1 = pnand %p2256_p0, %p2252_p11 }
 0x249   :  { %2260 = shalt.err (!%p2257_p1)  }
 0x24a   :  { %795 = dma.hbm_to_vmem [thread:$0]  %s791_s24, 16, %s793_s14, [#allocation3 + $0x2] }
 0x24b   :  { %2299 = dma.done.wait [#allocation3], 16 }
 0x24c   :  { %2300 = vsyncadd [#allocation3], 4294967280 }
 0x24d   :  { %2301 = dma.done.wait [#allocation3 + $0x1], 16 }
 0x24e   :  { %2302 = vsyncadd [#allocation3 + $0x1], 4294967280 }
 0x24f   :  { %2303 = dma.done.wait [#allocation3 + $0x2], 16 }
 0x250   :  { %2304 = vsyncadd [#allocation3 + $0x2], 4294967280 }
 0x251   :  { %2305 = dma.done.wait [#allocation3], 16 }
 0x252   :  { %2306 = vsyncadd [#allocation3], 4294967280 }
 0x253   :  { %2307 = dma.done.wait [#allocation3 + $0x1], 16 }
 0x254   :  { %2308 = vsyncadd [#allocation3 + $0x1], 4294967280 }
 0x255   :  { %2309 = dma.done.wait [#allocation3 + $0x2], 16 }
 0x256   :  { %2310 = vsyncadd [#allocation3 + $0x2], 4294967280 }
 0x257   :  { %2311 = dma.done.wait [#allocation3], 16 }
 0x258   :  { %2312 = vsyncadd [#allocation3], 4294967280 }
 0x259   :  { %2313 = dma.done.wait [#allocation3 + $0x1], 16 }
 0x25a   :  { %2314 = vsyncadd [#allocation3 + $0x1], 4294967280 }
 0x25b   :  { %2315 = dma.done.wait [#allocation3 + $0x2], 16 }
 0x25c   :  { %2316 = vsyncadd [#allocation3 + $0x2], 4294967280 }
 0x25d   :  { %2317 = dma.done.wait [#allocation3], 16 }
 0x25e   :  { %2318 = vsyncadd [#allocation3], 4294967280 }
 0x25f   :  { %2319 = dma.done.wait [#allocation3 + $0x1], 16 }
 0x260   :  { %2320 = vsyncadd [#allocation3 + $0x1], 4294967280 }
 0x261   :  { %2321 = dma.done.wait [#allocation3 + $0x2], 16 }
 0x262   :  { %2322 = vsyncadd [#allocation3 + $0x2], 4294967280 }
 0x263   :  { %2323 = dma.done.wait [#allocation3], 16 }
 0x264   :  { %2324 = vsyncadd [#allocation3], 4294967280 }
 0x265   :  { %2325 = dma.done.wait [#allocation3 + $0x1], 16 }
 0x266   :  { %2326 = vsyncadd [#allocation3 + $0x1], 4294967280 }
 0x267   :  { %2327 = dma.done.wait [#allocation3 + $0x2], 16 }
 0x268   :  { %2328 = vsyncadd [#allocation3 + $0x2], 4294967280 }
 0x269   :  { %2329 = dma.done.wait [#allocation3], 16 }
 0x26a   :  { %2330 = vsyncadd [#allocation3], 4294967280 }
 0x26b   :  { %2331 = dma.done.wait [#allocation3 + $0x1], 16 }
 0x26c   :  { %2332 = vsyncadd [#allocation3 + $0x1], 4294967280 }
 0x26d   :  { %2333 = dma.done.wait [#allocation3 + $0x2], 16 }
 0x26e   :  { %2334 = vsyncadd [#allocation3 + $0x2], 4294967280 }
 0x26f   :  { %2335 = dma.done.wait [#allocation3], 16 }
 0x270   :  { %2336 = vsyncadd [#allocation3], 4294967280 }
 0x271   :  { %2337 = dma.done.wait [#allocation3 + $0x1], 16 }
 0x272   :  { %2338 = vsyncadd [#allocation3 + $0x1], 4294967280 }
 0x273   :  { %2339 = dma.done.wait [#allocation3 + $0x2], 16 }
 0x274   :  { %2340 = vsyncadd [#allocation3 + $0x2], 4294967280 }
 0x275   :  { %2341 = dma.done.wait [#allocation3], 16 }
 0x276   :  { %2342 = vsyncadd [#allocation3], 4294967280 }
 0x277   :  { %2343 = dma.done.wait [#allocation3 + $0x1], 16 }
 0x278   :  { %2344 = vsyncadd [#allocation3 + $0x1], 4294967280 }
 0x279   :  { %2345 = dma.done.wait [#allocation3 + $0x2], 16 }
 0x27a   :  { %2346 = vsyncadd [#allocation3 + $0x2], 4294967280 }
 0x27b   :  { %2347 = dma.done.wait [#allocation3], 16 }
 0x27c   :  { %2348 = vsyncadd [#allocation3], 4294967280 }
 0x27d   :  { %2349 = dma.done.wait [#allocation3 + $0x1], 16 }
 0x27e   :  { %2350 = vsyncadd [#allocation3 + $0x1], 4294967280 }
 0x27f   :  { %2351 = dma.done.wait [#allocation3 + $0x2], 16 }
 0x280   :  { %2352 = vsyncadd [#allocation3 + $0x2], 4294967280 }
 0x281   :  { %2353 = dma.done.wait [#allocation3], 16 }
 0x282   :  { %2354 = vsyncadd [#allocation3], 4294967280 }
 0x283   :  { %2355 = dma.done.wait [#allocation3 + $0x1], 16 }
 0x284   :  { %2356 = vsyncadd [#allocation3 + $0x1], 4294967280 }
 0x285   :  { %2357 = dma.done.wait [#allocation3 + $0x2], 16 }
 0x286   :  { %2358 = vsyncadd [#allocation3 + $0x2], 4294967280 }
 0x287   :  { %2359 = dma.done.wait [#allocation3], 16 }
 0x288   :  { %2360 = vsyncadd [#allocation3], 4294967280 }
 0x289   :  { %2361 = dma.done.wait [#allocation3 + $0x1], 16 }
 0x28a   :  { %2362 = vsyncadd [#allocation3 + $0x1], 4294967280 }
 0x28b   :  { %2363 = dma.done.wait [#allocation3 + $0x2], 16 }
 0x28c   :  { %2364 = vsyncadd [#allocation3 + $0x2], 4294967280 }
 0x28d   :  { %2365 = dma.done.wait [#allocation3], 16 }
 0x28e   :  { %2366 = vsyncadd [#allocation3], 4294967280 }
 0x28f   :  { %2367 = dma.done.wait [#allocation3 + $0x1], 16 }
 0x290   :  { %2368 = vsyncadd [#allocation3 + $0x1], 4294967280 }
 0x291   :  { %2369 = dma.done.wait [#allocation3 + $0x2], 16 }
 0x292   :  { %2370 = vsyncadd [#allocation3 + $0x2], 4294967280 }
 0x293   :  { %2371 = dma.done.wait [#allocation3], 16 }
 0x294   :  { %2372 = vsyncadd [#allocation3], 4294967280 }
 0x295   :  { %2373 = dma.done.wait [#allocation3 + $0x1], 16 }
 0x296   :  { %2374 = vsyncadd [#allocation3 + $0x1], 4294967280 }
 0x297   :  { %2375 = dma.done.wait [#allocation3 + $0x2], 16 }
 0x298   :  { %2376 = vsyncadd [#allocation3 + $0x2], 4294967280 }
 0x299   :  { %2377 = dma.done.wait [#allocation3], 16 }
 0x29a   :  { %2378 = vsyncadd [#allocation3], 4294967280 }
 0x29b   :  { %2379 = dma.done.wait [#allocation3 + $0x1], 16 }
 0x29c   :  { %2380 = vsyncadd [#allocation3 + $0x1], 4294967280 }
 0x29d   :  { %2381 = dma.done.wait [#allocation3 + $0x2], 16 }
 0x29e   :  { %2382 = vsyncadd [#allocation3 + $0x2], 4294967280 }
 0x29f   :  { %2383 = dma.done.wait [#allocation3], 16 }
 0x2a0   :  { %2384 = vsyncadd [#allocation3], 4294967280 }
 0x2a1   :  { %2385 = dma.done.wait [#allocation3 + $0x1], 16 }
 0x2a2   :  { %2386 = vsyncadd [#allocation3 + $0x1], 4294967280 }
 0x2a3   :  { %2387 = dma.done.wait [#allocation3 + $0x2], 16 }
 0x2a4   :  { %2388 = vsyncadd [#allocation3 + $0x2], 4294967280 }
 0x2a5   :  { %2389 = dma.done.wait [#allocation3], 16 }
 0x2a6   :  { %2390 = vsyncadd [#allocation3], 4294967280 }
 0x2a7   :  { %2391 = dma.done.wait [#allocation3 + $0x1], 16 }
 0x2a8   :  { %2392 = vsyncadd [#allocation3 + $0x1], 4294967280 }
 0x2a9   :  { %2393 = dma.done.wait [#allocation3 + $0x2], 16 }
 0x2aa   :  { %2394 = vsyncadd [#allocation3 + $0x2], 4294967280  ;;  %v2447_v0 = vmov 0   ;;  %v899_v1 = vld [vmem:[%s2972_s2] sm:$0xff]  ;;  %v900_v2 = vld [vmem:[%s2972_s2 + $0x8] sm:$0xff]  ;;  %s2448_s11 = smov [#allocation7]  }
 0x2ab   :  { %1096 = vset.pattern.permute.xlu0 %v2447_v0  ;;  %v893_v3 = vld [vmem:[#allocation2] sm:$0xff]  ;;  %v895_v4 = vld [vmem:[#allocation2 + $0x10] sm:$0xff]  ;;  %v894_v10 = vld [vmem:[#allocation2 + $0x8] sm:$0xff]  ;;  %s927_s15 = sshll.u32 %s2448_s11, 4  ;;  %s929_s18 = sshll.u32 %s2976_s6, 4  ;;  %s928_s15 = int_to_ptr.vmem [resolvable:$true] %s927_s15  ;;  %s930_s18 = int_to_ptr.hbm [resolvable:$true] %s929_s18 }
 0x2ac   :  { %909 = vperm.xlu0 %1096, %v899_v1   ;;  %v901_v5 = vmul.f32 0.5, %v893_v3  ;;  %v903_v6 = vmul.f32 0.5, %v895_v4  ;;  %v897_v7 = vld [vmem:[#allocation2 + $0x20] sm:$0xff]  ;;  %v896_v11 = vld [vmem:[#allocation2 + $0x18] sm:$0xff]  ;;  %v902_v14 = vmul.f32 0.5, %v894_v10  ;;  %v898_v16 = vld [vmem:[#allocation2 + $0x28] sm:$0xff] }
 0x2ad   :  { %v904_v15 = vmul.f32 0.5, %v896_v11  ;;  %s2449_s30 = smov 128   ;;  %s2450_s12 = smov 8  }
 0x2ae   :  { %v905_v8 = vadd.f32 %v903_v6, %v901_v5 }
 0x2af   :  { %v906_v17 = vadd.f32 %v904_v15, %v902_v14 }
 0x2b4   :  { %914 = vperm.xlu0 %1096, %v900_v2  }
 0x31e   :  { %v910_v9 = vpop.permute.xlu0 %909 }
 0x31f   :  { %v917_v12 = vmul.f32 %v910_v9, %v897_v7 }
 0x321   :  { %v919_v13 = vadd.f32 %v917_v12, %v905_v8 }
 0x323   :  { %921 = vst [vmem:[#allocation7] sm:$0xff] %v919_v13 }
 0x326   :  { %v915_v18 = vpop.permute.xlu0 %914 }
 0x327   :  { %v918_v19 = vmul.f32 %v915_v18, %v898_v16 }
 0x329   :  { %v920_v20 = vadd.f32 %v918_v19, %v906_v17 }
 0x32b   :  { %922 = vst [vmem:[#allocation7 + $0x8] sm:$0xff] %v920_v20 }
 0x32c   :  { %935 = dma.vmem_to_hbm [thread:$0]  %s928_s15, 256, %s930_s18, [#allocation8], %s2449_s30, %s2449_s30, %s2450_s12  }
 0x32d   :  { %2395 = dma.done.wait [#allocation8], 256  }
 0x32e   :  { %2396 = vsyncadd [#allocation8], 4294967040 }
 0x32f   :  { %940 = vsyncpa [#allocation8], 1 }
 0x330   :  { %941 = vsyncmov [#allocation3] }
 0x333   :  { %s942_s20 = vpop.sfrf %941 }
 0x334   :  { %p1039_p2 = scmp.ne.s32.totalorder %s942_s20, 0 }
 0x336   :  { %946 = shalt.err (%p1039_p2)  }
 0x337   :  { %948 = vsyncmov [#allocation3 + $0x1] }
 0x33a   :  { %s949_s8 = vpop.sfrf %948 }
 0x33b   :  { %p1040_p3 = scmp.ne.s32.totalorder %s949_s8, 0 }
 0x33d   :  { %953 = shalt.err (%p1040_p3)  }
 0x33e   :  { %955 = vsyncmov [#allocation3 + $0x2] }
 0x341   :  { %s956_s6 = vpop.sfrf %955 }
 0x342   :  { %p1041_p4 = scmp.ne.s32.totalorder %s956_s6, 0 }
 0x344   :  { %960 = shalt.err (%p1041_p4)  }

</bundles_post_ra>
